<compile_context>
chip_gen: v7x
topology: tpu7x:2x2x1
jax: 0.10.0
libtpu: 0.0.40
codegen_flags: <defaults>
</compile_context>

<pallas_src>
import functools

import jax
import jax.numpy as jnp
from jax.experimental import pallas as pl
from jax.experimental.pallas import tpu as pltpu


_CP = 16  # padded channel count (multiple of 8 for f32 and 16 for bf16 packing)


# ----------------------------------------------------------------------------
# Fused Encoder -> Identity Noiser -> Decoder kernel (one image per grid step)
# ----------------------------------------------------------------------------
def _fused_encdec_kernel(img_ref, msg_ref, mask_ref, w_ref, b_ref,
                         enc_ref, dec_ref, act_ref, msgp_ref,
                         *, H, W, n_enc, n_dec):
    CP = _CP
    Hp, Wp = H + 2, W + 2
    Np = Hp * Wp                     # flat padded plane length
    Nc = (H - 1) * Wp + W            # contiguous "covering" range length
    o0 = Wp + 1                      # flat offset of interior pixel (0, 0)
    cdt = act_ref.dtype              # bf16 compute/store dtype for activations

    full_mask = mask_ref[...]                    # (1, Np) f32, 1 at interior
    cov_mask = full_mask[:, o0:o0 + Nc]          # (1, Nc)

    # The two lane strips outside the covering range are read (as zero padding)
    # but never written by layer stores -> re-zero them (tiny; per-core safe).
    act_ref[:, 0:o0] = jnp.zeros((CP, o0), cdt)
    act_ref[:, o0 + Nc:Np] = jnp.zeros((CP, Np - o0 - Nc), cdt)

    # Message plane: broadcast the (channel-padded) message over the interior.
    msgp_ref[...] = (msg_ref[0] * full_mask).astype(cdt)      # (CP, Np)

    # Static parameter cursors into the packed weight / bias stacks.
    cur = {"w": 0, "b": 0}

    def next_w():
        w = w_ref[cur["w"]]; cur["w"] += 1; return w          # (CP, 9*CP) bf16

    def next_b():
        b = b_ref[:, cur["b"]:cur["b"] + 1]; cur["b"] += 1; return b   # (CP, 1) f32

    # Flat padded channel-major sources.
    load_img = lambda s, e: img_ref[0, :, s:e]
    load_msg = lambda s, e: msgp_ref[:, s:e]
    load_act = lambda s, e: act_ref[:, s:e]
    load_enc = lambda s, e: enc_ref[0, :, s:e]

    def conv3x3(load, w, acc=None):
        # im2col fold: each tap is a contiguous lane slice; one matmul per layer.
        slab = jnp.concatenate(
            [load(dy * Wp + dx, dy * Wp + dx + Nc)
             for dy in range(3) for dx in range(3)], axis=0)   # (9*CP, Nc) bf16
        p = jnp.dot(w, slab, preferred_element_type=jnp.float32)  # (CP, Nc) f32
        return p if acc is None else acc + p

    def finish(acc, b, relu):
        y = (acc + b) * cov_mask      # re-zero the in-range halo columns
        return jnp.maximum(y, 0.0) if relu else y

    def store_act(y):
        act_ref[:, o0:o0 + Nc] = y.astype(cdt)

    # ---------------- Encoder conv stack ----------------
    src = load_img
    for _ in range(n_enc):
        store_act(finish(conv3x3(src, next_w()), next_b(), relu=True))
        src = load_act

    # after-concat conv = sum of partial convs over [message | features | image]
    acc = conv3x3(load_msg, next_w())
    acc = conv3x3(load_act, next_w(), acc)
    acc = conv3x3(load_img, next_w(), acc)
    store_act(finish(acc, next_b(), relu=True))

    # final 1x1 conv -> encoded image (plain conv bias, no BN / ReLU)
    w_fin = next_w()[:, 0:CP]                                   # (CP, CP) bf16
    acc = jnp.dot(w_fin, act_ref[:, o0:o0 + Nc],
                  preferred_element_type=jnp.float32)
    y_enc = finish(acc, next_b(), relu=False)                   # (CP, Nc) f32
    # Lane-dense encoded-image output plane; it doubles as the decoder input.
    enc_ref[0, :, 0:o0] = jnp.zeros((CP, o0), cdt)
    enc_ref[0, :, o0 + Nc:Np] = jnp.zeros((CP, Np - o0 - Nc), cdt)
    enc_ref[0, :, o0:o0 + Nc] = y_enc.astype(cdt)

    # ---------------- Noiser: Identity -> Decoder ----------------
    src = load_enc
    y = None
    for li in range(n_dec):
        y = finish(conv3x3(src, next_w()), next_b(), relu=True)
        if li < n_dec - 1:
            store_act(y)
            src = load_act

    # AdaptiveAvgPool2d((1,1)) + Linear(L, L), computed as mean(W @ y) + b
    w_lin = next_w()[:, 0:CP]                                   # (CP, CP) bf16
    z = jnp.dot(w_lin, y.astype(cdt), preferred_element_type=jnp.float32)
    dec_col = jnp.sum(z, axis=1, keepdims=True) * (1.0 / float(H * W)) + next_b()
    dec_ref[0] = dec_col.astype(dec_ref.dtype)                  # (CP, 1)


# ----------------------------------------------------------------------------
# Wrapper: parameter packing + one pallas_call for the whole forward
# ----------------------------------------------------------------------------
def _pack_conv(w, scale):
    """(Cout, Cin, kh, kw) torch-layout weight -> (CP, kh*kw*CP), BN scale folded."""
    co, ci, kh, kw = w.shape
    assert co <= _CP and ci <= _CP
    wf = (w * scale[:, None, None, None]).transpose(0, 2, 3, 1)   # (co, kh, kw, ci)
    wf = jnp.pad(wf, ((0, _CP - co), (0, 0), (0, 0), (0, _CP - ci)))
    return wf.reshape(_CP, kh * kw * _CP)


def _pad_bias(b):
    return jnp.pad(b, (0, _CP - b.shape[0]))


def encoder_decoder_forward(params, image, message):
    """Returns (encoded_image, noised_image, decoded_message). Noiser = Identity."""
    B, H, W, cimg = image.shape
    assert cimg == 3
    L = message.shape[-1]
    assert L <= _CP
    enc_convs, dec_convs = params["enc_convs"], params["dec_convs"]
    n_enc, n_dec = len(enc_convs), len(dec_convs)
    enc_ch = enc_convs[-1]["w"].shape[0]
    assert enc_ch <= _CP and all(cp["w"].shape[0] <= _CP for cp in dec_convs)

    Hp, Wp = H + 2, W + 2
    Np = Hp * Wp
    KW = 9 * _CP

    # ---- pack parameters: BN scale folded into weights, channels padded to CP,
    #      everything stacked into ONE weight tensor + ONE bias tensor.
    acp = params["enc_after_concat"]
    w_ac = acp["w"]                                   # (C, L + C + 3, 3, 3)
    ac_wm = w_ac[:, :L]
    ac_wf = w_ac[:, L:L + enc_ch]
    ac_wi = w_ac[:, L + enc_ch:]

    w_rows, b_cols = [], []
    add_w = lambda wp: w_rows.append(jnp.pad(wp, ((0, 0), (0, KW - wp.shape[1]))))
    add_b = lambda b: b_cols.append(_pad_bias(b))

    for cp in enc_convs:
        add_w(_pack_conv(cp["w"], cp["scale"])); add_b(cp["bias"])
    add_w(_pack_conv(ac_wm, acp["scale"]))            # torch concat order:
    add_w(_pack_conv(ac_wf, acp["scale"]))            # [message | features | image]
    add_w(_pack_conv(ac_wi, acp["scale"]))
    add_b(acp["bias"])
    fp = params["enc_final"]
    add_w(_pack_conv(fp["w"], fp["scale"])); add_b(fp["bias"])
    for cp in dec_convs:
        add_w(_pack_conv(cp["w"], cp["scale"])); add_b(cp["bias"])
    lp = params["dec_linear"]
    add_w(jnp.pad(lp["w"], ((0, _CP - L), (0, _CP - L)))); add_b(lp["b"])

    w_all = jnp.stack(w_rows).astype(jnp.bfloat16)            # (NW, CP, 9*CP)
    b_all = jnp.stack(b_cols, axis=1).astype(jnp.float32)     # (CP, NB)
    NW, NB = w_all.shape[0], b_all.shape[1]

    # ---- layout plumbing: channel-major, zero-padded flat planes (lane-dense).
    img = jnp.transpose(image, (0, 3, 1, 2))                  # (B, 3, H, W)
    img = jnp.pad(img, ((0, 0), (0, _CP - 3), (1, 1), (1, 1)))
    img_plane = img.reshape(B, _CP, Np).astype(jnp.bfloat16)  # (B, CP, Np)

    msg_col = jnp.pad(message, ((0, 0), (0, _CP - L)))[..., None].astype(jnp.float32)

    yy, xx = jnp.meshgrid(jnp.arange(Hp), jnp.arange(Wp), indexing="ij")
    interior = (yy >= 1) & (yy <= H) & (xx >= 1) & (xx <= W)
    mask_full = interior.reshape(1, Np).astype(jnp.float32)

    kernel = functools.partial(_fused_encdec_kernel, H=H, W=W,
                               n_enc=n_enc, n_dec=n_dec)
    enc_plane, dec_col = pl.pallas_call(
        kernel,
        out_shape=(jax.ShapeDtypeStruct((B, _CP, Np), jnp.bfloat16),
                   jax.ShapeDtypeStruct((B, _CP, 1), jnp.float32)),
        grid=(B,),
        in_specs=[
            pl.BlockSpec((1, _CP, Np), lambda b: (b, 0, 0)),     # image plane
            pl.BlockSpec((1, _CP, 1), lambda b: (b, 0, 0)),      # message column
            pl.BlockSpec((1, Np), lambda b: (0, 0)),             # interior mask
            pl.BlockSpec((NW, _CP, KW), lambda b: (0, 0, 0)),    # packed weights
            pl.BlockSpec((_CP, NB), lambda b: (0, 0)),           # packed biases
        ],
        out_specs=(pl.BlockSpec((1, _CP, Np), lambda b: (b, 0, 0)),
                   pl.BlockSpec((1, _CP, 1), lambda b: (b, 0, 0))),
        scratch_shapes=[
            pltpu.VMEM((_CP, Np), jnp.bfloat16),   # activation plane (single buffer)
            pltpu.VMEM((_CP, Np), jnp.bfloat16),   # broadcast message plane
        ],
        compiler_params=pltpu.CompilerParams(
            dimension_semantics=("parallel",),
            vmem_limit_bytes=48 * 1024 * 1024),
    )(img_plane, msg_col, mask_full, w_all, b_all)

    # Layout plumbing back to the reference (B, H, W, 3) / (B, L) shapes.
    enc = enc_plane.reshape(B, _CP, Hp, Wp)[:, :3, 1:1 + H, 1:1 + W]
    encoded = jnp.transpose(enc, (0, 2, 3, 1)).astype(jnp.float32)
    decoded = dec_col[:, :L, 0]
    noised = encoded                                           # Identity noiser
    return encoded, noised, decoded


# ----------------------------------------------------------------------------
# Deterministic parameter construction (BN folded to scale/bias, eval semantics)
# ----------------------------------------------------------------------------
def make_conv_bn_params(key, cin, cout, k=3):
    k1, k2, k3, k4, k5 = jax.random.split(key, 5)
    fan_in = cin * k * k
    w = jax.random.normal(k1, (cout, cin, k, k), jnp.float32) / jnp.sqrt(fan_in)
    gamma = 1.0 + 0.1 * jax.random.normal(k2, (cout,), jnp.float32)
    beta = 0.1 * jax.random.normal(k3, (cout,), jnp.float32)
    mean = 0.1 * jax.random.normal(k4, (cout,), jnp.float32)
    var = 1.0 + 0.1 * jnp.abs(jax.random.normal(k5, (cout,), jnp.float32))
    scale = gamma / jnp.sqrt(var + 1e-5)
    bias = beta - mean * scale
    return {"w": w, "scale": scale, "bias": bias}


def make_final_conv_params(key, cin, cout):
    k1, k2 = jax.random.split(key)
    w = jax.random.normal(k1, (cout, cin, 1, 1), jnp.float32) / jnp.sqrt(cin)
    b = 0.1 * jax.random.normal(k2, (cout,), jnp.float32)
    return {"w": w, "scale": jnp.ones((cout,), jnp.float32), "bias": b}


def make_linear_params(key, n):
    k1, k2 = jax.random.split(key)
    w = jax.random.normal(k1, (n, n), jnp.float32) / jnp.sqrt(n)   # (out, in)
    b = 0.1 * jax.random.normal(k2, (n,), jnp.float32)
    return {"w": w, "b": b}


def init_params(key, *, msg_len, enc_blocks, enc_ch, dec_blocks, dec_ch):
    keys = iter(jax.random.split(key, 32))
    p = {}
    # Encoder: ConvBNRelu(3,C) + (enc_blocks-1) x ConvBNRelu(C,C)
    enc = [make_conv_bn_params(next(keys), 3, enc_ch)]
    for _ in range(enc_blocks - 1):
        enc.append(make_conv_bn_params(next(keys), enc_ch, enc_ch))
    p["enc_convs"] = enc
    # after concat: (msg_len + C + 3) -> C ; final 1x1: C -> 3
    p["enc_after_concat"] = make_conv_bn_params(next(keys), msg_len + enc_ch + 3, enc_ch)
    p["enc_final"] = make_final_conv_params(next(keys), enc_ch, 3)
    # Decoder: ConvBNRelu(3,C) + (dec_blocks-1) x ConvBNRelu(C,C) + ConvBNRelu(C, L)
    dec = [make_conv_bn_params(next(keys), 3, dec_ch)]
    for _ in range(dec_blocks - 1):
        dec.append(make_conv_bn_params(next(keys), dec_ch, dec_ch))
    dec.append(make_conv_bn_params(next(keys), dec_ch, msg_len))
    p["dec_convs"] = dec
    p["dec_linear"] = make_linear_params(next(keys), msg_len)
    return p


# ----------------------------------------------------------------------------
# Main
# ----------------------------------------------------------------------------
if __name__ == "__main__":
    B, H, W = 2, 16, 16
    MSG_LEN = 8
    ENC_BLOCKS, ENC_CH = 3, 16
    DEC_BLOCKS, DEC_CH = 3, 16

    key = jax.random.PRNGKey(0)
    k_img, k_msg, k_par = jax.random.split(key, 3)

    # Inputs: image in NHWC (equivalent to torch NCHW (B,3,H,W)); message in {0,1}
    image = jax.random.uniform(k_img, (B, H, W, 3), jnp.float32)
    message = jax.random.bernoulli(k_msg, 0.5, (B, MSG_LEN)).astype(jnp.float32)

    params = init_params(k_par, msg_len=MSG_LEN, enc_blocks=ENC_BLOCKS, enc_ch=ENC_CH,
                         dec_blocks=DEC_BLOCKS, dec_ch=DEC_CH)

    encoded, noised, decoded = jax.jit(encoder_decoder_forward)(params, image, message)
    jax.block_until_ready((encoded, noised, decoded))

    assert encoded.shape == (B, H, W, 3)
    assert noised.shape == (B, H, W, 3)
    assert decoded.shape == (B, MSG_LEN)
    assert bool(jnp.all(jnp.isfinite(encoded))) and bool(jnp.all(jnp.isfinite(decoded)))
    print("KERNEL_OK")
</pallas_src>

<mosaic_0001>
module attributes {stable_mosaic.version = 11 : i64} {
  func.func @_fused_encdec_kernel(%arg0: i32, %arg1: memref<1x16x324xbf16, #tpu.memory_space<vmem>>, %arg2: memref<1x16x1xf32, #tpu.memory_space<vmem>>, %arg3: memref<1x324xf32, #tpu.memory_space<vmem>>, %arg4: memref<12x16x144xbf16, #tpu.memory_space<vmem>>, %arg5: memref<16x10xf32, #tpu.memory_space<vmem>>, %arg6: memref<1x16x324xbf16, #tpu.memory_space<vmem>>, %arg7: memref<1x16x1xf32, #tpu.memory_space<vmem>>, %arg8: memref<16x324xbf16, #tpu.memory_space<vmem>>, %arg9: memref<16x324xbf16, #tpu.memory_space<vmem>>) attributes {dimension_semantics = [#tpu.dimension_semantics<parallel>], iteration_bounds = array<i64: 2>, scalar_prefetch = 0 : i64, scratch_operands = 2 : i64, tpu.core_type = #tpu.core_type<tc>, window_params = [{transform_indices = @transform_0, window_bounds = array<i64: 1, 16, 324>}, {transform_indices = @transform_1, window_bounds = array<i64: 1, 16, 1>}, {pipeline_mode = #tpu.pipeline_mode<synchronous>, transform_indices = @transform_2, window_bounds = array<i64: 1, 324>}, {pipeline_mode = #tpu.pipeline_mode<synchronous>, transform_indices = @transform_3, window_bounds = array<i64: 12, 16, 144>}, {pipeline_mode = #tpu.pipeline_mode<synchronous>, transform_indices = @transform_4, window_bounds = array<i64: 16, 10>}, {transform_indices = @transform_5, window_bounds = array<i64: 1, 16, 324>}, {transform_indices = @transform_6, window_bounds = array<i64: 1, 16, 1>}]} {
    %c0 = arith.constant 0 : index
    %c0_0 = arith.constant 0 : index
    %0 = vector.load %arg3[%c0, %c0_0] : memref<1x324xf32, #tpu.memory_space<vmem>>, vector<1x324xf32>
    %1 = vector.extract_strided_slice %0 {offsets = [0, 19], sizes = [1, 286], strides = [1, 1]} : vector<1x324xf32> to vector<1x286xf32>
    %cst = arith.constant 0.000000e+00 : bf16
    %2 = vector.broadcast %cst : bf16 to vector<16x19xbf16>
    %c0_1 = arith.constant 0 : index
    %c0_2 = arith.constant 0 : index
    %3 = vector.load %arg8[%c0_1, %c0_2] : memref<16x324xbf16, #tpu.memory_space<vmem>>, vector<16x19xbf16>
    tpu.vector_store %arg8[%c0_1, %c0_2], %2 {strides = array<i32>} : memref<16x324xbf16, #tpu.memory_space<vmem>>, vector<16x19xbf16>,
    %cst_3 = arith.constant 0.000000e+00 : bf16
    %4 = vector.broadcast %cst_3 : bf16 to vector<16x19xbf16>
    %c0_4 = arith.constant 0 : index
    %c305 = arith.constant 305 : index
    %5 = vector.load %arg8[%c0_4, %c305] : memref<16x324xbf16, #tpu.memory_space<vmem>>, vector<16x19xbf16>
    tpu.vector_store %arg8[%c0_4, %c305], %4 {strides = array<i32>} : memref<16x324xbf16, #tpu.memory_space<vmem>>, vector<16x19xbf16>,
    %c0_5 = arith.constant 0 : index
    %c0_6 = arith.constant 0 : index
    %c0_7 = arith.constant 0 : index
    %6 = vector.load %arg2[%c0_5, %c0_6, %c0_7] : memref<1x16x1xf32, #tpu.memory_space<vmem>>, vector<1x16x1xf32>
    %7 = vector.shape_cast %6 : vector<1x16x1xf32> to vector<16x1xf32>
    %8 = vector.broadcast %7 : vector<16x1xf32> to vector<16x324xf32>
    %9 = vector.broadcast %0 : vector<1x324xf32> to vector<16x324xf32>
    %10 = arith.mulf %8, %9 : vector<16x324xf32>
    %11 = arith.truncf %10 : vector<16x324xf32> to vector<16x324xbf16>
    %c0_8 = arith.constant 0 : index
    %c0_9 = arith.constant 0 : index
    %12 = vector.load %arg9[%c0_8, %c0_9] : memref<16x324xbf16, #tpu.memory_space<vmem>>, vector<16x324xbf16>
    tpu.vector_store %arg9[%c0_8, %c0_9], %11 {strides = array<i32>} : memref<16x324xbf16, #tpu.memory_space<vmem>>, vector<16x324xbf16>,
    %c0_10 = arith.constant 0 : index
    %c0_11 = arith.constant 0 : index
    %c0_12 = arith.constant 0 : index
    %13 = vector.load %arg4[%c0_10, %c0_11, %c0_12] : memref<12x16x144xbf16, #tpu.memory_space<vmem>>, vector<1x16x144xbf16>
    %14 = vector.shape_cast %13 : vector<1x16x144xbf16> to vector<16x144xbf16>
    %c0_13 = arith.constant 0 : index
    %c0_14 = arith.constant 0 : index
    %c0_15 = arith.constant 0 : index
    %15 = vector.load %arg1[%c0_13, %c0_14, %c0_15] : memref<1x16x324xbf16, #tpu.memory_space<vmem>>, vector<1x16x286xbf16>
    %16 = vector.shape_cast %15 : vector<1x16x286xbf16> to vector<16x286xbf16>
    %c0_16 = arith.constant 0 : index
    %c0_17 = arith.constant 0 : index
    %c1 = arith.constant 1 : index
    %17 = vector.load %arg1[%c0_16, %c0_17, %c1] : memref<1x16x324xbf16, #tpu.memory_space<vmem>>, vector<1x16x286xbf16>
    %18 = vector.shape_cast %17 : vector<1x16x286xbf16> to vector<16x286xbf16>
    %c0_18 = arith.constant 0 : index
    %c0_19 = arith.constant 0 : index
    %c2 = arith.constant 2 : index
    %19 = vector.load %arg1[%c0_18, %c0_19, %c2] : memref<1x16x324xbf16, #tpu.memory_space<vmem>>, vector<1x16x286xbf16>
    %20 = vector.shape_cast %19 : vector<1x16x286xbf16> to vector<16x286xbf16>
    %c0_20 = arith.constant 0 : index
    %c0_21 = arith.constant 0 : index
    %c18 = arith.constant 18 : index
    %21 = vector.load %arg1[%c0_20, %c0_21, %c18] : memref<1x16x324xbf16, #tpu.memory_space<vmem>>, vector<1x16x286xbf16>
    %22 = vector.shape_cast %21 : vector<1x16x286xbf16> to vector<16x286xbf16>
    %c0_22 = arith.constant 0 : index
    %c0_23 = arith.constant 0 : index
    %c19 = arith.constant 19 : index
    %23 = vector.load %arg1[%c0_22, %c0_23, %c19] : memref<1x16x324xbf16, #tpu.memory_space<vmem>>, vector<1x16x286xbf16>
    %24 = vector.shape_cast %23 : vector<1x16x286xbf16> to vector<16x286xbf16>
    %c0_24 = arith.constant 0 : index
    %c0_25 = arith.constant 0 : index
    %c20 = arith.constant 20 : index
    %25 = vector.load %arg1[%c0_24, %c0_25, %c20] : memref<1x16x324xbf16, #tpu.memory_space<vmem>>, vector<1x16x286xbf16>
    %26 = vector.shape_cast %25 : vector<1x16x286xbf16> to vector<16x286xbf16>
    %c0_26 = arith.constant 0 : index
    %c0_27 = arith.constant 0 : index
    %c36 = arith.constant 36 : index
    %27 = vector.load %arg1[%c0_26, %c0_27, %c36] : memref<1x16x324xbf16, #tpu.memory_space<vmem>>, vector<1x16x286xbf16>
    %28 = vector.shape_cast %27 : vector<1x16x286xbf16> to vector<16x286xbf16>
    %c0_28 = arith.constant 0 : index
    %c0_29 = arith.constant 0 : index
    %c37 = arith.constant 37 : index
    %29 = vector.load %arg1[%c0_28, %c0_29, %c37] : memref<1x16x324xbf16, #tpu.memory_space<vmem>>, vector<1x16x286xbf16>
    %30 = vector.shape_cast %29 : vector<1x16x286xbf16> to vector<16x286xbf16>
    %c0_30 = arith.constant 0 : index
    %c0_31 = arith.constant 0 : index
    %c38 = arith.constant 38 : index
    %31 = vector.load %arg1[%c0_30, %c0_31, %c38] : memref<1x16x324xbf16, #tpu.memory_space<vmem>>, vector<1x16x286xbf16>
    %32 = vector.shape_cast %31 : vector<1x16x286xbf16> to vector<16x286xbf16>
    %33 = tpu.concatenate %16, %18, %20, %22, %24, %26, %28, %30, %32 in 0 : vector<16x286xbf16>, vector<16x286xbf16>, vector<16x286xbf16>, vector<16x286xbf16>, vector<16x286xbf16>, vector<16x286xbf16>, vector<16x286xbf16>, vector<16x286xbf16>, vector<16x286xbf16> -> vector<144x286xbf16>
    %cst_32 = arith.constant dense<0.000000e+00> : vector<16x286xf32>
    %34 = tpu.matmul %14, %33, %cst_32 {dimension_numbers = #tpu.dot_dimension_numbers<[1], [0], [0], [1], [0, 0, 1, 1], [], []>} : vector<16x144xbf16>, vector<144x286xbf16>, vector<16x286xf32> -> vector<16x286xf32>
    %c0_33 = arith.constant 0 : index
    %c0_34 = arith.constant 0 : index
    %35 = vector.load %arg5[%c0_33, %c0_34] : memref<16x10xf32, #tpu.memory_space<vmem>>, vector<16x1xf32>
    %36 = vector.broadcast %35 : vector<16x1xf32> to vector<16x286xf32>
    %37 = arith.addf %34, %36 : vector<16x286xf32>
    %38 = vector.broadcast %1 : vector<1x286xf32> to vector<16x286xf32>
    %39 = arith.mulf %37, %38 : vector<16x286xf32>
    %cst_35 = arith.constant 0.000000e+00 : f32
    %40 = vector.broadcast %cst_35 : f32 to vector<16x286xf32>
    %41 = arith.maximumf %39, %40 : vector<16x286xf32>
    %42 = arith.truncf %41 : vector<16x286xf32> to vector<16x286xbf16>
    %c0_36 = arith.constant 0 : index
    %c19_37 = arith.constant 19 : index
    %43 = vector.load %arg8[%c0_36, %c19_37] : memref<16x324xbf16, #tpu.memory_space<vmem>>, vector<16x286xbf16>
    tpu.vector_store %arg8[%c0_36, %c19_37], %42 {strides = array<i32>} : memref<16x324xbf16, #tpu.memory_space<vmem>>, vector<16x286xbf16>,
    %c1_38 = arith.constant 1 : index
    %c0_39 = arith.constant 0 : index
    %c0_40 = arith.constant 0 : index
    %44 = vector.load %arg4[%c1_38, %c0_39, %c0_40] : memref<12x16x144xbf16, #tpu.memory_space<vmem>>, vector<1x16x144xbf16>
    %45 = vector.shape_cast %44 : vector<1x16x144xbf16> to vector<16x144xbf16>
    %c0_41 = arith.constant 0 : index
    %c0_42 = arith.constant 0 : index
    %46 = vector.load %arg8[%c0_41, %c0_42] : memref<16x324xbf16, #tpu.memory_space<vmem>>, vector<16x286xbf16>
    %c0_43 = arith.constant 0 : index
    %c1_44 = arith.constant 1 : index
    %47 = vector.load %arg8[%c0_43, %c1_44] : memref<16x324xbf16, #tpu.memory_space<vmem>>, vector<16x286xbf16>
    %c0_45 = arith.constant 0 : index
    %c2_46 = arith.constant 2 : index
    %48 = vector.load %arg8[%c0_45, %c2_46] : memref<16x324xbf16, #tpu.memory_space<vmem>>, vector<16x286xbf16>
    %c0_47 = arith.constant 0 : index
    %c18_48 = arith.constant 18 : index
    %49 = vector.load %arg8[%c0_47, %c18_48] : memref<16x324xbf16, #tpu.memory_space<vmem>>, vector<16x286xbf16>
    %c0_49 = arith.constant 0 : index
    %c19_50 = arith.constant 19 : index
    %50 = vector.load %arg8[%c0_49, %c19_50] : memref<16x324xbf16, #tpu.memory_space<vmem>>, vector<16x286xbf16>
    %c0_51 = arith.constant 0 : index
    %c20_52 = arith.constant 20 : index
    %51 = vector.load %arg8[%c0_51, %c20_52] : memref<16x324xbf16, #tpu.memory_space<vmem>>, vector<16x286xbf16>
    %c0_53 = arith.constant 0 : index
    %c36_54 = arith.constant 36 : index
    %52 = vector.load %arg8[%c0_53, %c36_54] : memref<16x324xbf16, #tpu.memory_space<vmem>>, vector<16x286xbf16>
    %c0_55 = arith.constant 0 : index
    %c37_56 = arith.constant 37 : index
    %53 = vector.load %arg8[%c0_55, %c37_56] : memref<16x324xbf16, #tpu.memory_space<vmem>>, vector<16x286xbf16>
    %c0_57 = arith.constant 0 : index
    %c38_58 = arith.constant 38 : index
    %54 = vector.load %arg8[%c0_57, %c38_58] : memref<16x324xbf16, #tpu.memory_space<vmem>>, vector<16x286xbf16>
    %55 = tpu.concatenate %46, %47, %48, %49, %50, %51, %52, %53, %54 in 0 : vector<16x286xbf16>, vector<16x286xbf16>, vector<16x286xbf16>, vector<16x286xbf16>, vector<16x286xbf16>, vector<16x286xbf16>, vector<16x286xbf16>, vector<16x286xbf16>, vector<16x286xbf16> -> vector<144x286xbf16>
    %cst_59 = arith.constant dense<0.000000e+00> : vector<16x286xf32>
    %56 = tpu.matmul %45, %55, %cst_59 {dimension_numbers = #tpu.dot_dimension_numbers<[1], [0], [0], [1], [0, 0, 1, 1], [], []>} : vector<16x144xbf16>, vector<144x286xbf16>, vector<16x286xf32> -> vector<16x286xf32>
    %c0_60 = arith.constant 0 : index
    %c1_61 = arith.constant 1 : index
    %57 = vector.load %arg5[%c0_60, %c1_61] : memref<16x10xf32, #tpu.memory_space<vmem>>, vector<16x1xf32>
    %58 = vector.broadcast %57 : vector<16x1xf32> to vector<16x286xf32>
    %59 = arith.addf %56, %58 : vector<16x286xf32>
    %60 = vector.broadcast %1 : vector<1x286xf32> to vector<16x286xf32>
    %61 = arith.mulf %59, %60 : vector<16x286xf32>
    %cst_62 = arith.constant 0.000000e+00 : f32
    %62 = vector.broadcast %cst_62 : f32 to vector<16x286xf32>
    %63 = arith.maximumf %61, %62 : vector<16x286xf32>
    %64 = arith.truncf %63 : vector<16x286xf32> to vector<16x286xbf16>
    %c0_63 = arith.constant 0 : index
    %c19_64 = arith.constant 19 : index
    %65 = vector.load %arg8[%c0_63, %c19_64] : memref<16x324xbf16, #tpu.memory_space<vmem>>, vector<16x286xbf16>
    tpu.vector_store %arg8[%c0_63, %c19_64], %64 {strides = array<i32>} : memref<16x324xbf16, #tpu.memory_space<vmem>>, vector<16x286xbf16>,
    %c2_65 = arith.constant 2 : index
    %c0_66 = arith.constant 0 : index
    %c0_67 = arith.constant 0 : index
    %66 = vector.load %arg4[%c2_65, %c0_66, %c0_67] : memref<12x16x144xbf16, #tpu.memory_space<vmem>>, vector<1x16x144xbf16>
    %67 = vector.shape_cast %66 : vector<1x16x144xbf16> to vector<16x144xbf16>
    %c0_68 = arith.constant 0 : index
    %c0_69 = arith.constant 0 : index
    %68 = vector.load %arg8[%c0_68, %c0_69] : memref<16x324xbf16, #tpu.memory_space<vmem>>, vector<16x286xbf16>
    %c0_70 = arith.constant 0 : index
    %c1_71 = arith.constant 1 : index
    %69 = vector.load %arg8[%c0_70, %c1_71] : memref<16x324xbf16, #tpu.memory_space<vmem>>, vector<16x286xbf16>
    %c0_72 = arith.constant 0 : index
    %c2_73 = arith.constant 2 : index
    %70 = vector.load %arg8[%c0_72, %c2_73] : memref<16x324xbf16, #tpu.memory_space<vmem>>, vector<16x286xbf16>
    %c0_74 = arith.constant 0 : index
    %c18_75 = arith.constant 18 : index
    %71 = vector.load %arg8[%c0_74, %c18_75] : memref<16x324xbf16, #tpu.memory_space<vmem>>, vector<16x286xbf16>
    %c0_76 = arith.constant 0 : index
    %c19_77 = arith.constant 19 : index
    %72 = vector.load %arg8[%c0_76, %c19_77] : memref<16x324xbf16, #tpu.memory_space<vmem>>, vector<16x286xbf16>
    %c0_78 = arith.constant 0 : index
    %c20_79 = arith.constant 20 : index
    %73 = vector.load %arg8[%c0_78, %c20_79] : memref<16x324xbf16, #tpu.memory_space<vmem>>, vector<16x286xbf16>
    %c0_80 = arith.constant 0 : index
    %c36_81 = arith.constant 36 : index
    %74 = vector.load %arg8[%c0_80, %c36_81] : memref<16x324xbf16, #tpu.memory_space<vmem>>, vector<16x286xbf16>
    %c0_82 = arith.constant 0 : index
    %c37_83 = arith.constant 37 : index
    %75 = vector.load %arg8[%c0_82, %c37_83] : memref<16x324xbf16, #tpu.memory_space<vmem>>, vector<16x286xbf16>
    %c0_84 = arith.constant 0 : index
    %c38_85 = arith.constant 38 : index
    %76 = vector.load %arg8[%c0_84, %c38_85] : memref<16x324xbf16, #tpu.memory_space<vmem>>, vector<16x286xbf16>
    %77 = tpu.concatenate %68, %69, %70, %71, %72, %73, %74, %75, %76 in 0 : vector<16x286xbf16>, vector<16x286xbf16>, vector<16x286xbf16>, vector<16x286xbf16>, vector<16x286xbf16>, vector<16x286xbf16>, vector<16x286xbf16>, vector<16x286xbf16>, vector<16x286xbf16> -> vector<144x286xbf16>
    %cst_86 = arith.constant dense<0.000000e+00> : vector<16x286xf32>
    %78 = tpu.matmul %67, %77, %cst_86 {dimension_numbers = #tpu.dot_dimension_numbers<[1], [0], [0], [1], [0, 0, 1, 1], [], []>} : vector<16x144xbf16>, vector<144x286xbf16>, vector<16x286xf32> -> vector<16x286xf32>
    %c0_87 = arith.constant 0 : index
    %c2_88 = arith.constant 2 : index
    %79 = vector.load %arg5[%c0_87, %c2_88] : memref<16x10xf32, #tpu.memory_space<vmem>>, vector<16x1xf32>
    %80 = vector.broadcast %79 : vector<16x1xf32> to vector<16x286xf32>
    %81 = arith.addf %78, %80 : vector<16x286xf32>
    %82 = vector.broadcast %1 : vector<1x286xf32> to vector<16x286xf32>
    %83 = arith.mulf %81, %82 : vector<16x286xf32>
    %cst_89 = arith.constant 0.000000e+00 : f32
    %84 = vector.broadcast %cst_89 : f32 to vector<16x286xf32>
    %85 = arith.maximumf %83, %84 : vector<16x286xf32>
    %86 = arith.truncf %85 : vector<16x286xf32> to vector<16x286xbf16>
    %c0_90 = arith.constant 0 : index
    %c19_91 = arith.constant 19 : index
    %87 = vector.load %arg8[%c0_90, %c19_91] : memref<16x324xbf16, #tpu.memory_space<vmem>>, vector<16x286xbf16>
    tpu.vector_store %arg8[%c0_90, %c19_91], %86 {strides = array<i32>} : memref<16x324xbf16, #tpu.memory_space<vmem>>, vector<16x286xbf16>,
    %c3 = arith.constant 3 : index
    %c0_92 = arith.constant 0 : index
    %c0_93 = arith.constant 0 : index
    %88 = vector.load %arg4[%c3, %c0_92, %c0_93] : memref<12x16x144xbf16, #tpu.memory_space<vmem>>, vector<1x16x144xbf16>
    %89 = vector.shape_cast %88 : vector<1x16x144xbf16> to vector<16x144xbf16>
    %c0_94 = arith.constant 0 : index
    %c0_95 = arith.constant 0 : index
    %90 = vector.load %arg9[%c0_94, %c0_95] : memref<16x324xbf16, #tpu.memory_space<vmem>>, vector<16x286xbf16>
    %c0_96 = arith.constant 0 : index
    %c1_97 = arith.constant 1 : index
    %91 = vector.load %arg9[%c0_96, %c1_97] : memref<16x324xbf16, #tpu.memory_space<vmem>>, vector<16x286xbf16>
    %c0_98 = arith.constant 0 : index
    %c2_99 = arith.constant 2 : index
    %92 = vector.load %arg9[%c0_98, %c2_99] : memref<16x324xbf16, #tpu.memory_space<vmem>>, vector<16x286xbf16>
    %c0_100 = arith.constant 0 : index
    %c18_101 = arith.constant 18 : index
    %93 = vector.load %arg9[%c0_100, %c18_101] : memref<16x324xbf16, #tpu.memory_space<vmem>>, vector<16x286xbf16>
    %c0_102 = arith.constant 0 : index
    %c19_103 = arith.constant 19 : index
    %94 = vector.load %arg9[%c0_102, %c19_103] : memref<16x324xbf16, #tpu.memory_space<vmem>>, vector<16x286xbf16>
    %c0_104 = arith.constant 0 : index
    %c20_105 = arith.constant 20 : index
    %95 = vector.load %arg9[%c0_104, %c20_105] : memref<16x324xbf16, #tpu.memory_space<vmem>>, vector<16x286xbf16>
    %c0_106 = arith.constant 0 : index
    %c36_107 = arith.constant 36 : index
    %96 = vector.load %arg9[%c0_106, %c36_107] : memref<16x324xbf16, #tpu.memory_space<vmem>>, vector<16x286xbf16>
    %c0_108 = arith.constant 0 : index
    %c37_109 = arith.constant 37 : index
    %97 = vector.load %arg9[%c0_108, %c37_109] : memref<16x324xbf16, #tpu.memory_space<vmem>>, vector<16x286xbf16>
    %c0_110 = arith.constant 0 : index
    %c38_111 = arith.constant 38 : index
    %98 = vector.load %arg9[%c0_110, %c38_111] : memref<16x324xbf16, #tpu.memory_space<vmem>>, vector<16x286xbf16>
    %99 = tpu.concatenate %90, %91, %92, %93, %94, %95, %96, %97, %98 in 0 : vector<16x286xbf16>, vector<16x286xbf16>, vector<16x286xbf16>, vector<16x286xbf16>, vector<16x286xbf16>, vector<16x286xbf16>, vector<16x286xbf16>, vector<16x286xbf16>, vector<16x286xbf16> -> vector<144x286xbf16>
    %cst_112 = arith.constant dense<0.000000e+00> : vector<16x286xf32>
    %100 = tpu.matmul %89, %99, %cst_112 {dimension_numbers = #tpu.dot_dimension_numbers<[1], [0], [0], [1], [0, 0, 1, 1], [], []>} : vector<16x144xbf16>, vector<144x286xbf16>, vector<16x286xf32> -> vector<16x286xf32>
    %c4 = arith.constant 4 : index
    %c0_113 = arith.constant 0 : index
    %c0_114 = arith.constant 0 : index
    %101 = vector.load %arg4[%c4, %c0_113, %c0_114] : memref<12x16x144xbf16, #tpu.memory_space<vmem>>, vector<1x16x144xbf16>
    %102 = vector.shape_cast %101 : vector<1x16x144xbf16> to vector<16x144xbf16>
    %c0_115 = arith.constant 0 : index
    %c0_116 = arith.constant 0 : index
    %103 = vector.load %arg8[%c0_115, %c0_116] : memref<16x324xbf16, #tpu.memory_space<vmem>>, vector<16x286xbf16>
    %c0_117 = arith.constant 0 : index
    %c1_118 = arith.constant 1 : index
    %104 = vector.load %arg8[%c0_117, %c1_118] : memref<16x324xbf16, #tpu.memory_space<vmem>>, vector<16x286xbf16>
    %c0_119 = arith.constant 0 : index
    %c2_120 = arith.constant 2 : index
    %105 = vector.load %arg8[%c0_119, %c2_120] : memref<16x324xbf16, #tpu.memory_space<vmem>>, vector<16x286xbf16>
    %c0_121 = arith.constant 0 : index
    %c18_122 = arith.constant 18 : index
    %106 = vector.load %arg8[%c0_121, %c18_122] : memref<16x324xbf16, #tpu.memory_space<vmem>>, vector<16x286xbf16>
    %c0_123 = arith.constant 0 : index
    %c19_124 = arith.constant 19 : index
    %107 = vector.load %arg8[%c0_123, %c19_124] : memref<16x324xbf16, #tpu.memory_space<vmem>>, vector<16x286xbf16>
    %c0_125 = arith.constant 0 : index
    %c20_126 = arith.constant 20 : index
    %108 = vector.load %arg8[%c0_125, %c20_126] : memref<16x324xbf16, #tpu.memory_space<vmem>>, vector<16x286xbf16>
    %c0_127 = arith.constant 0 : index
    %c36_128 = arith.constant 36 : index
    %109 = vector.load %arg8[%c0_127, %c36_128] : memref<16x324xbf16, #tpu.memory_space<vmem>>, vector<16x286xbf16>
    %c0_129 = arith.constant 0 : index
    %c37_130 = arith.constant 37 : index
    %110 = vector.load %arg8[%c0_129, %c37_130] : memref<16x324xbf16, #tpu.memory_space<vmem>>, vector<16x286xbf16>
    %c0_131 = arith.constant 0 : index
    %c38_132 = arith.constant 38 : index
    %111 = vector.load %arg8[%c0_131, %c38_132] : memref<16x324xbf16, #tpu.memory_space<vmem>>, vector<16x286xbf16>
    %112 = tpu.concatenate %103, %104, %105, %106, %107, %108, %109, %110, %111 in 0 : vector<16x286xbf16>, vector<16x286xbf16>, vector<16x286xbf16>, vector<16x286xbf16>, vector<16x286xbf16>, vector<16x286xbf16>, vector<16x286xbf16>, vector<16x286xbf16>, vector<16x286xbf16> -> vector<144x286xbf16>
    %cst_133 = arith.constant dense<0.000000e+00> : vector<16x286xf32>
    %113 = tpu.matmul %102, %112, %cst_133 {dimension_numbers = #tpu.dot_dimension_numbers<[1], [0], [0], [1], [0, 0, 1, 1], [], []>} : vector<16x144xbf16>, vector<144x286xbf16>, vector<16x286xf32> -> vector<16x286xf32>
    %114 = arith.addf %100, %113 : vector<16x286xf32>
    %c5 = arith.constant 5 : index
    %c0_134 = arith.constant 0 : index
    %c0_135 = arith.constant 0 : index
    %115 = vector.load %arg4[%c5, %c0_134, %c0_135] : memref<12x16x144xbf16, #tpu.memory_space<vmem>>, vector<1x16x144xbf16>
    %116 = vector.shape_cast %115 : vector<1x16x144xbf16> to vector<16x144xbf16>
    %c0_136 = arith.constant 0 : index
    %c0_137 = arith.constant 0 : index
    %c0_138 = arith.constant 0 : index
    %117 = vector.load %arg1[%c0_136, %c0_137, %c0_138] : memref<1x16x324xbf16, #tpu.memory_space<vmem>>, vector<1x16x286xbf16>
    %118 = vector.shape_cast %117 : vector<1x16x286xbf16> to vector<16x286xbf16>
    %c0_139 = arith.constant 0 : index
    %c0_140 = arith.constant 0 : index
    %c1_141 = arith.constant 1 : index
    %119 = vector.load %arg1[%c0_139, %c0_140, %c1_141] : memref<1x16x324xbf16, #tpu.memory_space<vmem>>, vector<1x16x286xbf16>
    %120 = vector.shape_cast %119 : vector<1x16x286xbf16> to vector<16x286xbf16>
    %c0_142 = arith.constant 0 : index
    %c0_143 = arith.constant 0 : index
    %c2_144 = arith.constant 2 : index
    %121 = vector.load %arg1[%c0_142, %c0_143, %c2_144] : memref<1x16x324xbf16, #tpu.memory_space<vmem>>, vector<1x16x286xbf16>
    %122 = vector.shape_cast %121 : vector<1x16x286xbf16> to vector<16x286xbf16>
    %c0_145 = arith.constant 0 : index
    %c0_146 = arith.constant 0 : index
    %c18_147 = arith.constant 18 : index
    %123 = vector.load %arg1[%c0_145, %c0_146, %c18_147] : memref<1x16x324xbf16, #tpu.memory_space<vmem>>, vector<1x16x286xbf16>
    %124 = vector.shape_cast %123 : vector<1x16x286xbf16> to vector<16x286xbf16>
    %c0_148 = arith.constant 0 : index
    %c0_149 = arith.constant 0 : index
    %c19_150 = arith.constant 19 : index
    %125 = vector.load %arg1[%c0_148, %c0_149, %c19_150] : memref<1x16x324xbf16, #tpu.memory_space<vmem>>, vector<1x16x286xbf16>
    %126 = vector.shape_cast %125 : vector<1x16x286xbf16> to vector<16x286xbf16>
    %c0_151 = arith.constant 0 : index
    %c0_152 = arith.constant 0 : index
    %c20_153 = arith.constant 20 : index
    %127 = vector.load %arg1[%c0_151, %c0_152, %c20_153] : memref<1x16x324xbf16, #tpu.memory_space<vmem>>, vector<1x16x286xbf16>
    %128 = vector.shape_cast %127 : vector<1x16x286xbf16> to vector<16x286xbf16>
    %c0_154 = arith.constant 0 : index
    %c0_155 = arith.constant 0 : index
    %c36_156 = arith.constant 36 : index
    %129 = vector.load %arg1[%c0_154, %c0_155, %c36_156] : memref<1x16x324xbf16, #tpu.memory_space<vmem>>, vector<1x16x286xbf16>
    %130 = vector.shape_cast %129 : vector<1x16x286xbf16> to vector<16x286xbf16>
    %c0_157 = arith.constant 0 : index
    %c0_158 = arith.constant 0 : index
    %c37_159 = arith.constant 37 : index
    %131 = vector.load %arg1[%c0_157, %c0_158, %c37_159] : memref<1x16x324xbf16, #tpu.memory_space<vmem>>, vector<1x16x286xbf16>
    %132 = vector.shape_cast %131 : vector<1x16x286xbf16> to vector<16x286xbf16>
    %c0_160 = arith.constant 0 : index
    %c0_161 = arith.constant 0 : index
    %c38_162 = arith.constant 38 : index
    %133 = vector.load %arg1[%c0_160, %c0_161, %c38_162] : memref<1x16x324xbf16, #tpu.memory_space<vmem>>, vector<1x16x286xbf16>
    %134 = vector.shape_cast %133 : vector<1x16x286xbf16> to vector<16x286xbf16>
    %135 = tpu.concatenate %118, %120, %122, %124, %126, %128, %130, %132, %134 in 0 : vector<16x286xbf16>, vector<16x286xbf16>, vector<16x286xbf16>, vector<16x286xbf16>, vector<16x286xbf16>, vector<16x286xbf16>, vector<16x286xbf16>, vector<16x286xbf16>, vector<16x286xbf16> -> vector<144x286xbf16>
    %cst_163 = arith.constant dense<0.000000e+00> : vector<16x286xf32>
    %136 = tpu.matmul %116, %135, %cst_163 {dimension_numbers = #tpu.dot_dimension_numbers<[1], [0], [0], [1], [0, 0, 1, 1], [], []>} : vector<16x144xbf16>, vector<144x286xbf16>, vector<16x286xf32> -> vector<16x286xf32>
    %137 = arith.addf %114, %136 : vector<16x286xf32>
    %c0_164 = arith.constant 0 : index
    %c3_165 = arith.constant 3 : index
    %138 = vector.load %arg5[%c0_164, %c3_165] : memref<16x10xf32, #tpu.memory_space<vmem>>, vector<16x1xf32>
    %139 = vector.broadcast %138 : vector<16x1xf32> to vector<16x286xf32>
    %140 = arith.addf %137, %139 : vector<16x286xf32>
    %141 = vector.broadcast %1 : vector<1x286xf32> to vector<16x286xf32>
    %142 = arith.mulf %140, %141 : vector<16x286xf32>
    %cst_166 = arith.constant 0.000000e+00 : f32
    %143 = vector.broadcast %cst_166 : f32 to vector<16x286xf32>
    %144 = arith.maximumf %142, %143 : vector<16x286xf32>
    %145 = arith.truncf %144 : vector<16x286xf32> to vector<16x286xbf16>
    %c0_167 = arith.constant 0 : index
    %c19_168 = arith.constant 19 : index
    %146 = vector.load %arg8[%c0_167, %c19_168] : memref<16x324xbf16, #tpu.memory_space<vmem>>, vector<16x286xbf16>
    tpu.vector_store %arg8[%c0_167, %c19_168], %145 {strides = array<i32>} : memref<16x324xbf16, #tpu.memory_space<vmem>>, vector<16x286xbf16>,
    %c6 = arith.constant 6 : index
    %c0_169 = arith.constant 0 : index
    %c0_170 = arith.constant 0 : index
    %147 = vector.load %arg4[%c6, %c0_169, %c0_170] : memref<12x16x144xbf16, #tpu.memory_space<vmem>>, vector<1x16x144xbf16>
    %148 = vector.shape_cast %147 : vector<1x16x144xbf16> to vector<16x144xbf16>
    %149 = vector.extract_strided_slice %148 {offsets = [0, 0], sizes = [16, 16], strides = [1, 1]} : vector<16x144xbf16> to vector<16x16xbf16>
    %c0_171 = arith.constant 0 : index
    %c19_172 = arith.constant 19 : index
    %150 = vector.load %arg8[%c0_171, %c19_172] : memref<16x324xbf16, #tpu.memory_space<vmem>>, vector<16x286xbf16>
    %cst_173 = arith.constant dense<0.000000e+00> : vector<16x286xf32>
    %151 = tpu.matmul %149, %150, %cst_173 {dimension_numbers = #tpu.dot_dimension_numbers<[1], [0], [0], [1], [0, 0, 1, 1], [], []>} : vector<16x16xbf16>, vector<16x286xbf16>, vector<16x286xf32> -> vector<16x286xf32>
    %c0_174 = arith.constant 0 : index
    %c4_175 = arith.constant 4 : index
    %152 = vector.load %arg5[%c0_174, %c4_175] : memref<16x10xf32, #tpu.memory_space<vmem>>, vector<16x1xf32>
    %153 = vector.broadcast %152 : vector<16x1xf32> to vector<16x286xf32>
    %154 = arith.addf %151, %153 : vector<16x286xf32>
    %155 = vector.broadcast %1 : vector<1x286xf32> to vector<16x286xf32>
    %156 = arith.mulf %154, %155 : vector<16x286xf32>
    %cst_176 = arith.constant 0.000000e+00 : bf16
    %157 = vector.broadcast %cst_176 : bf16 to vector<16x19xbf16>
    %c0_177 = arith.constant 0 : index
    %c0_178 = arith.constant 0 : index
    %c0_179 = arith.constant 0 : index
    %158 = vector.load %arg6[%c0_177, %c0_178, %c0_179] : memref<1x16x324xbf16, #tpu.memory_space<vmem>>, vector<1x16x19xbf16>
    %159 = vector.shape_cast %158 : vector<1x16x19xbf16> to vector<16x19xbf16>
    %160 = vector.shape_cast %157 : vector<16x19xbf16> to vector<1x16x19xbf16>
    tpu.vector_store %arg6[%c0_177, %c0_178, %c0_179], %160 {strides = array<i32>} : memref<1x16x324xbf16, #tpu.memory_space<vmem>>, vector<1x16x19xbf16>,
    %cst_180 = arith.constant 0.000000e+00 : bf16
    %161 = vector.broadcast %cst_180 : bf16 to vector<16x19xbf16>
    %c0_181 = arith.constant 0 : index
    %c0_182 = arith.constant 0 : index
    %c305_183 = arith.constant 305 : index
    %162 = vector.load %arg6[%c0_181, %c0_182, %c305_183] : memref<1x16x324xbf16, #tpu.memory_space<vmem>>, vector<1x16x19xbf16>
    %163 = vector.shape_cast %162 : vector<1x16x19xbf16> to vector<16x19xbf16>
    %164 = vector.shape_cast %161 : vector<16x19xbf16> to vector<1x16x19xbf16>
    tpu.vector_store %arg6[%c0_181, %c0_182, %c305_183], %164 {strides = array<i32>} : memref<1x16x324xbf16, #tpu.memory_space<vmem>>, vector<1x16x19xbf16>,
    %165 = arith.truncf %156 : vector<16x286xf32> to vector<16x286xbf16>
    %c0_184 = arith.constant 0 : index
    %c0_185 = arith.constant 0 : index
    %c19_186 = arith.constant 19 : index
    %166 = vector.load %arg6[%c0_184, %c0_185, %c19_186] : memref<1x16x324xbf16, #tpu.memory_space<vmem>>, vector<1x16x286xbf16>
    %167 = vector.shape_cast %166 : vector<1x16x286xbf16> to vector<16x286xbf16>
    %168 = vector.shape_cast %165 : vector<16x286xbf16> to vector<1x16x286xbf16>
    tpu.vector_store %arg6[%c0_184, %c0_185, %c19_186], %168 {strides = array<i32>} : memref<1x16x324xbf16, #tpu.memory_space<vmem>>, vector<1x16x286xbf16>,
    %c7 = arith.constant 7 : index
    %c0_187 = arith.constant 0 : index
    %c0_188 = arith.constant 0 : index
    %169 = vector.load %arg4[%c7, %c0_187, %c0_188] : memref<12x16x144xbf16, #tpu.memory_space<vmem>>, vector<1x16x144xbf16>
    %170 = vector.shape_cast %169 : vector<1x16x144xbf16> to vector<16x144xbf16>
    %c0_189 = arith.constant 0 : index
    %c0_190 = arith.constant 0 : index
    %c0_191 = arith.constant 0 : index
    %171 = vector.load %arg6[%c0_189, %c0_190, %c0_191] : memref<1x16x324xbf16, #tpu.memory_space<vmem>>, vector<1x16x286xbf16>
    %172 = vector.shape_cast %171 : vector<1x16x286xbf16> to vector<16x286xbf16>
    %c0_192 = arith.constant 0 : index
    %c0_193 = arith.constant 0 : index
    %c1_194 = arith.constant 1 : index
    %173 = vector.load %arg6[%c0_192, %c0_193, %c1_194] : memref<1x16x324xbf16, #tpu.memory_space<vmem>>, vector<1x16x286xbf16>
    %174 = vector.shape_cast %173 : vector<1x16x286xbf16> to vector<16x286xbf16>
    %c0_195 = arith.constant 0 : index
    %c0_196 = arith.constant 0 : index
    %c2_197 = arith.constant 2 : index
    %175 = vector.load %arg6[%c0_195, %c0_196, %c2_197] : memref<1x16x324xbf16, #tpu.memory_space<vmem>>, vector<1x16x286xbf16>
    %176 = vector.shape_cast %175 : vector<1x16x286xbf16> to vector<16x286xbf16>
    %c0_198 = arith.constant 0 : index
    %c0_199 = arith.constant 0 : index
    %c18_200 = arith.constant 18 : index
    %177 = vector.load %arg6[%c0_198, %c0_199, %c18_200] : memref<1x16x324xbf16, #tpu.memory_space<vmem>>, vector<1x16x286xbf16>
    %178 = vector.shape_cast %177 : vector<1x16x286xbf16> to vector<16x286xbf16>
    %c0_201 = arith.constant 0 : index
    %c0_202 = arith.constant 0 : index
    %c19_203 = arith.constant 19 : index
    %179 = vector.load %arg6[%c0_201, %c0_202, %c19_203] : memref<1x16x324xbf16, #tpu.memory_space<vmem>>, vector<1x16x286xbf16>
    %180 = vector.shape_cast %179 : vector<1x16x286xbf16> to vector<16x286xbf16>
    %c0_204 = arith.constant 0 : index
    %c0_205 = arith.constant 0 : index
    %c20_206 = arith.constant 20 : index
    %181 = vector.load %arg6[%c0_204, %c0_205, %c20_206] : memref<1x16x324xbf16, #tpu.memory_space<vmem>>, vector<1x16x286xbf16>
    %182 = vector.shape_cast %181 : vector<1x16x286xbf16> to vector<16x286xbf16>
    %c0_207 = arith.constant 0 : index
    %c0_208 = arith.constant 0 : index
    %c36_209 = arith.constant 36 : index
    %183 = vector.load %arg6[%c0_207, %c0_208, %c36_209] : memref<1x16x324xbf16, #tpu.memory_space<vmem>>, vector<1x16x286xbf16>
    %184 = vector.shape_cast %183 : vector<1x16x286xbf16> to vector<16x286xbf16>
    %c0_210 = arith.constant 0 : index
    %c0_211 = arith.constant 0 : index
    %c37_212 = arith.constant 37 : index
    %185 = vector.load %arg6[%c0_210, %c0_211, %c37_212] : memref<1x16x324xbf16, #tpu.memory_space<vmem>>, vector<1x16x286xbf16>
    %186 = vector.shape_cast %185 : vector<1x16x286xbf16> to vector<16x286xbf16>
    %c0_213 = arith.constant 0 : index
    %c0_214 = arith.constant 0 : index
    %c38_215 = arith.constant 38 : index
    %187 = vector.load %arg6[%c0_213, %c0_214, %c38_215] : memref<1x16x324xbf16, #tpu.memory_space<vmem>>, vector<1x16x286xbf16>
    %188 = vector.shape_cast %187 : vector<1x16x286xbf16> to vector<16x286xbf16>
    %189 = tpu.concatenate %172, %174, %176, %178, %180, %182, %184, %186, %188 in 0 : vector<16x286xbf16>, vector<16x286xbf16>, vector<16x286xbf16>, vector<16x286xbf16>, vector<16x286xbf16>, vector<16x286xbf16>, vector<16x286xbf16>, vector<16x286xbf16>, vector<16x286xbf16> -> vector<144x286xbf16>
    %cst_216 = arith.constant dense<0.000000e+00> : vector<16x286xf32>
    %190 = tpu.matmul %170, %189, %cst_216 {dimension_numbers = #tpu.dot_dimension_numbers<[1], [0], [0], [1], [0, 0, 1, 1], [], []>} : vector<16x144xbf16>, vector<144x286xbf16>, vector<16x286xf32> -> vector<16x286xf32>
    %c0_217 = arith.constant 0 : index
    %c5_218 = arith.constant 5 : index
    %191 = vector.load %arg5[%c0_217, %c5_218] : memref<16x10xf32, #tpu.memory_space<vmem>>, vector<16x1xf32>
    %192 = vector.broadcast %191 : vector<16x1xf32> to vector<16x286xf32>
    %193 = arith.addf %190, %192 : vector<16x286xf32>
    %194 = vector.broadcast %1 : vector<1x286xf32> to vector<16x286xf32>
    %195 = arith.mulf %193, %194 : vector<16x286xf32>
    %cst_219 = arith.constant 0.000000e+00 : f32
    %196 = vector.broadcast %cst_219 : f32 to vector<16x286xf32>
    %197 = arith.maximumf %195, %196 : vector<16x286xf32>
    %198 = arith.truncf %197 : vector<16x286xf32> to vector<16x286xbf16>
    %c0_220 = arith.constant 0 : index
    %c19_221 = arith.constant 19 : index
    %199 = vector.load %arg8[%c0_220, %c19_221] : memref<16x324xbf16, #tpu.memory_space<vmem>>, vector<16x286xbf16>
    tpu.vector_store %arg8[%c0_220, %c19_221], %198 {strides = array<i32>} : memref<16x324xbf16, #tpu.memory_space<vmem>>, vector<16x286xbf16>,
    %c8 = arith.constant 8 : index
    %c0_222 = arith.constant 0 : index
    %c0_223 = arith.constant 0 : index
    %200 = vector.load %arg4[%c8, %c0_222, %c0_223] : memref<12x16x144xbf16, #tpu.memory_space<vmem>>, vector<1x16x144xbf16>
    %201 = vector.shape_cast %200 : vector<1x16x144xbf16> to vector<16x144xbf16>
    %c0_224 = arith.constant 0 : index
    %c0_225 = arith.constant 0 : index
    %202 = vector.load %arg8[%c0_224, %c0_225] : memref<16x324xbf16, #tpu.memory_space<vmem>>, vector<16x286xbf16>
    %c0_226 = arith.constant 0 : index
    %c1_227 = arith.constant 1 : index
    %203 = vector.load %arg8[%c0_226, %c1_227] : memref<16x324xbf16, #tpu.memory_space<vmem>>, vector<16x286xbf16>
    %c0_228 = arith.constant 0 : index
    %c2_229 = arith.constant 2 : index
    %204 = vector.load %arg8[%c0_228, %c2_229] : memref<16x324xbf16, #tpu.memory_space<vmem>>, vector<16x286xbf16>
    %c0_230 = arith.constant 0 : index
    %c18_231 = arith.constant 18 : index
    %205 = vector.load %arg8[%c0_230, %c18_231] : memref<16x324xbf16, #tpu.memory_space<vmem>>, vector<16x286xbf16>
    %c0_232 = arith.constant 0 : index
    %c19_233 = arith.constant 19 : index
    %206 = vector.load %arg8[%c0_232, %c19_233] : memref<16x324xbf16, #tpu.memory_space<vmem>>, vector<16x286xbf16>
    %c0_234 = arith.constant 0 : index
    %c20_235 = arith.constant 20 : index
    %207 = vector.load %arg8[%c0_234, %c20_235] : memref<16x324xbf16, #tpu.memory_space<vmem>>, vector<16x286xbf16>
    %c0_236 = arith.constant 0 : index
    %c36_237 = arith.constant 36 : index
    %208 = vector.load %arg8[%c0_236, %c36_237] : memref<16x324xbf16, #tpu.memory_space<vmem>>, vector<16x286xbf16>
    %c0_238 = arith.constant 0 : index
    %c37_239 = arith.constant 37 : index
    %209 = vector.load %arg8[%c0_238, %c37_239] : memref<16x324xbf16, #tpu.memory_space<vmem>>, vector<16x286xbf16>
    %c0_240 = arith.constant 0 : index
    %c38_241 = arith.constant 38 : index
    %210 = vector.load %arg8[%c0_240, %c38_241] : memref<16x324xbf16, #tpu.memory_space<vmem>>, vector<16x286xbf16>
    %211 = tpu.concatenate %202, %203, %204, %205, %206, %207, %208, %209, %210 in 0 : vector<16x286xbf16>, vector<16x286xbf16>, vector<16x286xbf16>, vector<16x286xbf16>, vector<16x286xbf16>, vector<16x286xbf16>, vector<16x286xbf16>, vector<16x286xbf16>, vector<16x286xbf16> -> vector<144x286xbf16>
    %cst_242 = arith.constant dense<0.000000e+00> : vector<16x286xf32>
    %212 = tpu.matmul %201, %211, %cst_242 {dimension_numbers = #tpu.dot_dimension_numbers<[1], [0], [0], [1], [0, 0, 1, 1], [], []>} : vector<16x144xbf16>, vector<144x286xbf16>, vector<16x286xf32> -> vector<16x286xf32>
    %c0_243 = arith.constant 0 : index
    %c6_244 = arith.constant 6 : index
    %213 = vector.load %arg5[%c0_243, %c6_244] : memref<16x10xf32, #tpu.memory_space<vmem>>, vector<16x1xf32>
    %214 = vector.broadcast %213 : vector<16x1xf32> to vector<16x286xf32>
    %215 = arith.addf %212, %214 : vector<16x286xf32>
    %216 = vector.broadcast %1 : vector<1x286xf32> to vector<16x286xf32>
    %217 = arith.mulf %215, %216 : vector<16x286xf32>
    %cst_245 = arith.constant 0.000000e+00 : f32
    %218 = vector.broadcast %cst_245 : f32 to vector<16x286xf32>
    %219 = arith.maximumf %217, %218 : vector<16x286xf32>
    %220 = arith.truncf %219 : vector<16x286xf32> to vector<16x286xbf16>
    %c0_246 = arith.constant 0 : index
    %c19_247 = arith.constant 19 : index
    %221 = vector.load %arg8[%c0_246, %c19_247] : memref<16x324xbf16, #tpu.memory_space<vmem>>, vector<16x286xbf16>
    tpu.vector_store %arg8[%c0_246, %c19_247], %220 {strides = array<i32>} : memref<16x324xbf16, #tpu.memory_space<vmem>>, vector<16x286xbf16>,
    %c9 = arith.constant 9 : index
    %c0_248 = arith.constant 0 : index
    %c0_249 = arith.constant 0 : index
    %222 = vector.load %arg4[%c9, %c0_248, %c0_249] : memref<12x16x144xbf16, #tpu.memory_space<vmem>>, vector<1x16x144xbf16>
    %223 = vector.shape_cast %222 : vector<1x16x144xbf16> to vector<16x144xbf16>
    %c0_250 = arith.constant 0 : index
    %c0_251 = arith.constant 0 : index
    %224 = vector.load %arg8[%c0_250, %c0_251] : memref<16x324xbf16, #tpu.memory_space<vmem>>, vector<16x286xbf16>
    %c0_252 = arith.constant 0 : index
    %c1_253 = arith.constant 1 : index
    %225 = vector.load %arg8[%c0_252, %c1_253] : memref<16x324xbf16, #tpu.memory_space<vmem>>, vector<16x286xbf16>
    %c0_254 = arith.constant 0 : index
    %c2_255 = arith.constant 2 : index
    %226 = vector.load %arg8[%c0_254, %c2_255] : memref<16x324xbf16, #tpu.memory_space<vmem>>, vector<16x286xbf16>
    %c0_256 = arith.constant 0 : index
    %c18_257 = arith.constant 18 : index
    %227 = vector.load %arg8[%c0_256, %c18_257] : memref<16x324xbf16, #tpu.memory_space<vmem>>, vector<16x286xbf16>
    %c0_258 = arith.constant 0 : index
    %c19_259 = arith.constant 19 : index
    %228 = vector.load %arg8[%c0_258, %c19_259] : memref<16x324xbf16, #tpu.memory_space<vmem>>, vector<16x286xbf16>
    %c0_260 = arith.constant 0 : index
    %c20_261 = arith.constant 20 : index
    %229 = vector.load %arg8[%c0_260, %c20_261] : memref<16x324xbf16, #tpu.memory_space<vmem>>, vector<16x286xbf16>
    %c0_262 = arith.constant 0 : index
    %c36_263 = arith.constant 36 : index
    %230 = vector.load %arg8[%c0_262, %c36_263] : memref<16x324xbf16, #tpu.memory_space<vmem>>, vector<16x286xbf16>
    %c0_264 = arith.constant 0 : index
    %c37_265 = arith.constant 37 : index
    %231 = vector.load %arg8[%c0_264, %c37_265] : memref<16x324xbf16, #tpu.memory_space<vmem>>, vector<16x286xbf16>
    %c0_266 = arith.constant 0 : index
    %c38_267 = arith.constant 38 : index
    %232 = vector.load %arg8[%c0_266, %c38_267] : memref<16x324xbf16, #tpu.memory_space<vmem>>, vector<16x286xbf16>
    %233 = tpu.concatenate %224, %225, %226, %227, %228, %229, %230, %231, %232 in 0 : vector<16x286xbf16>, vector<16x286xbf16>, vector<16x286xbf16>, vector<16x286xbf16>, vector<16x286xbf16>, vector<16x286xbf16>, vector<16x286xbf16>, vector<16x286xbf16>, vector<16x286xbf16> -> vector<144x286xbf16>
    %cst_268 = arith.constant dense<0.000000e+00> : vector<16x286xf32>
    %234 = tpu.matmul %223, %233, %cst_268 {dimension_numbers = #tpu.dot_dimension_numbers<[1], [0], [0], [1], [0, 0, 1, 1], [], []>} : vector<16x144xbf16>, vector<144x286xbf16>, vector<16x286xf32> -> vector<16x286xf32>
    %c0_269 = arith.constant 0 : index
    %c7_270 = arith.constant 7 : index
    %235 = vector.load %arg5[%c0_269, %c7_270] : memref<16x10xf32, #tpu.memory_space<vmem>>, vector<16x1xf32>
    %236 = vector.broadcast %235 : vector<16x1xf32> to vector<16x286xf32>
    %237 = arith.addf %234, %236 : vector<16x286xf32>
    %238 = vector.broadcast %1 : vector<1x286xf32> to vector<16x286xf32>
    %239 = arith.mulf %237, %238 : vector<16x286xf32>
    %cst_271 = arith.constant 0.000000e+00 : f32
    %240 = vector.broadcast %cst_271 : f32 to vector<16x286xf32>
    %241 = arith.maximumf %239, %240 : vector<16x286xf32>
    %242 = arith.truncf %241 : vector<16x286xf32> to vector<16x286xbf16>
    %c0_272 = arith.constant 0 : index
    %c19_273 = arith.constant 19 : index
    %243 = vector.load %arg8[%c0_272, %c19_273] : memref<16x324xbf16, #tpu.memory_space<vmem>>, vector<16x286xbf16>
    tpu.vector_store %arg8[%c0_272, %c19_273], %242 {strides = array<i32>} : memref<16x324xbf16, #tpu.memory_space<vmem>>, vector<16x286xbf16>,
    %c10 = arith.constant 10 : index
    %c0_274 = arith.constant 0 : index
    %c0_275 = arith.constant 0 : index
    %244 = vector.load %arg4[%c10, %c0_274, %c0_275] : memref<12x16x144xbf16, #tpu.memory_space<vmem>>, vector<1x16x144xbf16>
    %245 = vector.shape_cast %244 : vector<1x16x144xbf16> to vector<16x144xbf16>
    %c0_276 = arith.constant 0 : index
    %c0_277 = arith.constant 0 : index
    %246 = vector.load %arg8[%c0_276, %c0_277] : memref<16x324xbf16, #tpu.memory_space<vmem>>, vector<16x286xbf16>
    %c0_278 = arith.constant 0 : index
    %c1_279 = arith.constant 1 : index
    %247 = vector.load %arg8[%c0_278, %c1_279] : memref<16x324xbf16, #tpu.memory_space<vmem>>, vector<16x286xbf16>
    %c0_280 = arith.constant 0 : index
    %c2_281 = arith.constant 2 : index
    %248 = vector.load %arg8[%c0_280, %c2_281] : memref<16x324xbf16, #tpu.memory_space<vmem>>, vector<16x286xbf16>
    %c0_282 = arith.constant 0 : index
    %c18_283 = arith.constant 18 : index
    %249 = vector.load %arg8[%c0_282, %c18_283] : memref<16x324xbf16, #tpu.memory_space<vmem>>, vector<16x286xbf16>
    %c0_284 = arith.constant 0 : index
    %c19_285 = arith.constant 19 : index
    %250 = vector.load %arg8[%c0_284, %c19_285] : memref<16x324xbf16, #tpu.memory_space<vmem>>, vector<16x286xbf16>
    %c0_286 = arith.constant 0 : index
    %c20_287 = arith.constant 20 : index
    %251 = vector.load %arg8[%c0_286, %c20_287] : memref<16x324xbf16, #tpu.memory_space<vmem>>, vector<16x286xbf16>
    %c0_288 = arith.constant 0 : index
    %c36_289 = arith.constant 36 : index
    %252 = vector.load %arg8[%c0_288, %c36_289] : memref<16x324xbf16, #tpu.memory_space<vmem>>, vector<16x286xbf16>
    %c0_290 = arith.constant 0 : index
    %c37_291 = arith.constant 37 : index
    %253 = vector.load %arg8[%c0_290, %c37_291] : memref<16x324xbf16, #tpu.memory_space<vmem>>, vector<16x286xbf16>
    %c0_292 = arith.constant 0 : index
    %c38_293 = arith.constant 38 : index
    %254 = vector.load %arg8[%c0_292, %c38_293] : memref<16x324xbf16, #tpu.memory_space<vmem>>, vector<16x286xbf16>
    %255 = tpu.concatenate %246, %247, %248, %249, %250, %251, %252, %253, %254 in 0 : vector<16x286xbf16>, vector<16x286xbf16>, vector<16x286xbf16>, vector<16x286xbf16>, vector<16x286xbf16>, vector<16x286xbf16>, vector<16x286xbf16>, vector<16x286xbf16>, vector<16x286xbf16> -> vector<144x286xbf16>
    %cst_294 = arith.constant dense<0.000000e+00> : vector<16x286xf32>
    %256 = tpu.matmul %245, %255, %cst_294 {dimension_numbers = #tpu.dot_dimension_numbers<[1], [0], [0], [1], [0, 0, 1, 1], [], []>} : vector<16x144xbf16>, vector<144x286xbf16>, vector<16x286xf32> -> vector<16x286xf32>
    %c0_295 = arith.constant 0 : index
    %c8_296 = arith.constant 8 : index
    %257 = vector.load %arg5[%c0_295, %c8_296] : memref<16x10xf32, #tpu.memory_space<vmem>>, vector<16x1xf32>
    %258 = vector.broadcast %257 : vector<16x1xf32> to vector<16x286xf32>
    %259 = arith.addf %256, %258 : vector<16x286xf32>
    %260 = vector.broadcast %1 : vector<1x286xf32> to vector<16x286xf32>
    %261 = arith.mulf %259, %260 : vector<16x286xf32>
    %cst_297 = arith.constant 0.000000e+00 : f32
    %262 = vector.broadcast %cst_297 : f32 to vector<16x286xf32>
    %263 = arith.maximumf %261, %262 : vector<16x286xf32>
    %c11 = arith.constant 11 : index
    %c0_298 = arith.constant 0 : index
    %c0_299 = arith.constant 0 : index
    %264 = vector.load %arg4[%c11, %c0_298, %c0_299] : memref<12x16x144xbf16, #tpu.memory_space<vmem>>, vector<1x16x144xbf16>
    %265 = vector.shape_cast %264 : vector<1x16x144xbf16> to vector<16x144xbf16>
    %266 = vector.extract_strided_slice %265 {offsets = [0, 0], sizes = [16, 16], strides = [1, 1]} : vector<16x144xbf16> to vector<16x16xbf16>
    %267 = arith.truncf %263 : vector<16x286xf32> to vector<16x286xbf16>
    %cst_300 = arith.constant dense<0.000000e+00> : vector<16x286xf32>
    %268 = tpu.matmul %266, %267, %cst_300 {dimension_numbers = #tpu.dot_dimension_numbers<[1], [0], [0], [1], [0, 0, 1, 1], [], []>} : vector<16x16xbf16>, vector<16x286xbf16>, vector<16x286xf32> -> vector<16x286xf32>
    %cst_301 = arith.constant dense<0.000000e+00> : vector<16xf32>
    %269 = vector.multi_reduction <add>, %268, %cst_301 [1] : vector<16x286xf32> to vector<16xf32>
    %270 = vector.shape_cast %269 : vector<16xf32> to vector<16x1xf32>
    %cst_302 = arith.constant 3.906250e-03 : f32
    %271 = vector.broadcast %cst_302 : f32 to vector<16x1xf32>
    %272 = arith.mulf %270, %271 : vector<16x1xf32>
    %c0_303 = arith.constant 0 : index
    %c9_304 = arith.constant 9 : index
    %273 = vector.load %arg5[%c0_303, %c9_304] : memref<16x10xf32, #tpu.memory_space<vmem>>, vector<16x1xf32>
    %274 = arith.addf %272, %273 : vector<16x1xf32>
    %c0_305 = arith.constant 0 : index
    %c0_306 = arith.constant 0 : index
    %c0_307 = arith.constant 0 : index
    %275 = vector.load %arg7[%c0_305, %c0_306, %c0_307] : memref<1x16x1xf32, #tpu.memory_space<vmem>>, vector<1x16x1xf32>
    %276 = vector.shape_cast %275 : vector<1x16x1xf32> to vector<16x1xf32>
    %277 = vector.shape_cast %274 : vector<16x1xf32> to vector<1x16x1xf32>
    tpu.vector_store %arg7[%c0_305, %c0_306, %c0_307], %277 {strides = array<i32>} : memref<1x16x1xf32, #tpu.memory_space<vmem>>, vector<1x16x1xf32>,
    return
  }
  func.func @transform_0(%arg0: i32) -> (i32, i32, i32) {
    %c0_i32 = arith.constant 0 : i32
    %c0_i32_0 = arith.constant 0 : i32
    %c0_i32_1 = arith.constant 0 : i32
    return %arg0, %c0_i32, %c0_i32_0 : i32, i32, i32
  }
  func.func @transform_1(%arg0: i32) -> (i32, i32, i32) {
    %c0_i32 = arith.constant 0 : i32
    %c0_i32_0 = arith.constant 0 : i32
    %c0_i32_1 = arith.constant 0 : i32
    return %arg0, %c0_i32, %c0_i32_0 : i32, i32, i32
  }
  func.func @transform_2(%arg0: i32) -> (i32, i32) {
    %c0_i32 = arith.constant 0 : i32
    %c0_i32_0 = arith.constant 0 : i32
    %c0_i32_1 = arith.constant 0 : i32
    return %c0_i32, %c0_i32_0 : i32, i32
  }
  func.func @transform_3(%arg0: i32) -> (i32, i32, i32) {
    %c0_i32 = arith.constant 0 : i32
    %c0_i32_0 = arith.constant 0 : i32
    %c0_i32_1 = arith.constant 0 : i32
    %c0_i32_2 = arith.constant 0 : i32
    return %c0_i32, %c0_i32_0, %c0_i32_1 : i32, i32, i32
  }
  func.func @transform_4(%arg0: i32) -> (i32, i32) {
    %c0_i32 = arith.constant 0 : i32
    %c0_i32_0 = arith.constant 0 : i32
    %c0_i32_1 = arith.constant 0 : i32
    return %c0_i32, %c0_i32_0 : i32, i32
  }
  func.func @transform_5(%arg0: i32) -> (i32, i32, i32) {
    %c0_i32 = arith.constant 0 : i32
    %c0_i32_0 = arith.constant 0 : i32
    %c0_i32_1 = arith.constant 0 : i32
    return %arg0, %c0_i32, %c0_i32_0 : i32, i32, i32
  }
  func.func @transform_6(%arg0: i32) -> (i32, i32, i32) {
    %c0_i32 = arith.constant 0 : i32
    %c0_i32_0 = arith.constant 0 : i32
    %c0_i32_1 = arith.constant 0 : i32
    return %arg0, %c0_i32, %c0_i32_0 : i32, i32, i32
  }
}

</mosaic_0001>

<bundles_post_ra>
// kernel: encoder_decoder_forward.1
= control target key start
LH: loop header
LB: loop body
LE: loop exit
PB: predicated region body
PF: predicated region fallthrough
CT: control target
= control target key end

     0   :  { %s3353_s21 = smov 0   ;;  %s4326_s0 = inlined_call_operand.vmem [shape: bf16[2,16,324], index: 0, kind: input, shape index: {}]   ;;  %s4327_s1 = inlined_call_operand.vmem [shape: f32[2,16,1], index: 1, kind: input, shape index: {}]   ;;  %s4328_s2 = inlined_call_operand.vmem [shape: f32[1,324], index: 2, kind: input, shape index: {}]   ;;  %s4329_s3 = inlined_call_operand.vmem [shape: bf16[12,16,144], index: 3, kind: input, shape index: {}]   ;;  %s4330_s4 = inlined_call_operand.vmem [shape: f32[16,10], index: 4, kind: input, shape index: {}]   ;;  %s4331_s5 = inlined_call_operand.vmem [shape: bf16[2,16,324], index: 5, kind: output, shape index: {0}]   ;;  %s4332_s6 = inlined_call_operand.vmem [shape: f32[2,16,1], index: 6, kind: output, shape index: {1}]  }
   0x1 LB: > { %s3073_s22 = sadd.s32 4294967295, %s3295_s21   ;;  %p3077_p0 = scmp.ge.s32.totalorder %s3295_s21, 1  ;;  %s3295_s21 = sphi %s3353_s21, %s17_s21  }
   0x2   : > { %p225_p1 = scmp.lt.s32.totalorder %s3295_s21, 3 }
   0x4   : > { %p226_p2 = pnand %p3077_p0, %p225_p1 }
   0x5   : > { %p265_p3 = scmp.lt.s32.totalorder (!%p226_p2), %s3073_s22, 1  ;;  %v3297_v0 = vmov (!%p226_p2), 0   ;;  %s3298_s27 = smov (!%p226_p2), 127   ;;  %v3253_v4 = vld [vmem:[%s4329_s3 + $0x4] ss:$8 sps:$4 sm:$0xff] (!%p226_p2)   ;;  %vm471_vm0 = vcmask (!%p226_p2), 130048   ;;  %v304_v5 = vlaneseq (!%p226_p2) }
   0x6   : > { %229 = sbr.rel (%p226_p2) target bundleno = 5054 (0x13be), region = 40  ;;  %518 = vmatprep.subr.bf16.mxu1 (!%p226_p2), %v3297_v0  ;;  %3228 = vset.pattern.permute.xlu1 (!%p226_p2), %v3297_v0  ;;  %s3299_s28 = smov (!%p226_p2), 126   ;;  %v3410_v8 = vld [vmem:[%s4330_s4] sm:$0xff] (!%p226_p2)  ;;  %v3415_v10 = vld [vmem:[%s4330_s4 + $0x8] sm:$0xff] (!%p226_p2)  ;;  %vm360_vm1 = vcmask (!%p226_p2), 1039360   ;;  %vm372_vm2 = vcmask (!%p226_p2), 1031168  }
   0x7   : > { %3227 = vset.pattern.permute.xlu0 (!%p226_p2), %v3297_v0  ;;  %s3300_s29 = smov (!%p226_p2), 110   ;;  %s3301_s30 = smov (!%p226_p2), 109   ;;  %3090 = vmatprep.mubr.msk.bf16.mxu1 (!%p226_p2), %vm471_vm0, %v3253_v4  ;;  %v305_v6 = vshrl.u32 (!%p226_p2), %v304_v5, 7  ;;  %v286_v11 = vld [vmem:[%s4328_s2] sm:$0x7] (!%p226_p2)  ;;  %vm384_vm3 = vcmask (!%p226_p2), 900096  }
   0x8   : > { %s3302_s7 = smov (!%p226_p2), 108   ;;  %s3303_s8 = smov (!%p226_p2), 92   ;;  %3089 = vmatprep.mubr.msk.bf16.mxu0 (!%p226_p2), %vm471_vm0, %v3253_v4  ;;  %vm396_vm4 = vcmask (!%p226_p2), 891904   ;;  %vm408_vm5 = vcmask (!%p226_p2), 883712   ;;  %vm420_vm6 = vcmask (!%p226_p2), 752640   ;;  %vm432_vm7 = vcmask (!%p226_p2), 744448  }
   0x9   : > { %s3304_s11 = smov (!%p226_p2), 91   ;;  %s3305_s12 = smov (!%p226_p2), 90   ;;  %v310_v7 = vsub.s32 (!%p226_p2), 1, %v305_v6  ;;  %v306_v9 = vsub.s32 (!%p226_p2), 0, %v305_v6  ;;  %v314_v14 = vsub.s32 (!%p226_p2), 2, %v305_v6  ;;  %vm444_vm8 = vcmask (!%p226_p2), 736256  }
   0xa   : > { %v3251_v53 = vld [vmem:[%s4329_s3] ss:$8 sps:$4 sm:$0xff] (!%p226_p2)   ;;  %vm287_vm9 = vcmask (!%p226_p2), 154624   ;;  %vm289_vm10 = vcmask (!%p226_p2), 556424   ;;  %s3306_s24 = smov (!%p226_p2), 19   ;;  %vm601_vm11 = vcmask (!%p226_p2), 1047704  }
   0xb   : > { %v3421_v12 = vrot.slane (!%p226_p2), %v286_v11, %v310_v7  ;;  %v3424_v13 = vrot.slane (!%p226_p2), %v286_v11, %v306_v9  ;;  %v3430_v15 = vrot.slane (!%p226_p2), %v286_v11, %v314_v14  ;;  %288 = vst.msk [vmem:[#allocation2] sm:$0xff] (!%p226_p2), %vm287_vm9, %v3297_v0  ;;  %vm604_vm12 = vcmask (!%p226_p2), 400384  }
   0xc   : > { %290 = vst.msk [vmem:[#allocation2 + $0x10] sm:$0xff] (!%p226_p2), %vm289_vm10, %v3297_v0  ;;  %vm330_vm13 = vcmask (!%p226_p2), 556032   ;;  %vm4333_vm14 = vmmov (!%p226_p2), 0   ;;  %vm1859_vm15 = vcmask (!%p226_p2), 150528   ;;  %vm1862_vm10 = vcmask (!%p226_p2), 552328  }
   0xd   : > { %s4336_s22 = smov (!%p265_p3, %s3073_s22), 1 }
   0xe   : > { %s3197_s23 = smul.u32 24, %s4336_s22  ;;  %s3167_s18 = sshll.u32 %s4336_s22, 4 }
   0xf   : > { %s274_s25 = scalar_lea.vmem %s4327_s1, %s3167_s18  ;;  %s284_s16 = scalar_lea.vmem %s4332_s6, %s3167_s18 }
  0x10   : > { %s3372_s26 = scalar_lea.vmem %s4326_s0, %s3197_s23  ;;  %s3981_s20 = scalar_lea.vmem %s4331_s5, %s3197_s23 }
  0x11   : > { %v3247_v1 = vld [vmem:[%s3372_s26 + $0x4] ss:$12 sps:$4 sm:$0xff]   ;;  %v3249_v2 = vld [vmem:[%s3372_s26] ss:$12 sps:$4 sm:$0xff]   ;;  %v3250_v3 = vld [vmem:[%s3372_s26 + $0x8] ss:$12 sps:$4 sm:$0xff]  }
  0x12   : > { %356 = vrot.lane.b32.xlu0 %v3247_v1, %s3298_s27  ;;  %475 = vmatprep.subr.bf16.mxu0 %v3247_v1  ;;  %1860 = vst.msk [vmem:[%s3981_s20] sm:$0xf] %vm1859_vm15, %v3297_v0  ;;  %1861 = vst.msk [vmem:[%s3981_s20 + $0xc] sm:$0xf] %vm1859_vm15, %v3297_v0  ;;  %vm1900_vm15 = vcmask 1047556  }
  0x13   : > { %354 = vrot.lane.b32.xlu1 %v3249_v2, %s3298_s27  ;;  %476 = vmatpush1.bf16.msra.mxu0 %v3249_v2  ;;  %1863 = vst.msk [vmem:[%s3981_s20 + $0x8] sm:$0xf] %vm1862_vm10, %v3297_v0  ;;  %1864 = vst.msk [vmem:[%s3981_s20 + $0x14] sm:$0xf] %vm1862_vm10, %v3297_v0 }
  0x14   : > { %519 = vmatpush1.bf16.msra.mxu1 %v3250_v3 }
  0x15   : > { %520 = vmatprep.subr.bf16.mxu1 %v3297_v0 }
  0x16   : > { %358 = vrot.lane.b32.xlu0 %v3250_v3, %s3298_s27 }
  0x17   : > { %368 = vrot.lane.b32.xlu1 %v3247_v1, %s3299_s28 }
  0x1a   : > { %370 = vrot.lane.b32.xlu0 %v3250_v3, %s3299_s28 }
  0x1b   : > { %366 = vrot.lane.b32.xlu1 %v3249_v2, %s3299_s28 }
  0x1e   : > { %380 = vrot.lane.b32.xlu0 %v3247_v1, %s3300_s29 }
  0x1f   : > { %382 = vrot.lane.b32.xlu1 %v3250_v3, %s3300_s29 }
  0x22   : > { %378 = vrot.lane.b32.xlu0 %v3249_v2, %s3300_s29 }
  0x23   : > { %392 = vrot.lane.b32.xlu1 %v3247_v1, %s3301_s30 }
  0x26   : > { %394 = vrot.lane.b32.xlu0 %v3250_v3, %s3301_s30 }
  0x27   : > { %390 = vrot.lane.b32.xlu1 %v3249_v2, %s3301_s30 }
  0x2a   : > { %404 = vrot.lane.b32.xlu0 %v3247_v1, %s3302_s7 }
  0x2b   : > { %406 = vrot.lane.b32.xlu1 %v3250_v3, %s3302_s7 }
  0x2e   : > { %402 = vrot.lane.b32.xlu0 %v3249_v2, %s3302_s7 }
  0x2f   : > { %416 = vrot.lane.b32.xlu1 %v3247_v1, %s3303_s8 }
  0x32   : > { %418 = vrot.lane.b32.xlu0 %v3250_v3, %s3303_s8 }
  0x33   : > { %414 = vrot.lane.b32.xlu1 %v3249_v2, %s3303_s8 }
  0x36   : > { %428 = vrot.lane.b32.xlu0 %v3247_v1, %s3304_s11 }
  0x37   : > { %430 = vrot.lane.b32.xlu1 %v3250_v3, %s3304_s11 }
  0x3a   : > { %426 = vrot.lane.b32.xlu0 %v3249_v2, %s3304_s11 }
  0x3b   : > { %440 = vrot.lane.b32.xlu1 %v3247_v1, %s3305_s12 }
  0x3e   : > { %442 = vrot.lane.b32.xlu0 %v3250_v3, %s3305_s12 }
  0x3f   : > { %438 = vrot.lane.b32.xlu1 %v3249_v2, %s3305_s12 }
  0x42   : > { %454 = vperm.xlu0 %3227, %v3410_v8  }
  0x43   : > { %459 = vperm.xlu1 %3228, %v3415_v10  }
  0x46   : > { %561 = vrot.lane.b32.xlu0 %v3421_v12, %s3301_s30 }
  0x47   : > { %559 = vrot.lane.b32.xlu1 %v3424_v13, %s3301_s30 }
  0x4b   : > { %563 = vrot.lane.b32.xlu1 %v3430_v15, %s3301_s30 }
  0x84   : > { %v357_v16 = vpop.permute.xlu0 %356 }
  0x85   : > { %v355_v17 = vpop.permute.xlu1 %354 }
  0x86   : > { %v361_v21 = vsel %vm360_vm1, %v355_v17, %v357_v16 }
  0x88   : > { %v359_v18 = vpop.permute.xlu0 %358 }
  0x89   : > { %v369_v19 = vpop.permute.xlu1 %368  ;;  %521 = vmatpush1.bf16.msra.mxu1 %v359_v18  ;;  %v362_v20 = vsel %vm360_vm1, %v357_v16, %v359_v18 }
  0x8a   : > { %477 = vmatprep.subr.bf16.mxu0 %v362_v20  ;;  %522 = vmatprep.subr.bf16.mxu1 %v3297_v0 }
  0x8b   : > { %478 = vmatpush1.bf16.msra.mxu0 %v361_v21 }
  0x8c   : > { %v371_v22 = vpop.permute.xlu0 %370 }
  0x8d   : > { %v367_v23 = vpop.permute.xlu1 %366  ;;  %523 = vmatpush1.bf16.msra.mxu1 %v371_v22  ;;  %v374_v24 = vsel %vm372_vm2, %v369_v19, %v371_v22 }
  0x8e   : > { %479 = vmatprep.subr.bf16.mxu0 %v374_v24  ;;  %v373_v25 = vsel %vm372_vm2, %v367_v23, %v369_v19  ;;  %524 = vmatprep.subr.bf16.mxu1 %v3297_v0 }
  0x8f   : > { %480 = vmatpush1.bf16.msra.mxu0 %v373_v25 }
  0x90   : > { %v381_v26 = vpop.permute.xlu0 %380 }
  0x91   : > { %v383_v27 = vpop.permute.xlu1 %382 }
  0x92   : > { %v386_v28 = vsel %vm384_vm3, %v381_v26, %v383_v27  ;;  %525 = vmatpush1.bf16.msra.mxu1 %v383_v27 }
  0x93   : > { %481 = vmatprep.subr.bf16.mxu0 %v386_v28  ;;  %526 = vmatprep.subr.bf16.mxu1 %v3297_v0 }
  0x94   : > { %v379_v29 = vpop.permute.xlu0 %378 }
  0x95   : > { %v393_v30 = vpop.permute.xlu1 %392  ;;  %v385_v31 = vsel %vm384_vm3, %v379_v29, %v381_v26 }
  0x96   : > { %482 = vmatpush1.bf16.msra.mxu0 %v385_v31 }
  0x98   : > { %v395_v32 = vpop.permute.xlu0 %394 }
  0x99   : > { %v391_v33 = vpop.permute.xlu1 %390  ;;  %527 = vmatpush1.bf16.msra.mxu1 %v395_v32  ;;  %v398_v34 = vsel %vm396_vm4, %v393_v30, %v395_v32 }
  0x9a   : > { %483 = vmatprep.subr.bf16.mxu0 %v398_v34  ;;  %v397_v35 = vsel %vm396_vm4, %v391_v33, %v393_v30  ;;  %528 = vmatprep.subr.bf16.mxu1 %v3297_v0 }
  0x9b   : > { %484 = vmatpush1.bf16.msra.mxu0 %v397_v35 }
  0x9c   : > { %v405_v36 = vpop.permute.xlu0 %404 }
  0x9d   : > { %v407_v37 = vpop.permute.xlu1 %406 }
  0x9e   : > { %v410_v38 = vsel %vm408_vm5, %v405_v36, %v407_v37  ;;  %529 = vmatpush1.bf16.msra.mxu1 %v407_v37 }
  0x9f   : > { %485 = vmatprep.subr.bf16.mxu0 %v410_v38  ;;  %530 = vmatprep.subr.bf16.mxu1 %v3297_v0 }
  0xa0   : > { %v403_v39 = vpop.permute.xlu0 %402 }
  0xa1   : > { %v417_v40 = vpop.permute.xlu1 %416  ;;  %v409_v41 = vsel %vm408_vm5, %v403_v39, %v405_v36 }
  0xa2   : > { %486 = vmatpush1.bf16.msra.mxu0 %v409_v41 }
  0xa4   : > { %v419_v42 = vpop.permute.xlu0 %418 }
  0xa5   : > { %v415_v43 = vpop.permute.xlu1 %414  ;;  %531 = vmatpush1.bf16.msra.mxu1 %v419_v42  ;;  %v422_v44 = vsel %vm420_vm6, %v417_v40, %v419_v42  ;;  %v3254_v42 = vld [vmem:[%s4329_s3 + $0x14] ss:$8 sps:$4 sm:$0xff]  }
  0xa6   : > { %487 = vmatprep.subr.bf16.mxu0 %v422_v44  ;;  %v421_v45 = vsel %vm420_vm6, %v415_v43, %v417_v40  ;;  %532 = vmatprep.subr.bf16.mxu1 %v3297_v0  ;;  %v3307_v43 = vmov 1  }
  0xa7   : > { %488 = vmatpush1.bf16.msra.mxu0 %v421_v45  ;;  %3229 = vset.pattern.permute.xlu1 %v3307_v43 }
  0xa8   : > { %v429_v46 = vpop.permute.xlu0 %428  ;;  %3230 = vset.pattern.permute.xlu0 %v3307_v43 }
  0xa9   : > { %v431_v47 = vpop.permute.xlu1 %430 }
  0xaa   : > { %v434_v48 = vsel %vm432_vm7, %v429_v46, %v431_v47  ;;  %533 = vmatpush1.bf16.msra.mxu1 %v431_v47 }
  0xab   : > { %489 = vmatprep.subr.bf16.mxu0 %v434_v48  ;;  %534 = vmatprep.subr.bf16.mxu1 %v3297_v0 }
  0xac   : > { %v427_v49 = vpop.permute.xlu0 %426 }
  0xad   : > { %v441_v50 = vpop.permute.xlu1 %440  ;;  %v433_v51 = vsel %vm432_vm7, %v427_v49, %v429_v46 }
  0xae   : > { %490 = vmatpush1.bf16.msra.mxu0 %v433_v51 }
  0xb0   : > { %v443_v52 = vpop.permute.xlu0 %442 }
  0xb1   : > { %v439_v54 = vpop.permute.xlu1 %438  ;;  %535 = vmatpush1.bf16.msra.mxu1 %v443_v52  ;;  %v446_v55 = vsel %vm444_vm8, %v441_v50, %v443_v52 }
  0xb2   : > { %491 = vmatprep.subr.bf16.mxu0 %v446_v55  ;;  %v445_v56 = vsel %vm444_vm8, %v439_v54, %v441_v50  ;;  %770 = vmatprep.subr.bf16.mxu1 %v3297_v0 }
  0xb3   : > { %492 = vmatpush1.bf16.msra.mxu0 %v445_v56 }
  0xb4   : > { %551 = vmatmul.mubr.bf16.vlgmr.msra.gmra.mrb[0].mxu1 %v3251_v53 }
  0xb5   : > { %3096 = vmatprep.mubr.msk.bf16.mxu1 %vm471_vm0, %v3254_v42 }
  0xb6   : > { %508 = vmatmul.mubr.bf16.vlgmr.msra.gmra.mrb[0].mxu0 %v3251_v53 }
  0xb7   : > { %3095 = vmatprep.mubr.msk.bf16.mxu0 %vm471_vm0, %v3254_v42 }
  0xc1   : > { %v455_v58 = vpop.permute.xlu0 %454 }
  0xc2   : > { %v460_v57 = vpop.permute.xlu1 %459 }
  0xc5   : > { %v562_v60 = vpop.permute.xlu0 %561 }
  0xc6   : > { %v560_v59 = vpop.permute.xlu1 %559 }
  0xc7   : > { %v3466_v4 = vsel %vm396_vm4, %v560_v59, %v562_v60 }
  0xca   : > { %v3463_v62 = vpop.permute.xlu1 %563 }
  0xcb   : > { %v3471_v9 = vsel %vm396_vm4, %v562_v60, %v3463_v62 }
 0x187   : > { %v552_v61 = vpop.f32.mrb[0].mxu1 }
 0x188   : > { %v553_v63 = vadd.f32 %v552_v61, %v455_v58  ;;  %v554_v1 = vpop.f32.mrb[1].mxu1 }
 0x189   : > { %v509_v2 = vpop.f32.mrb[0].mxu0  ;;  %v555_v3 = vpop.f32.mrb[2].mxu1 }
 0x18a   : > { %v510_v5 = vadd.f32 %v509_v2, %v455_v58  ;;  %v556_v6 = vadd.f32 %v555_v3, %v460_v57  ;;  %v511_v7 = vpop.f32.mrb[1].mxu0  ;;  %v557_v11 = vpop.f32.mrb[3].mxu1  ;;  %v573_v14 = vmul.f32 %v3463_v62, %v553_v63 }
 0x18b   : > { %v512_v16 = vadd.f32 %v511_v7, %v455_v58  ;;  %v513_v17 = vpop.f32.mrb[2].mxu0 }
 0x18c   : > { %v514_v18 = vadd.f32 %v513_v17, %v460_v57  ;;  %v515_v19 = vpop.f32.mrb[3].mxu0  ;;  %v571_v20 = vmul.f32 %v3466_v4, %v510_v5  ;;  %v576_v21 = vmul.f32 %v3463_v62, %v556_v6  ;;  %v579_v22 = vmax.f32 %v573_v14, 0.0 }
 0x18d   : > { %v572_v23 = vmul.f32 %v3471_v9, %v512_v16  ;;  %v516_v24 = vadd.f32 %v515_v19, %v460_v57 }
 0x18e   : > { %v574_v25 = vmul.f32 %v3466_v4, %v514_v18  ;;  %v582_v26 = vmax.f32 %v576_v21, 0.0  ;;  %v577_v29 = vmax.f32 %v571_v20, 0.0 }
 0x18f   : > { %v575_v27 = vmul.f32 %v3471_v9, %v516_v24  ;;  %v578_v31 = vmax.f32 %v572_v23, 0.0 }
 0x190   : > { %v580_v28 = vmax.f32 %v574_v25, 0.0  ;;  %v585_v30 = vpack.c.bf16 %v582_v26, %v579_v22 }
 0x191   : > { %v581_v32 = vmax.f32 %v575_v27, 0.0  ;;  %v3256_v27 = vld [vmem:[%s4329_s3 + $0x10] ss:$8 sps:$4 sm:$0xff]  }
 0x192   : > { %v583_v33 = vpack.c.bf16 %v580_v28, %v577_v29 }
 0x193   : > { %v584_v34 = vpack.c.bf16 %v581_v32, %v578_v31 }
 0x194   : > { %589 = vrot.lane.b32.xlu0 %v583_v33, %s3306_s24 }
 0x195   : > { %591 = vrot.lane.b32.xlu1 %v584_v34, %s3306_s24 }
 0x198   : > { %593 = vrot.lane.b32.xlu0 %v585_v30, %s3306_s24 }
 0x206   : > { %v590_v35 = vpop.permute.xlu0 %589 }
 0x207   : > { %602 = vst.msk [vmem:[#allocation2] sm:$0xff] %vm601_vm11, %v590_v35  ;;  %v592_v36 = vpop.permute.xlu1 %591 }
 0x208   : > { %v596_v37 = vsel %vm287_vm9, %v590_v35, %v592_v36 }
 0x209   : > { %727 = vmatprep.subr.bf16.mxu0 %v596_v37 }
 0x20a   : > { %v594_v38 = vpop.permute.xlu0 %593 }
 0x20b   : > { %v597_v39 = vsel %vm287_vm9, %v592_v36, %v594_v38 }
 0x20c   : > { %605 = vst.msk [vmem:[#allocation2 + $0x10] sm:$0xff] %vm604_vm12, %v597_v39 }
 0x20e   : > { %v609_v40 = vld [vmem:[#allocation2] sm:$0xff] }
 0x20f   : > { %626 = vrot.lane.b32.xlu0 %v609_v40, %s3299_s28  ;;  %615 = vrot.lane.b32.xlu1 %v609_v40, %s3298_s27 }
 0x210   : > { %728 = vmatpush1.bf16.msra.mxu0 %v609_v40 }
 0x213   : > { %648 = vrot.lane.b32.xlu0 %v609_v40, %s3301_s30  ;;  %637 = vrot.lane.b32.xlu1 %v609_v40, %s3300_s29  ;;  %v611_v41 = vld [vmem:[#allocation2 + $0x10] sm:$0xff] }
 0x214   : > { %771 = vmatpush1.bf16.msra.mxu1 %v611_v41 }
 0x215   : > { %772 = vmatprep.subr.bf16.mxu1 %v3297_v0 }
 0x217   : > { %670 = vrot.lane.b32.xlu0 %v609_v40, %s3303_s8  ;;  %659 = vrot.lane.b32.xlu1 %v609_v40, %s3302_s7 }
 0x21b   : > { %681 = vrot.lane.b32.xlu1 %v609_v40, %s3304_s11  ;;  %619 = vrot.lane.b32.xlu0 %v611_v41, %s3298_s27 }
 0x21f   : > { %617 = vrot.lane.b32.xlu1 %v596_v37, %s3298_s27  ;;  %628 = vrot.lane.b32.xlu0 %v596_v37, %s3299_s28 }
 0x223   : > { %630 = vrot.lane.b32.xlu1 %v611_v41, %s3299_s28  ;;  %641 = vrot.lane.b32.xlu0 %v611_v41, %s3300_s29 }
 0x227   : > { %639 = vrot.lane.b32.xlu1 %v596_v37, %s3300_s29  ;;  %650 = vrot.lane.b32.xlu0 %v596_v37, %s3301_s30 }
 0x22b   : > { %652 = vrot.lane.b32.xlu1 %v611_v41, %s3301_s30  ;;  %663 = vrot.lane.b32.xlu0 %v611_v41, %s3302_s7 }
 0x22f   : > { %661 = vrot.lane.b32.xlu1 %v596_v37, %s3302_s7  ;;  %672 = vrot.lane.b32.xlu0 %v596_v37, %s3303_s8 }
 0x233   : > { %674 = vrot.lane.b32.xlu1 %v611_v41, %s3303_s8  ;;  %685 = vrot.lane.b32.xlu0 %v611_v41, %s3304_s11 }
 0x237   : > { %683 = vrot.lane.b32.xlu1 %v596_v37, %s3304_s11  ;;  %694 = vrot.lane.b32.xlu0 %v596_v37, %s3305_s12 }
 0x23b   : > { %696 = vrot.lane.b32.xlu1 %v611_v41, %s3305_s12  ;;  %692 = vrot.lane.b32.xlu0 %v609_v40, %s3305_s12 }
 0x23f   : > { %707 = vperm.xlu1 %3229, %v3410_v8   ;;  %712 = vperm.xlu0 %3230, %v3415_v10  }
 0x281   : > { %v616_v44 = vpop.permute.xlu1 %615  ;;  %v627_v45 = vpop.permute.xlu0 %626 }
 0x285   : > { %v638_v46 = vpop.permute.xlu1 %637  ;;  %v649_v47 = vpop.permute.xlu0 %648 }
 0x289   : > { %v660_v48 = vpop.permute.xlu1 %659  ;;  %v671_v49 = vpop.permute.xlu0 %670 }
 0x28d   : > { %v682_v50 = vpop.permute.xlu1 %681  ;;  %v620_v51 = vpop.permute.xlu0 %619 }
 0x28e   : > { %773 = vmatpush1.bf16.msra.mxu1 %v620_v51 }
 0x28f   : > { %774 = vmatprep.subr.bf16.mxu1 %v3297_v0 }
 0x291   : > { %v618_v52 = vpop.permute.xlu1 %617  ;;  %v629_v53 = vpop.permute.xlu0 %628 }
 0x292   : > { %v622_v54 = vsel %vm360_vm1, %v618_v52, %v620_v51  ;;  %v621_v55 = vsel %vm360_vm1, %v616_v44, %v618_v52  ;;  %v632_v59 = vsel %vm372_vm2, %v627_v45, %v629_v53 }
 0x293   : > { %729 = vmatprep.subr.bf16.mxu0 %v622_v54 }
 0x294   : > { %730 = vmatpush1.bf16.msra.mxu0 %v621_v55 }
 0x295   : > { %v631_v56 = vpop.permute.xlu1 %630  ;;  %v642_v57 = vpop.permute.xlu0 %641 }
 0x296   : > { %775 = vmatpush1.bf16.msra.mxu1 %v631_v56  ;;  %v633_v58 = vsel %vm372_vm2, %v629_v53, %v631_v56 }
 0x297   : > { %731 = vmatprep.subr.bf16.mxu0 %v633_v58  ;;  %776 = vmatprep.subr.bf16.mxu1 %v3297_v0 }
 0x298   : > { %732 = vmatpush1.bf16.msra.mxu0 %v632_v59 }
 0x299   : > { %v640_v60 = vpop.permute.xlu1 %639  ;;  %v651_v61 = vpop.permute.xlu0 %650 }
 0x29a   : > { %777 = vmatpush1.bf16.msra.mxu1 %v642_v57  ;;  %v644_v63 = vsel %vm384_vm3, %v640_v60, %v642_v57  ;;  %v643_v1 = vsel %vm384_vm3, %v638_v46, %v640_v60  ;;  %v654_v6 = vsel %vm396_vm4, %v649_v47, %v651_v61 }
 0x29b   : > { %733 = vmatprep.subr.bf16.mxu0 %v644_v63  ;;  %778 = vmatprep.subr.bf16.mxu1 %v3297_v0 }
 0x29c   : > { %734 = vmatpush1.bf16.msra.mxu0 %v643_v1 }
 0x29d   : > { %v653_v2 = vpop.permute.xlu1 %652  ;;  %v664_v3 = vpop.permute.xlu0 %663 }
 0x29e   : > { %779 = vmatpush1.bf16.msra.mxu1 %v653_v2  ;;  %v655_v5 = vsel %vm396_vm4, %v651_v61, %v653_v2 }
 0x29f   : > { %735 = vmatprep.subr.bf16.mxu0 %v655_v5  ;;  %780 = vmatprep.subr.bf16.mxu1 %v3297_v0 }
 0x2a0   : > { %736 = vmatpush1.bf16.msra.mxu0 %v654_v6 }
 0x2a1   : > { %v662_v7 = vpop.permute.xlu1 %661  ;;  %v673_v11 = vpop.permute.xlu0 %672 }
 0x2a2   : > { %781 = vmatpush1.bf16.msra.mxu1 %v664_v3  ;;  %v666_v14 = vsel %vm408_vm5, %v662_v7, %v664_v3  ;;  %v665_v16 = vsel %vm408_vm5, %v660_v48, %v662_v7  ;;  %v676_v20 = vsel %vm420_vm6, %v671_v49, %v673_v11  ;;  %v3257_v7 = vld [vmem:[%s4329_s3 + $0x24] ss:$8 sps:$4 sm:$0xff]  }
 0x2a3   : > { %737 = vmatprep.subr.bf16.mxu0 %v666_v14  ;;  %782 = vmatprep.subr.bf16.mxu1 %v3297_v0 }
 0x2a4   : > { %738 = vmatpush1.bf16.msra.mxu0 %v665_v16 }
 0x2a5   : > { %v675_v17 = vpop.permute.xlu1 %674  ;;  %v686_v18 = vpop.permute.xlu0 %685 }
 0x2a6   : > { %783 = vmatpush1.bf16.msra.mxu1 %v675_v17  ;;  %v677_v19 = vsel %vm420_vm6, %v673_v11, %v675_v17  ;;  %v3308_v11 = vmov 2  }
 0x2a7   : > { %739 = vmatprep.subr.bf16.mxu0 %v677_v19  ;;  %784 = vmatprep.subr.bf16.mxu1 %v3297_v0 }
 0x2a8   : > { %740 = vmatpush1.bf16.msra.mxu0 %v676_v20  ;;  %3231 = vset.pattern.permute.xlu1 %v3308_v11 }
 0x2a9   : > { %v684_v21 = vpop.permute.xlu1 %683  ;;  %v695_v22 = vpop.permute.xlu0 %694  ;;  %3232 = vset.pattern.permute.xlu0 %v3308_v11 }
 0x2aa   : > { %785 = vmatpush1.bf16.msra.mxu1 %v686_v18  ;;  %v688_v23 = vsel %vm432_vm7, %v684_v21, %v686_v18  ;;  %v687_v24 = vsel %vm432_vm7, %v682_v50, %v684_v21 }
 0x2ab   : > { %741 = vmatprep.subr.bf16.mxu0 %v688_v23  ;;  %786 = vmatprep.subr.bf16.mxu1 %v3297_v0 }
 0x2ac   : > { %742 = vmatpush1.bf16.msra.mxu0 %v687_v24 }
 0x2ad   : > { %v697_v25 = vpop.permute.xlu1 %696  ;;  %v693_v26 = vpop.permute.xlu0 %692 }
 0x2ae   : > { %v698_v28 = vsel %vm444_vm8, %v693_v26, %v695_v22  ;;  %787 = vmatpush1.bf16.msra.mxu1 %v697_v25  ;;  %v699_v29 = vsel %vm444_vm8, %v695_v22, %v697_v25 }
 0x2af   : > { %743 = vmatprep.subr.bf16.mxu0 %v699_v29  ;;  %1007 = vmatprep.subr.bf16.mxu1 %v3297_v0 }
 0x2b0   : > { %744 = vmatpush1.bf16.msra.mxu0 %v698_v28 }
 0x2b1   : > { %803 = vmatmul.mubr.bf16.vlgmr.msra.gmra.mrb[4].mxu1 %v3256_v27 }
 0x2b2   : > { %3102 = vmatprep.mubr.msk.bf16.mxu1 %vm471_vm0, %v3257_v7 }
 0x2b3   : > { %760 = vmatmul.mubr.bf16.vlgmr.msra.gmra.mrb[4].mxu0 %v3256_v27 }
 0x2b4   : > { %3101 = vmatprep.mubr.msk.bf16.mxu0 %vm471_vm0, %v3257_v7 }
 0x2be   : > { %v708_v30 = vpop.permute.xlu1 %707  ;;  %v713_v32 = vpop.permute.xlu0 %712 }
 0x384   : > { %v804_v31 = vpop.f32.mrb[4].mxu1 }
 0x385   : > { %v805_v33 = vadd.f32 %v804_v31, %v708_v30  ;;  %v806_v34 = vpop.f32.mrb[5].mxu1 }
 0x386   : > { %v761_v35 = vpop.f32.mrb[4].mxu0  ;;  %v807_v36 = vpop.f32.mrb[6].mxu1 }
 0x387   : > { %v813_v37 = vmul.f32 %v805_v33, %v3463_v62  ;;  %v762_v38 = vadd.f32 %v761_v35, %v708_v30  ;;  %v808_v39 = vadd.f32 %v807_v36, %v713_v32  ;;  %v763_v40 = vpop.f32.mrb[5].mxu0  ;;  %v809_v41 = vpop.f32.mrb[7].mxu1 }
 0x388   : > { %v764_v42 = vadd.f32 %v763_v40, %v708_v30  ;;  %v765_v43 = vpop.f32.mrb[6].mxu0 }
 0x389   : > { %v811_v44 = vmul.f32 %v762_v38, %v3466_v4  ;;  %v766_v45 = vadd.f32 %v765_v43, %v713_v32  ;;  %v767_v46 = vpop.f32.mrb[7].mxu0  ;;  %v816_v47 = vmul.f32 %v808_v39, %v3463_v62  ;;  %v819_v50 = vmax.f32 %v813_v37, 0.0 }
 0x38a   : > { %v812_v48 = vmul.f32 %v764_v42, %v3471_v9  ;;  %v768_v49 = vadd.f32 %v767_v46, %v713_v32 }
 0x38b   : > { %v814_v51 = vmul.f32 %v766_v45, %v3466_v4  ;;  %v822_v52 = vmax.f32 %v816_v47, 0.0  ;;  %v817_v54 = vmax.f32 %v811_v44, 0.0 }
 0x38c   : > { %v815_v53 = vmul.f32 %v768_v49, %v3471_v9  ;;  %v818_v57 = vmax.f32 %v812_v48, 0.0 }
 0x38d   : > { %v820_v55 = vmax.f32 %v814_v51, 0.0  ;;  %v825_v56 = vpack.c.bf16 %v822_v52, %v819_v50  ;;  %v3259_v51 = vld [vmem:[%s4329_s3 + $0x20] ss:$8 sps:$4 sm:$0xff]  }
 0x38e   : > { %v821_v58 = vmax.f32 %v815_v53, 0.0 }
 0x38f   : > { %833 = vrot.lane.b32.xlu0 %v825_v56, %s3306_s24  ;;  %v823_v59 = vpack.c.bf16 %v820_v55, %v817_v54 }
 0x390   : > { %v824_v60 = vpack.c.bf16 %v821_v58, %v818_v57 }
 0x391   : > { %829 = vrot.lane.b32.xlu1 %v823_v59, %s3306_s24 }
 0x395   : > { %831 = vrot.lane.b32.xlu1 %v824_v60, %s3306_s24 }
 0x401   : > { %v834_v63 = vpop.permute.xlu0 %833 }
 0x403   : > { %v830_v61 = vpop.permute.xlu1 %829 }
 0x404   : > { %840 = vst.msk [vmem:[#allocation2] sm:$0xff] %vm601_vm11, %v830_v61 }
 0x407   : > { %v832_v1 = vpop.permute.xlu1 %831 }
 0x408   : > { %v835_v2 = vsel %vm287_vm9, %v830_v61, %v832_v1  ;;  %v836_v3 = vsel %vm287_vm9, %v832_v1, %v834_v63 }
 0x409   : > { %842 = vst.msk [vmem:[#allocation2 + $0x10] sm:$0xff] %vm604_vm12, %v836_v3  ;;  %964 = vmatprep.subr.bf16.mxu0 %v835_v2 }
 0x40b   : > { %v846_v5 = vld [vmem:[#allocation2] sm:$0xff] }
 0x40c   : > { %863 = vrot.lane.b32.xlu0 %v846_v5, %s3299_s28  ;;  %852 = vrot.lane.b32.xlu1 %v846_v5, %s3298_s27 }
 0x40d   : > { %965 = vmatpush1.bf16.msra.mxu0 %v846_v5 }
 0x410   : > { %885 = vrot.lane.b32.xlu0 %v846_v5, %s3301_s30  ;;  %874 = vrot.lane.b32.xlu1 %v846_v5, %s3300_s29  ;;  %v848_v6 = vld [vmem:[#allocation2 + $0x10] sm:$0xff] }
 0x411   : > { %1008 = vmatpush1.bf16.msra.mxu1 %v848_v6 }
 0x412   : > { %1009 = vmatprep.subr.bf16.mxu1 %v3297_v0 }
 0x414   : > { %907 = vrot.lane.b32.xlu0 %v846_v5, %s3303_s8  ;;  %896 = vrot.lane.b32.xlu1 %v846_v5, %s3302_s7 }
 0x418   : > { %918 = vrot.lane.b32.xlu1 %v846_v5, %s3304_s11  ;;  %856 = vrot.lane.b32.xlu0 %v848_v6, %s3298_s27 }
 0x41c   : > { %865 = vrot.lane.b32.xlu0 %v835_v2, %s3299_s28  ;;  %854 = vrot.lane.b32.xlu1 %v835_v2, %s3298_s27 }
 0x420   : > { %878 = vrot.lane.b32.xlu0 %v848_v6, %s3300_s29  ;;  %867 = vrot.lane.b32.xlu1 %v848_v6, %s3299_s28 }
 0x424   : > { %887 = vrot.lane.b32.xlu0 %v835_v2, %s3301_s30  ;;  %876 = vrot.lane.b32.xlu1 %v835_v2, %s3300_s29 }
 0x428   : > { %900 = vrot.lane.b32.xlu0 %v848_v6, %s3302_s7  ;;  %889 = vrot.lane.b32.xlu1 %v848_v6, %s3301_s30 }
 0x42c   : > { %909 = vrot.lane.b32.xlu0 %v835_v2, %s3303_s8  ;;  %898 = vrot.lane.b32.xlu1 %v835_v2, %s3302_s7 }
 0x430   : > { %922 = vrot.lane.b32.xlu0 %v848_v6, %s3304_s11  ;;  %911 = vrot.lane.b32.xlu1 %v848_v6, %s3303_s8 }
 0x434   : > { %931 = vrot.lane.b32.xlu0 %v835_v2, %s3305_s12  ;;  %920 = vrot.lane.b32.xlu1 %v835_v2, %s3304_s11 }
 0x438   : > { %929 = vrot.lane.b32.xlu0 %v846_v5, %s3305_s12  ;;  %933 = vrot.lane.b32.xlu1 %v848_v6, %s3305_s12 }
 0x43c   : > { %944 = vperm.xlu1 %3231, %v3410_v8   ;;  %949 = vperm.xlu0 %3232, %v3415_v10  }
 0x440   : > { %3234 = vset.pattern.permute.xlu0 %v3297_v0  ;;  %3233 = vset.pattern.permute.xlu1 %v3297_v0 }
 0x47e   : > { %v864_v14 = vpop.permute.xlu0 %863  ;;  %v853_v16 = vpop.permute.xlu1 %852 }
 0x482   : > { %v886_v17 = vpop.permute.xlu0 %885  ;;  %v875_v18 = vpop.permute.xlu1 %874 }
 0x486   : > { %v908_v19 = vpop.permute.xlu0 %907  ;;  %v897_v20 = vpop.permute.xlu1 %896 }
 0x48a   : > { %v857_v21 = vpop.permute.xlu0 %856  ;;  %v919_v22 = vpop.permute.xlu1 %918 }
 0x48b   : > { %1010 = vmatpush1.bf16.msra.mxu1 %v857_v21 }
 0x48c   : > { %1011 = vmatprep.subr.bf16.mxu1 %v3297_v0 }
 0x48e   : > { %v866_v23 = vpop.permute.xlu0 %865  ;;  %v855_v24 = vpop.permute.xlu1 %854 }
 0x48f   : > { %v859_v8 = vsel %vm360_vm1, %v855_v24, %v857_v21  ;;  %v858_v10 = vsel %vm360_vm1, %v853_v16, %v855_v24  ;;  %v869_v28 = vsel %vm372_vm2, %v864_v14, %v866_v23 }
 0x490   : > { %966 = vmatprep.subr.bf16.mxu0 %v859_v8 }
 0x491   : > { %967 = vmatpush1.bf16.msra.mxu0 %v858_v10 }
 0x492   : > { %v879_v25 = vpop.permute.xlu0 %878  ;;  %v868_v26 = vpop.permute.xlu1 %867 }
 0x493   : > { %1012 = vmatpush1.bf16.msra.mxu1 %v868_v26  ;;  %v870_v27 = vsel %vm372_vm2, %v866_v23, %v868_v26 }
 0x494   : > { %968 = vmatprep.subr.bf16.mxu0 %v870_v27  ;;  %1013 = vmatprep.subr.bf16.mxu1 %v3297_v0 }
 0x495   : > { %969 = vmatpush1.bf16.msra.mxu0 %v869_v28  ;;  %v292_v28 = vld [vmem:[%s274_s25 + $0x8] sm:$0xff] }
 0x496   : > { %v888_v29 = vpop.permute.xlu0 %887  ;;  %v877_v30 = vpop.permute.xlu1 %876 }
 0x497   : > { %1014 = vmatpush1.bf16.msra.mxu1 %v879_v25  ;;  %v881_v31 = vsel %vm384_vm3, %v877_v30, %v879_v25  ;;  %v880_v32 = vsel %vm384_vm3, %v875_v18, %v877_v30  ;;  %v891_v36 = vsel %vm396_vm4, %v886_v17, %v888_v29 }
 0x498   : > { %970 = vmatprep.subr.bf16.mxu0 %v881_v31  ;;  %1015 = vmatprep.subr.bf16.mxu1 %v3297_v0 }
 0x499   : > { %971 = vmatpush1.bf16.msra.mxu0 %v880_v32 }
 0x49a   : > { %v901_v33 = vpop.permute.xlu0 %900  ;;  %v890_v34 = vpop.permute.xlu1 %889 }
 0x49b   : > { %1016 = vmatpush1.bf16.msra.mxu1 %v890_v34  ;;  %v892_v35 = vsel %vm396_vm4, %v888_v29, %v890_v34  ;;  %v291_v29 = vld [vmem:[%s274_s25] sm:$0xff] }
 0x49c   : > { %972 = vmatprep.subr.bf16.mxu0 %v892_v35  ;;  %1017 = vmatprep.subr.bf16.mxu1 %v3297_v0 }
 0x49d   : > { %973 = vmatpush1.bf16.msra.mxu0 %v891_v36 }
 0x49e   : > { %v910_v37 = vpop.permute.xlu0 %909  ;;  %v899_v38 = vpop.permute.xlu1 %898 }
 0x49f   : > { %1018 = vmatpush1.bf16.msra.mxu1 %v901_v33  ;;  %v903_v39 = vsel %vm408_vm5, %v899_v38, %v901_v33  ;;  %v902_v40 = vsel %vm408_vm5, %v897_v20, %v899_v38  ;;  %v913_v44 = vsel %vm420_vm6, %v908_v19, %v910_v37 }
 0x4a0   : > { %974 = vmatprep.subr.bf16.mxu0 %v903_v39  ;;  %1019 = vmatprep.subr.bf16.mxu1 %v3297_v0 }
 0x4a1   : > { %975 = vmatpush1.bf16.msra.mxu0 %v902_v40 }
 0x4a2   : > { %v923_v41 = vpop.permute.xlu0 %922  ;;  %v912_v42 = vpop.permute.xlu1 %911 }
 0x4a3   : > { %1020 = vmatpush1.bf16.msra.mxu1 %v912_v42  ;;  %v914_v43 = vsel %vm420_vm6, %v910_v37, %v912_v42 }
 0x4a4   : > { %976 = vmatprep.subr.bf16.mxu0 %v914_v43  ;;  %1021 = vmatprep.subr.bf16.mxu1 %v3297_v0 }
 0x4a5   : > { %977 = vmatpush1.bf16.msra.mxu0 %v913_v44 }
 0x4a6   : > { %v932_v45 = vpop.permute.xlu0 %931  ;;  %v921_v46 = vpop.permute.xlu1 %920 }
 0x4a7   : > { %1022 = vmatpush1.bf16.msra.mxu1 %v923_v41  ;;  %v925_v47 = vsel %vm432_vm7, %v921_v46, %v923_v41  ;;  %v924_v48 = vsel %vm432_vm7, %v919_v22, %v921_v46 }
 0x4a8   : > { %978 = vmatprep.subr.bf16.mxu0 %v925_v47  ;;  %1023 = vmatprep.subr.bf16.mxu1 %v3297_v0 }
 0x4a9   : > { %979 = vmatpush1.bf16.msra.mxu0 %v924_v48 }
 0x4aa   : > { %v930_v49 = vpop.permute.xlu0 %929  ;;  %v934_v50 = vpop.permute.xlu1 %933 }
 0x4ab   : > { %v935_v52 = vsel %vm444_vm8, %v930_v49, %v932_v45  ;;  %1024 = vmatpush1.bf16.msra.mxu1 %v934_v50  ;;  %v936_v53 = vsel %vm444_vm8, %v932_v45, %v934_v50  ;;  %v3735_v49 = vld [vmem:[%s3372_s26 + $0x8] ss:$12 sps:$4 sm:$0xff]  }
 0x4ac   : > { %980 = vmatprep.subr.bf16.mxu0 %v936_v53  ;;  %1329 = vmatprep.subr.bf16.mxu1 %v3297_v0 }
 0x4ad   : > { %981 = vmatpush1.bf16.msra.mxu0 %v935_v52 }
 0x4ae   : > { %1040 = vmatmul.mubr.bf16.vlgmr.msra.gmra.mrb[8].mxu1 %v3259_v51 }
 0x4b0   : > { %997 = vmatmul.mubr.bf16.vlgmr.msra.gmra.mrb[8].mxu0 %v3259_v51 }
 0x4bb   : > { %v945_v54 = vpop.permute.xlu1 %944  ;;  %v950_v56 = vpop.permute.xlu0 %949 }
 0x581   : > { %v1041_v55 = vpop.f32.mrb[8].mxu1 }
 0x582   : > { %v1042_v57 = vadd.f32 %v1041_v55, %v945_v54  ;;  %v1043_v58 = vpop.f32.mrb[9].mxu1 }
 0x583   : > { %v998_v59 = vpop.f32.mrb[8].mxu0  ;;  %v1044_v60 = vpop.f32.mrb[10].mxu1 }
 0x584   : > { %v999_v61 = vadd.f32 %v998_v59, %v945_v54  ;;  %v1045_v63 = vadd.f32 %v1044_v60, %v950_v56  ;;  %v1000_v1 = vpop.f32.mrb[9].mxu0  ;;  %v1046_v2 = vpop.f32.mrb[11].mxu1  ;;  %v1050_v3 = vmul.f32 %v1042_v57, %v3463_v62 }
 0x585   : > { %v1001_v5 = vadd.f32 %v1000_v1, %v945_v54  ;;  %v1002_v6 = vpop.f32.mrb[10].mxu0  ;;  %v3804_v2 = vld [vmem:[%s4330_s4] sm:$0xff] }
 0x586   : > { %v1048_v7 = vmul.f32 %v999_v61, %v3466_v4  ;;  %v1053_v11 = vmul.f32 %v1045_v63, %v3463_v62  ;;  %v1003_v14 = vadd.f32 %v1002_v6, %v950_v56  ;;  %v1004_v16 = vpop.f32.mrb[11].mxu0  ;;  %v1056_v21 = vmax.f32 %v1050_v3, 0.0 }
 0x587   : > { %v1049_v17 = vmul.f32 %v1001_v5, %v3471_v9  ;;  %v1005_v18 = vadd.f32 %v1004_v16, %v950_v56  ;;  %v3309_v3 = vmov 3  }
 0x588   : > { %v1059_v19 = vmax.f32 %v1053_v11, 0.0  ;;  %v1051_v20 = vmul.f32 %v1003_v14, %v3466_v4  ;;  %v1054_v23 = vmax.f32 %v1048_v7, 0.0  ;;  %v3816_v14 = vld [vmem:[%s4330_s4 + $0x8] sm:$0xff] }
 0x589   : > { %v1052_v22 = vmul.f32 %v1005_v18, %v3471_v9  ;;  %v1055_v10 = vmax.f32 %v1049_v17, 0.0 }
 0x58a   : > { %v1057_v24 = vmax.f32 %v1051_v20, 0.0  ;;  %v1062_v8 = vpack.c.bf16 %v1059_v19, %v1056_v21 }
 0x58b   : > { %v1058_v25 = vmax.f32 %v1052_v22, 0.0 }
 0x58c   : > { %1070 = vrot.lane.b32.xlu0 %v1062_v8, %s3306_s24  ;;  %v1060_v26 = vpack.c.bf16 %v1057_v24, %v1054_v23 }
 0x58d   : > { %v1061_v27 = vpack.c.bf16 %v1058_v25, %v1055_v10 }
 0x58e   : > { %1066 = vrot.lane.b32.xlu1 %v1060_v26, %s3306_s24 }
 0x590   : > { %300 = vperm.xlu0 %3234, %v292_v28  }
 0x592   : > { %1068 = vrot.lane.b32.xlu1 %v1061_v27, %s3306_s24 }
 0x594   : > { %3235 = vset.pattern.permute.xlu0 %v3309_v3 }
 0x596   : > { %295 = vperm.xlu1 %3233, %v291_v29  }
 0x59a   : > { %3236 = vset.pattern.permute.xlu1 %v3309_v3 }
 0x5fe   : > { %v1071_v31 = vpop.permute.xlu0 %1070 }
 0x600   : > { %v1067_v30 = vpop.permute.xlu1 %1066 }
 0x601   : > { %1077 = vst.msk [vmem:[#allocation2] sm:$0xff] %vm601_vm11, %v1067_v30 }
 0x604   : > { %v1069_v32 = vpop.permute.xlu1 %1068 }
 0x605   : > { %v1072_v33 = vsel %vm287_vm9, %v1067_v30, %v1069_v32  ;;  %v1073_v34 = vsel %vm287_vm9, %v1069_v32, %v1071_v31 }
 0x606   : > { %1079 = vst.msk [vmem:[#allocation2 + $0x10] sm:$0xff] %vm604_vm12, %v1073_v34  ;;  %1286 = vmatprep.subr.bf16.mxu0 %v1072_v33 }
 0x608   : > { %v1180_v35 = vld [vmem:[#allocation2] sm:$0xff] }
 0x609   : > { %1287 = vmatpush1.bf16.msra.mxu0 %v1180_v35 }
 0x60d   : > { %v1182_v36 = vld [vmem:[#allocation2 + $0x10] sm:$0xff] }
 0x60e   : > { %1330 = vmatpush1.bf16.msra.mxu1 %v1182_v36 }
 0x60f   : > { %1331 = vmatprep.subr.bf16.mxu1 %v3297_v0  ;;  %v301_v37 = vpop.permute.xlu0 %300 }
 0x610   : > { %v322_v38 = vmul.f32 %v3424_v13, %v301_v37  ;;  %v323_v39 = vmul.f32 %v3421_v12, %v301_v37  ;;  %v324_v40 = vmul.f32 %v3430_v15, %v301_v37 }
 0x615   : > { %v296_v41 = vpop.permute.xlu1 %295 }
 0x616   : > { %v319_v42 = vmul.f32 %v3424_v13, %v296_v41  ;;  %v320_v43 = vmul.f32 %v3421_v12, %v296_v41  ;;  %v321_v44 = vmul.f32 %v3430_v15, %v296_v41  ;;  %v3264_v12 = vld [vmem:[%s4329_s3 + $0x44] ss:$8 sps:$4 sm:$0xff]  }
 0x617   : > { %3110 = vmatprep.mubr.msk.bf16.mxu1 %vm471_vm0, %v3264_v12  ;;  %3109 = vmatprep.mubr.msk.bf16.mxu0 %vm471_vm0, %v3264_v12  ;;  %v3721_v13 = vld [vmem:[%s3372_s26 + $0x4] ss:$12 sps:$4 sm:$0xff]   ;;  %v3728_v15 = vld [vmem:[%s3372_s26] ss:$12 sps:$4 sm:$0xff]  }
 0x618   : > { %v3645_v45 = vpack.c.bf16 %v322_v38, %v319_v42  ;;  %v3647_v46 = vpack.c.bf16 %v323_v39, %v320_v43  ;;  %v327_v47 = vpack.c.bf16 %v324_v40, %v321_v44 }
 0x61a   : > { %331 = vst.msk [vmem:[#allocation3 + $0x10] sm:$0xff] %vm330_vm13, %v327_v47  ;;  %1091 = vrot.lane.b32.xlu0 %v3647_v46, %s3298_s27  ;;  %vm1899_vm13 = vcmask 1043608  }
 0x61b   : > { %vm1901_vm10 = vmor %vm1900_vm15, %vm1899_vm13 }
 0x61e   : > { %1089 = vrot.lane.b32.xlu0 %v3645_v45, %s3298_s27 }
 0x621   : > { %v3653_v48 = vld [vmem:[#allocation3 + $0x10] sm:$0xff] }
 0x622   : > { %1093 = vrot.lane.b32.xlu1 %v3653_v48, %s3298_s27  ;;  %1104 = vrot.lane.b32.xlu0 %v3653_v48, %s3299_s28 }
 0x626   : > { %1102 = vrot.lane.b32.xlu1 %v3647_v46, %s3299_s28  ;;  %1113 = vrot.lane.b32.xlu0 %v3647_v46, %s3300_s29 }
 0x62a   : > { %1100 = vrot.lane.b32.xlu1 %v3645_v45, %s3299_s28  ;;  %1111 = vrot.lane.b32.xlu0 %v3645_v45, %s3300_s29 }
 0x62e   : > { %1115 = vrot.lane.b32.xlu1 %v3653_v48, %s3300_s29  ;;  %1126 = vrot.lane.b32.xlu0 %v3653_v48, %s3301_s30 }
 0x632   : > { %1124 = vrot.lane.b32.xlu1 %v3647_v46, %s3301_s30  ;;  %1186 = vrot.lane.b32.xlu0 %v1180_v35, %s3298_s27 }
 0x636   : > { %1197 = vrot.lane.b32.xlu1 %v1180_v35, %s3299_s28  ;;  %1208 = vrot.lane.b32.xlu0 %v1180_v35, %s3300_s29 }
 0x63a   : > { %1219 = vrot.lane.b32.xlu1 %v1180_v35, %s3301_s30  ;;  %1230 = vrot.lane.b32.xlu0 %v1180_v35, %s3302_s7 }
 0x63e   : > { %1241 = vrot.lane.b32.xlu1 %v1180_v35, %s3303_s8  ;;  %1252 = vrot.lane.b32.xlu0 %v1180_v35, %s3304_s11 }
 0x642   : > { %1263 = vrot.lane.b32.xlu1 %v1180_v35, %s3305_s12  ;;  %1201 = vrot.lane.b32.xlu0 %v1182_v36, %s3299_s28 }
 0x646   : > { %1188 = vrot.lane.b32.xlu1 %v1072_v33, %s3298_s27  ;;  %1210 = vrot.lane.b32.xlu0 %v1072_v33, %s3300_s29 }
 0x64a   : > { %1190 = vrot.lane.b32.xlu1 %v1182_v36, %s3298_s27  ;;  %1223 = vrot.lane.b32.xlu0 %v1182_v36, %s3301_s30 }
 0x64e   : > { %1199 = vrot.lane.b32.xlu1 %v1072_v33, %s3299_s28  ;;  %1232 = vrot.lane.b32.xlu0 %v1072_v33, %s3302_s7 }
 0x652   : > { %1212 = vrot.lane.b32.xlu1 %v1182_v36, %s3300_s29  ;;  %1245 = vrot.lane.b32.xlu0 %v1182_v36, %s3303_s8 }
 0x656   : > { %1221 = vrot.lane.b32.xlu1 %v1072_v33, %s3301_s30  ;;  %1254 = vrot.lane.b32.xlu0 %v1072_v33, %s3304_s11 }
 0x65a   : > { %1234 = vrot.lane.b32.xlu1 %v1182_v36, %s3302_s7  ;;  %1267 = vrot.lane.b32.xlu0 %v1182_v36, %s3305_s12 }
 0x65e   : > { %1243 = vrot.lane.b32.xlu1 %v1072_v33, %s3303_s8  ;;  %1135 = vrot.lane.b32.xlu0 %v3647_v46, %s3302_s7 }
 0x662   : > { %1256 = vrot.lane.b32.xlu1 %v1182_v36, %s3304_s11  ;;  %1133 = vrot.lane.b32.xlu0 %v3645_v45, %s3302_s7 }
 0x666   : > { %1265 = vrot.lane.b32.xlu1 %v1072_v33, %s3305_s12  ;;  %1148 = vrot.lane.b32.xlu0 %v3653_v48, %s3303_s8 }
 0x66a   : > { %1122 = vrot.lane.b32.xlu1 %v3645_v45, %s3301_s30  ;;  %1157 = vrot.lane.b32.xlu0 %v3647_v46, %s3304_s11 }
 0x66e   : > { %1137 = vrot.lane.b32.xlu1 %v3653_v48, %s3302_s7  ;;  %1155 = vrot.lane.b32.xlu0 %v3645_v45, %s3304_s11 }
 0x672   : > { %1146 = vrot.lane.b32.xlu1 %v3647_v46, %s3303_s8  ;;  %1170 = vrot.lane.b32.xlu0 %v3653_v48, %s3305_s12 }
 0x676   : > { %1144 = vrot.lane.b32.xlu1 %v3645_v45, %s3303_s8  ;;  %1491 = vrot.lane.b32.xlu0 %v3721_v13, %s3298_s27 }
 0x67a   : > { %1159 = vrot.lane.b32.xlu1 %v3653_v48, %s3304_s11  ;;  %1489 = vrot.lane.b32.xlu0 %v3728_v15, %s3298_s27 }
 0x67e   : > { %1168 = vrot.lane.b32.xlu1 %v3647_v46, %s3305_s12  ;;  %1504 = vrot.lane.b32.xlu0 %v3735_v49, %s3299_s28 }
 0x682   : > { %1166 = vrot.lane.b32.xlu1 %v3645_v45, %s3305_s12  ;;  %1513 = vrot.lane.b32.xlu0 %v3721_v13, %s3300_s29 }
 0x686   : > { %1493 = vrot.lane.b32.xlu1 %v3735_v49, %s3298_s27  ;;  %1511 = vrot.lane.b32.xlu0 %v3728_v15, %s3300_s29 }
 0x68a   : > { %1502 = vrot.lane.b32.xlu1 %v3721_v13, %s3299_s28  ;;  %1526 = vrot.lane.b32.xlu0 %v3735_v49, %s3301_s30 }
 0x68c   : > { %v3753_v50 = vpop.permute.xlu0 %1091 }
 0x68e   : > { %1500 = vrot.lane.b32.xlu1 %v3728_v15, %s3299_s28  ;;  %1535 = vrot.lane.b32.xlu0 %v3721_v13, %s3302_s7 }
 0x690   : > { %v3759_v51 = vpop.permute.xlu0 %1089 }
 0x692   : > { %1515 = vrot.lane.b32.xlu1 %v3735_v49, %s3300_s29  ;;  %1533 = vrot.lane.b32.xlu0 %v3728_v15, %s3302_s7 }
 0x694   : > { %v3765_v52 = vpop.permute.xlu1 %1093  ;;  %v3767_v53 = vpop.permute.xlu0 %1104 }
 0x696   : > { %1524 = vrot.lane.b32.xlu1 %v3721_v13, %s3301_s30  ;;  %1548 = vrot.lane.b32.xlu0 %v3735_v49, %s3303_s8 }
 0x698   : > { %v3773_v54 = vpop.permute.xlu1 %1102  ;;  %v3775_v55 = vpop.permute.xlu0 %1113 }
 0x69a   : > { %1522 = vrot.lane.b32.xlu1 %v3728_v15, %s3301_s30  ;;  %1557 = vrot.lane.b32.xlu0 %v3721_v13, %s3304_s11 }
 0x69c   : > { %v3781_v56 = vpop.permute.xlu1 %1100  ;;  %v3783_v57 = vpop.permute.xlu0 %1111 }
 0x69e   : > { %1537 = vrot.lane.b32.xlu1 %v3735_v49, %s3302_s7  ;;  %1555 = vrot.lane.b32.xlu0 %v3728_v15, %s3304_s11 }
 0x6a0   : > { %v3789_v58 = vpop.permute.xlu1 %1115  ;;  %v3791_v59 = vpop.permute.xlu0 %1126 }
 0x6a2   : > { %1546 = vrot.lane.b32.xlu1 %v3721_v13, %s3303_s8  ;;  %1570 = vrot.lane.b32.xlu0 %v3735_v49, %s3305_s12 }
 0x6a4   : > { %v3797_v60 = vpop.permute.xlu1 %1124  ;;  %v1187_v61 = vpop.permute.xlu0 %1186 }
 0x6a6   : > { %1544 = vrot.lane.b32.xlu1 %v3728_v15, %s3303_s8  ;;  %1683 = vperm.xlu0 %3235, %v3804_v2  }
 0x6a8   : > { %v1198_v63 = vpop.permute.xlu1 %1197  ;;  %v1209_v1 = vpop.permute.xlu0 %1208 }
 0x6aa   : > { %1559 = vrot.lane.b32.xlu1 %v3735_v49, %s3304_s11 }
 0x6ac   : > { %v1220_v5 = vpop.permute.xlu1 %1219  ;;  %v1231_v6 = vpop.permute.xlu0 %1230 }
 0x6ae   : > { %1568 = vrot.lane.b32.xlu1 %v3721_v13, %s3305_s12 }
 0x6b0   : > { %v1242_v7 = vpop.permute.xlu1 %1241  ;;  %v1253_v11 = vpop.permute.xlu0 %1252 }
 0x6b2   : > { %1566 = vrot.lane.b32.xlu1 %v3728_v15, %s3305_s12 }
 0x6b4   : > { %v3818_v16 = vpop.permute.xlu1 %1263  ;;  %v1202_v17 = vpop.permute.xlu0 %1201 }
 0x6b6   : > { %1688 = vperm.xlu1 %3236, %v3816_v14  }
 0x6b8   : > { %v1189_v18 = vpop.permute.xlu1 %1188  ;;  %v1211_v19 = vpop.permute.xlu0 %1210 }
 0x6b9   : > { %v1192_v23 = vsel %vm360_vm1, %v1187_v61, %v1189_v18  ;;  %v1214_v29 = vsel %vm384_vm3, %v1209_v1, %v1211_v19  ;;  %v3266_v61 = vld [vmem:[%s4329_s3 + $0x40] ss:$8 sps:$4 sm:$0xff]  }
 0x6bc   : > { %v1191_v20 = vpop.permute.xlu1 %1190  ;;  %v1224_v21 = vpop.permute.xlu0 %1223 }
 0x6bd   : > { %1332 = vmatpush1.bf16.msra.mxu1 %v1191_v20  ;;  %v1193_v22 = vsel %vm360_vm1, %v1189_v18, %v1191_v20 }
 0x6be   : > { %1288 = vmatprep.subr.bf16.mxu0 %v1193_v22  ;;  %1333 = vmatprep.subr.bf16.mxu1 %v3297_v0 }
 0x6bf   : > { %1289 = vmatpush1.bf16.msra.mxu0 %v1192_v23 }
 0x6c0   : > { %v1200_v24 = vpop.permute.xlu1 %1199  ;;  %v1233_v8 = vpop.permute.xlu0 %1232 }
 0x6c1   : > { %1334 = vmatpush1.bf16.msra.mxu1 %v1202_v17  ;;  %v1204_v10 = vsel %vm372_vm2, %v1200_v24, %v1202_v17  ;;  %v1203_v25 = vsel %vm372_vm2, %v1198_v63, %v1200_v24  ;;  %v1236_v37 = vsel %vm408_vm5, %v1231_v6, %v1233_v8 }
 0x6c2   : > { %1290 = vmatprep.subr.bf16.mxu0 %v1204_v10  ;;  %1335 = vmatprep.subr.bf16.mxu1 %v3297_v0 }
 0x6c3   : > { %1291 = vmatpush1.bf16.msra.mxu0 %v1203_v25 }
 0x6c4   : > { %v1213_v26 = vpop.permute.xlu1 %1212  ;;  %v1246_v27 = vpop.permute.xlu0 %1245 }
 0x6c5   : > { %1336 = vmatpush1.bf16.msra.mxu1 %v1213_v26  ;;  %v1215_v28 = vsel %vm384_vm3, %v1211_v19, %v1213_v26 }
 0x6c6   : > { %1292 = vmatprep.subr.bf16.mxu0 %v1215_v28  ;;  %1337 = vmatprep.subr.bf16.mxu1 %v3297_v0 }
 0x6c7   : > { %1293 = vmatpush1.bf16.msra.mxu0 %v1214_v29  ;;  %v3269_v29 = vld [vmem:[%s4329_s3 + $0x30] ss:$8 sps:$4 sm:$0xff]  }
 0x6c8   : > { %v1222_v30 = vpop.permute.xlu1 %1221  ;;  %v1255_v31 = vpop.permute.xlu0 %1254 }
 0x6c9   : > { %1338 = vmatpush1.bf16.msra.mxu1 %v1224_v21  ;;  %v1226_v32 = vsel %vm396_vm4, %v1222_v30, %v1224_v21  ;;  %v1225_v33 = vsel %vm396_vm4, %v1220_v5, %v1222_v30  ;;  %v1258_v47 = vsel %vm432_vm7, %v1253_v11, %v1255_v31  ;;  %v3267_v5 = vld [vmem:[%s4329_s3 + $0x34] ss:$8 sps:$4 sm:$0xff]   ;;  %v1096_v11 = vsel %vm360_vm1, %v3753_v50, %v3765_v52 }
 0x6ca   : > { %1294 = vmatprep.subr.bf16.mxu0 %v1226_v32  ;;  %1339 = vmatprep.subr.bf16.mxu1 %v3297_v0 }
 0x6cb   : > { %1295 = vmatpush1.bf16.msra.mxu0 %v1225_v33 }
 0x6cc   : > { %v1235_v34 = vpop.permute.xlu1 %1234  ;;  %v1268_v35 = vpop.permute.xlu0 %1267 }
 0x6cd   : > { %1340 = vmatpush1.bf16.msra.mxu1 %v1235_v34  ;;  %v1237_v36 = vsel %vm408_vm5, %v1233_v8, %v1235_v34 }
 0x6ce   : > { %1296 = vmatprep.subr.bf16.mxu0 %v1237_v36  ;;  %1341 = vmatprep.subr.bf16.mxu1 %v3297_v0 }
 0x6cf   : > { %1297 = vmatpush1.bf16.msra.mxu0 %v1236_v37 }
 0x6d0   : > { %v1244_v38 = vpop.permute.xlu1 %1243  ;;  %v3836_v39 = vpop.permute.xlu0 %1135 }
 0x6d1   : > { %1342 = vmatpush1.bf16.msra.mxu1 %v1246_v27  ;;  %v1248_v40 = vsel %vm420_vm6, %v1244_v38, %v1246_v27  ;;  %v1247_v41 = vsel %vm420_vm6, %v1242_v7, %v1244_v38 }
 0x6d2   : > { %1298 = vmatprep.subr.bf16.mxu0 %v1248_v40  ;;  %1343 = vmatprep.subr.bf16.mxu1 %v3297_v0 }
 0x6d3   : > { %1299 = vmatpush1.bf16.msra.mxu0 %v1247_v41 }
 0x6d4   : > { %v1257_v42 = vpop.permute.xlu1 %1256  ;;  %v3841_v43 = vpop.permute.xlu0 %1133 }
 0x6d5   : > { %1344 = vmatpush1.bf16.msra.mxu1 %v1257_v42  ;;  %v1259_v44 = vsel %vm432_vm7, %v1255_v31, %v1257_v42  ;;  %v1139_v22 = vsel %vm408_vm5, %v3841_v43, %v3836_v39  ;;  %v3270_v31 = vld [vmem:[%s4329_s3 + $0x54] ss:$8 sps:$4 sm:$0xff]  }
 0x6d6   : > { %1300 = vmatprep.subr.bf16.mxu0 %v1259_v44  ;;  %1345 = vmatprep.subr.bf16.mxu1 %v3297_v0 }
 0x6d7   : > { %1301 = vmatpush1.bf16.msra.mxu0 %v1258_v47 }
 0x6d8   : > { %v1266_v12 = vpop.permute.xlu1 %1265  ;;  %v1149_v63 = vpop.permute.xlu0 %1148 }
 0x6d9   : > { %1346 = vmatpush1.bf16.msra.mxu1 %v1268_v35  ;;  %v1270_v1 = vsel %vm444_vm8, %v1266_v12, %v1268_v35  ;;  %v1269_v3 = vsel %vm444_vm8, %v3818_v16, %v1266_v12 }
 0x6da   : > { %1302 = vmatprep.subr.bf16.mxu0 %v1270_v1  ;;  %1425 = vmatprep.subr.bf16.mxu1 %v3297_v0 }
 0x6db   : > { %1303 = vmatpush1.bf16.msra.mxu0 %v1269_v3 }
 0x6dc   : > { %v1123_v6 = vpop.permute.xlu1 %1122  ;;  %1382 = vmatprep.subr.bf16.mxu0 %v3647_v46  ;;  %1362 = vmatmul.mubr.bf16.vlgmr.msra.gmra.mrb[12].mxu1 %v3266_v61  ;;  %v1158_v7 = vpop.permute.xlu0 %1157 }
 0x6dd   : > { %1426 = vmatpush1.bf16.msra.mxu1 %v3653_v48  ;;  %3114 = vmatprep.mubr.msk.bf16.mxu1 %vm471_vm0, %v3267_v5  ;;  %v1095_v48 = vsel %vm360_vm1, %v3759_v51, %v3753_v50  ;;  %v1118_v50 = vsel %vm384_vm3, %v3775_v55, %v3789_v58  ;;  %v1128_v21 = vsel %vm396_vm4, %v1123_v6, %v3797_v60 }
 0x6de   : > { %1319 = vmatmul.mubr.bf16.vlgmr.msra.gmra.mrb[12].mxu0 %v3266_v61  ;;  %1427 = vmatprep.subr.bf16.mxu1 %v3297_v0 }
 0x6df   : > { %1383 = vmatpush1.bf16.msra.mxu0 %v3645_v45  ;;  %3113 = vmatprep.mubr.msk.bf16.mxu0 %vm471_vm0, %v3267_v5  ;;  %v1107_v45 = vsel %vm372_vm2, %v3773_v54, %v3767_v53 }
 0x6e0   : > { %v1138_v16 = vpop.permute.xlu1 %1137  ;;  %1384 = vmatprep.subr.bf16.mxu0 %v1096_v11  ;;  %v1156_v46 = vpop.permute.xlu0 %1155 }
 0x6e1   : > { %1428 = vmatpush1.bf16.msra.mxu1 %v3765_v52  ;;  %v1106_v52 = vsel %vm372_vm2, %v3781_v56, %v3773_v54  ;;  %v1129_v54 = vsel %vm396_vm4, %v3797_v60, %v3791_v59  ;;  %v1161_v26 = vsel %vm432_vm7, %v1156_v46, %v1158_v7 }
 0x6e2   : > { %1429 = vmatprep.subr.bf16.mxu1 %v3297_v0 }
 0x6e3   : > { %1385 = vmatpush1.bf16.msra.mxu0 %v1095_v48 }
 0x6e4   : > { %v1147_v17 = vpop.permute.xlu1 %1146  ;;  %1386 = vmatprep.subr.bf16.mxu0 %v1107_v45  ;;  %v1171_v18 = vpop.permute.xlu0 %1170 }
 0x6e5   : > { %1430 = vmatpush1.bf16.msra.mxu1 %v3767_v53  ;;  %v1117_v53 = vsel %vm384_vm3, %v3783_v57, %v3775_v55  ;;  %v1140_v55 = vsel %vm408_vm5, %v3836_v39, %v1138_v16 }
 0x6e6   : > { %1431 = vmatprep.subr.bf16.mxu1 %v3297_v0 }
 0x6e7   : > { %1387 = vmatpush1.bf16.msra.mxu0 %v1106_v52 }
 0x6e8   : > { %v1145_v51 = vpop.permute.xlu1 %1144  ;;  %1388 = vmatprep.subr.bf16.mxu0 %v1118_v50  ;;  %v1492_v19 = vpop.permute.xlu0 %1491 }
 0x6e9   : > { %1432 = vmatpush1.bf16.msra.mxu1 %v3789_v58  ;;  %v1150_v24 = vsel %vm420_vm6, %v1145_v51, %v1147_v17 }
 0x6ea   : > { %1433 = vmatprep.subr.bf16.mxu1 %v3297_v0 }
 0x6eb   : > { %1389 = vmatpush1.bf16.msra.mxu0 %v1117_v53 }
 0x6ec   : > { %v1160_v56 = vpop.permute.xlu1 %1159  ;;  %1390 = vmatprep.subr.bf16.mxu0 %v1129_v54  ;;  %v1490_v20 = vpop.permute.xlu0 %1489 }
 0x6ed   : > { %1434 = vmatpush1.bf16.msra.mxu1 %v3791_v59  ;;  %v1151_v59 = vsel %vm420_vm6, %v1147_v17, %v1149_v63  ;;  %v1162_v8 = vsel %vm432_vm7, %v1158_v7, %v1160_v56  ;;  %v1495_v37 = vsel %vm360_vm1, %v1490_v20, %v1492_v19  ;;  %v3272_v17 = vld [vmem:[%s4329_s3 + $0x50] ss:$8 sps:$4 sm:$0xff]  }
 0x6ee   : > { %1435 = vmatprep.subr.bf16.mxu1 %v3297_v0 }
 0x6ef   : > { %1391 = vmatpush1.bf16.msra.mxu0 %v1128_v21 }
 0x6f0   : > { %v1169_v57 = vpop.permute.xlu1 %1168  ;;  %1392 = vmatprep.subr.bf16.mxu0 %v1140_v55  ;;  %v1505_v58 = vpop.permute.xlu0 %1504 }
 0x6f1   : > { %1436 = vmatpush1.bf16.msra.mxu1 %v1138_v16  ;;  %v1173_v27 = vsel %vm444_vm8, %v1169_v57, %v1171_v18 }
 0x6f2   : > { %1437 = vmatprep.subr.bf16.mxu1 %v3297_v0 }
 0x6f3   : > { %1393 = vmatpush1.bf16.msra.mxu0 %v1139_v22 }
 0x6f4   : > { %v1167_v60 = vpop.permute.xlu1 %1166  ;;  %1394 = vmatprep.subr.bf16.mxu0 %v1151_v59  ;;  %v1514_v23 = vpop.permute.xlu0 %1513 }
 0x6f5   : > { %1438 = vmatpush1.bf16.msra.mxu1 %v1149_v63  ;;  %v1172_v32 = vsel %vm444_vm8, %v1167_v60, %v1169_v57 }
 0x6f6   : > { %1439 = vmatprep.subr.bf16.mxu1 %v3297_v0 }
 0x6f7   : > { %1395 = vmatpush1.bf16.msra.mxu0 %v1150_v24 }
 0x6f8   : > { %v1494_v10 = vpop.permute.xlu1 %1493  ;;  %1396 = vmatprep.subr.bf16.mxu0 %v1162_v8  ;;  %v1512_v25 = vpop.permute.xlu0 %1511 }
 0x6f9   : > { %1440 = vmatpush1.bf16.msra.mxu1 %v1160_v56  ;;  %v1496_v35 = vsel %vm360_vm1, %v1492_v19, %v1494_v10  ;;  %v1517_v42 = vsel %vm384_vm3, %v1512_v25, %v1514_v23 }
 0x6fa   : > { %1441 = vmatprep.subr.bf16.mxu1 %v3297_v0 }
 0x6fb   : > { %1397 = vmatpush1.bf16.msra.mxu0 %v1161_v26 }
 0x6fc   : > { %v1503_v28 = vpop.permute.xlu1 %1502  ;;  %1398 = vmatprep.subr.bf16.mxu0 %v1173_v27  ;;  %v1527_v30 = vpop.permute.xlu0 %1526 }
 0x6fd   : > { %1442 = vmatpush1.bf16.msra.mxu1 %v1171_v18 }
 0x6fe   : > { %1632 = vmatprep.subr.bf16.mxu1 %v3297_v0 }
 0x6ff   : > { %1399 = vmatpush1.bf16.msra.mxu0 %v1172_v32 }
 0x700   : > { %v1501_v33 = vpop.permute.xlu1 %1500  ;;  %1458 = vmatmul.mubr.bf16.vlgmr.msra.gmra.mrb[16].mxu1 %v3269_v29  ;;  %1589 = vmatprep.subr.bf16.mxu0 %v3721_v13  ;;  %v1536_v34 = vpop.permute.xlu0 %1535 }
 0x701   : > { %1633 = vmatpush1.bf16.msra.mxu1 %v3735_v49  ;;  %3123 = vmatprep.mubr.msk.bf16.mxu1 %vm471_vm0, %v3270_v31  ;;  %v1507_v49 = vsel %vm372_vm2, %v1503_v28, %v1505_v58 }
 0x702   : > { %1415 = vmatmul.mubr.bf16.vlgmr.msra.gmra.mrb[12].mxu0 %v3269_v29  ;;  %1634 = vmatprep.subr.bf16.mxu1 %v3297_v0 }
 0x703   : > { %1590 = vmatpush1.bf16.msra.mxu0 %v3728_v15  ;;  %3122 = vmatprep.mubr.msk.bf16.mxu0 %vm471_vm0, %v3270_v31  ;;  %v1506_v15 = vsel %vm372_vm2, %v1501_v33, %v1503_v28 }
 0x704   : > { %v1516_v36 = vpop.permute.xlu1 %1515  ;;  %1591 = vmatprep.subr.bf16.mxu0 %v1496_v35  ;;  %v1534_v13 = vpop.permute.xlu0 %1533 }
 0x705   : > { %1635 = vmatpush1.bf16.msra.mxu1 %v1494_v10  ;;  %v1518_v39 = vsel %vm384_vm3, %v1514_v23, %v1516_v36  ;;  %v1539_v1 = vsel %vm408_vm5, %v1534_v13, %v1536_v34 }
 0x706   : > { %1636 = vmatprep.subr.bf16.mxu1 %v3297_v0 }
 0x707   : > { %1592 = vmatpush1.bf16.msra.mxu0 %v1495_v37 }
 0x708   : > { %v1525_v38 = vpop.permute.xlu1 %1524  ;;  %1593 = vmatprep.subr.bf16.mxu0 %v1507_v49  ;;  %v1549_v41 = vpop.permute.xlu0 %1548 }
 0x709   : > { %1637 = vmatpush1.bf16.msra.mxu1 %v1505_v58  ;;  %v1529_v43 = vsel %vm396_vm4, %v1525_v38, %v1527_v30 }
 0x70a   : > { %1638 = vmatprep.subr.bf16.mxu1 %v3297_v0 }
 0x70b   : > { %1594 = vmatpush1.bf16.msra.mxu0 %v1506_v15 }
 0x70c   : > { %v1523_v40 = vpop.permute.xlu1 %1522  ;;  %1595 = vmatprep.subr.bf16.mxu0 %v1518_v39  ;;  %v1558_v12 = vpop.permute.xlu0 %1557 }
 0x70d   : > { %1639 = vmatpush1.bf16.msra.mxu1 %v1516_v36  ;;  %v1528_v47 = vsel %vm396_vm4, %v1523_v40, %v1525_v38 }
 0x70e   : > { %1640 = vmatprep.subr.bf16.mxu1 %v3297_v0 }
 0x70f   : > { %1596 = vmatpush1.bf16.msra.mxu0 %v1517_v42 }
 0x710   : > { %v1538_v44 = vpop.permute.xlu1 %1537  ;;  %1597 = vmatprep.subr.bf16.mxu0 %v1529_v43  ;;  %v1556_v6 = vpop.permute.xlu0 %1555 }
 0x711   : > { %1641 = vmatpush1.bf16.msra.mxu1 %v1527_v30  ;;  %v1540_v61 = vsel %vm408_vm5, %v1536_v34, %v1538_v44  ;;  %v1561_v46 = vsel %vm432_vm7, %v1556_v6, %v1558_v12 }
 0x712   : > { %1642 = vmatprep.subr.bf16.mxu1 %v3297_v0 }
 0x713   : > { %1598 = vmatpush1.bf16.msra.mxu0 %v1528_v47 }
 0x714   : > { %v1547_v63 = vpop.permute.xlu1 %1546  ;;  %1599 = vmatprep.subr.bf16.mxu0 %v1540_v61  ;;  %v1571_v48 = vpop.permute.xlu0 %1570 }
 0x715   : > { %1643 = vmatpush1.bf16.msra.mxu1 %v1538_v44  ;;  %v1551_v3 = vsel %vm420_vm6, %v1547_v63, %v1549_v41 }
 0x716   : > { %1644 = vmatprep.subr.bf16.mxu1 %v3297_v0 }
 0x717   : > { %1600 = vmatpush1.bf16.msra.mxu0 %v1539_v1 }
 0x718   : > { %v1545_v5 = vpop.permute.xlu1 %1544  ;;  %1601 = vmatprep.subr.bf16.mxu0 %v1551_v3 }
 0x719   : > { %v1550_v7 = vsel %vm420_vm6, %v1545_v5, %v1547_v63  ;;  %1645 = vmatpush1.bf16.msra.mxu1 %v1549_v41  ;;  %v3310_v63 = vmov 0.0  }
 0x71a   : > { %1646 = vmatprep.subr.bf16.mxu1 %v3297_v0 }
 0x71b   : > { %1602 = vmatpush1.bf16.msra.mxu0 %v1550_v7 }
 0x71c   : > { %v1560_v11 = vpop.permute.xlu1 %1559 }
 0x71d   : > { %1647 = vmatpush1.bf16.msra.mxu1 %v1560_v11  ;;  %v1562_v16 = vsel %vm432_vm7, %v1558_v12, %v1560_v11  ;;  %v3312_v11 = vmov 4  }
 0x71e   : > { %1603 = vmatprep.subr.bf16.mxu0 %v1562_v16  ;;  %1648 = vmatprep.subr.bf16.mxu1 %v3297_v0 }
 0x71f   : > { %1604 = vmatpush1.bf16.msra.mxu0 %v1561_v46  ;;  %3237 = vset.pattern.permute.xlu1 %v3312_v11 }
 0x720   : > { %v1569_v45 = vpop.permute.xlu1 %1568  ;;  %3238 = vset.pattern.permute.xlu0 %v3312_v11 }
 0x721   : > { %1649 = vmatpush1.bf16.msra.mxu1 %v1571_v48  ;;  %v1573_v18 = vsel %vm444_vm8, %v1569_v45, %v1571_v48 }
 0x722   : > { %1605 = vmatprep.subr.bf16.mxu0 %v1573_v18  ;;  %3177 = vmatprep.subr.bf16.mxu1 %v3310_v63  ;;  %v3273_v18 = vld [vmem:[%s4329_s3 + $0x60] ss:$8 sps:$4 sm:$0xff]  }
 0x724   : > { %v1567_v52 = vpop.permute.xlu1 %1566  ;;  %1665 = vmatmul.mubr.bf16.vlgmr.msra.gmra.mrb[20].mxu1 %v3272_v17 }
 0x725   : > { %v1572_v50 = vsel %vm444_vm8, %v1567_v52, %v1569_v45  ;;  %v1684_v59 = vpop.permute.xlu0 %1683  ;;  %3179 = vmatprep.mubr.msk.bf16.mxu1 %vm4333_vm14, %v3310_v63  ;;  %vm1903_vm14 = vcmask 396288  }
 0x726   : > { %1606 = vmatpush1.bf16.msra.mxu0 %v1572_v50 }
 0x729   : > { %1622 = vmatmul.mubr.bf16.vlgmr.msra.gmra.mrb[12].mxu0 %v3272_v17 }
 0x72a   : > { %1801 = vmatprep.mubr.bf16.mxu0 %v3297_v0 }
 0x735   : > { %v1689_v8 = vpop.permute.xlu1 %1688 }
 0x7af   : > { %v1363_v51 = vpop.f32.mrb[12].mxu1 }
 0x7b0   : > { %v1365_v19 = vpop.f32.mrb[13].mxu1 }
 0x7b1   : > { %v1366_v53 = vpop.f32.mrb[14].mxu1 }
 0x7b2   : > { %v1368_v54 = vpop.f32.mrb[15].mxu1 }
 0x7d3   : > { %v1459_v56 = vpop.f32.mrb[16].mxu1 }
 0x7d4   : > { %v1460_v20 = vadd.f32 %v1459_v56, %v1363_v51  ;;  %v1461_v21 = vpop.f32.mrb[17].mxu1 }
 0x7d5   : > { %v1462_v55 = vpop.f32.mrb[18].mxu1 }
 0x7d6   : > { %v1463_v57 = vadd.f32 %v1462_v55, %v1366_v53  ;;  %v1464_v58 = vpop.f32.mrb[19].mxu1 }
 0x7f7   : > { %v1666_v22 = vpop.f32.mrb[20].mxu1 }
 0x7f8   : > { %v1675_v60 = vadd.f32 %v1666_v22, %v1460_v20  ;;  %v1668_v23 = vpop.f32.mrb[21].mxu1 }
 0x7f9   : > { %v1669_v24 = vpop.f32.mrb[22].mxu1 }
 0x7fa   : > { %v1678_v10 = vadd.f32 %v1669_v24, %v1463_v57  ;;  %v1693_v25 = vadd.f32 %v1684_v59, %v1675_v60  ;;  %v1671_v26 = vpop.f32.mrb[23].mxu1 }
 0x7fc   : > { %v1699_v27 = vmul.f32 %v1693_v25, %v3463_v62  ;;  %v1696_v28 = vadd.f32 %v1689_v8, %v1678_v10  ;;  %v1623_v29 = vpop.f32.mrb[12].mxu0 }
 0x7fd   : > { %v1691_v30 = vadd.f32 %v1684_v59, %v1623_v29  ;;  %v1625_v31 = vpop.f32.mrb[13].mxu0 }
 0x7fe   : > { %v1702_v32 = vmul.f32 %v1696_v28, %v3463_v62  ;;  %v1692_v33 = vadd.f32 %v1684_v59, %v1625_v31  ;;  %v1627_v34 = vpop.f32.mrb[14].mxu0  ;;  %v1705_v13 = vmax.f32 %v1699_v27, 0.0 }
 0x7ff   : > { %v1697_v35 = vmul.f32 %v1691_v30, %v3466_v4  ;;  %v1694_v36 = vadd.f32 %v1689_v8, %v1627_v34  ;;  %v1629_v37 = vpop.f32.mrb[15].mxu0 }
 0x800   : > { %v1708_v49 = vmax.f32 %v1702_v32, 0.0  ;;  %v1698_v38 = vmul.f32 %v1692_v33, %v3471_v9  ;;  %v1695_v15 = vadd.f32 %v1689_v8, %v1629_v37 }
 0x801   : > { %v1700_v39 = vmul.f32 %v1694_v36, %v3466_v4  ;;  %v1703_v42 = vmax.f32 %v1697_v35, 0.0 }
 0x802   : > { %v1701_v40 = vmul.f32 %v1695_v15, %v3471_v9  ;;  %v1711_v41 = vpack.c.bf16 %v1708_v49, %v1705_v13  ;;  %v1704_v44 = vmax.f32 %v1698_v38, 0.0 }
 0x803   : > { %v1706_v43 = vmax.f32 %v1700_v39, 0.0 }
 0x804   : > { %v1707_v47 = vmax.f32 %v1701_v40, 0.0 }
 0x805   : > { %v1709_v12 = vpack.c.bf16 %v1706_v43, %v1703_v42 }
 0x806   : > { %v1710_v61 = vpack.c.bf16 %v1707_v47, %v1704_v44 }
 0x807   : > { %1715 = vrot.lane.b32.xlu1 %v1709_v12, %s3306_s24 }
 0x808   : > { %1717 = vrot.lane.b32.xlu0 %v1710_v61, %s3306_s24 }
 0x80b   : > { %1719 = vrot.lane.b32.xlu1 %v1711_v41, %s3306_s24 }
 0x879   : > { %v1716_v1 = vpop.permute.xlu1 %1715 }
 0x87a   : > { %1726 = vst.msk [vmem:[#allocation2] sm:$0xff] %vm601_vm11, %v1716_v1  ;;  %v1718_v3 = vpop.permute.xlu0 %1717 }
 0x87b   : > { %v1721_v5 = vsel %vm287_vm9, %v1716_v1, %v1718_v3  ;;  %v3274_v1 = vld [vmem:[%s4329_s3 + $0x74] ss:$8 sps:$4 sm:$0xff]  }
 0x87c   : > { %1757 = vrot.lane.b32.xlu0 %v1721_v5, %s3301_s30 }
 0x87d   : > { %v1720_v6 = vpop.permute.xlu1 %1719 }
 0x87e   : > { %v1722_v7 = vsel %vm287_vm9, %v1718_v3, %v1720_v6  ;;  %v3313_v3 = vmov 5  }
 0x87f   : > { %1728 = vst.msk [vmem:[#allocation2 + $0x10] sm:$0xff] %vm604_vm12, %v1722_v7 }
 0x881   : > { %v1732_v16 = vld [vmem:[#allocation2] sm:$0xff] }
 0x882   : > { %1755 = vrot.lane.b32.xlu0 %v1732_v16, %s3301_s30 }
 0x886   : > { %v1734_v46 = vld [vmem:[#allocation2 + $0x10] sm:$0xff]  ;;  %1744 = vperm.xlu0 %3238, %v3816_v14  }
 0x887   : > { %1759 = vrot.lane.b32.xlu1 %v1734_v46, %s3301_s30 }
 0x88a   : > { %3239 = vset.pattern.permute.xlu0 %v3313_v3 }
 0x88b   : > { %1739 = vperm.xlu1 %3237, %v3804_v2  }
 0x88f   : > { %3240 = vset.pattern.permute.xlu1 %v3313_v3 }
 0x8ee   : > { %v1758_v48 = vpop.permute.xlu0 %1757 }
 0x8f4   : > { %v1756_v45 = vpop.permute.xlu0 %1755 }
 0x8f5   : > { %v1761_v50 = vsel %vm396_vm4, %v1756_v45, %v1758_v48 }
 0x8f9   : > { %v1760_v17 = vpop.permute.xlu1 %1759 }
 0x8fa   : > { %3178 = vmatpush3.bf16.msra.mxu1 %v1760_v17  ;;  %v1762_v52 = vsel %vm396_vm4, %v1758_v48, %v1760_v17 }
 0x8fb   : > { %1769 = vmatprep.subr.bf16.mxu0 %v1762_v52  ;;  %2085 = vmatprep.subr.bf16.mxu1 %v3297_v0 }
 0x8fc   : > { %1770 = vmatpush1.bf16.msra.mxu0 %v1761_v50 }
 0x8fd   : > { %3180 = vmatmul.mubr.msk.bf16.vlgmr.msra.gmra.mrb[24].mxu1 %vm471_vm0, %v3273_v18 }
 0x8fe   : > { %3141 = vmatprep.mubr.msk.bf16.mxu1 %vm471_vm0, %v3274_v1 }
 0x8ff   : > { %3127 = vmatmul.mubr.msk.bf16.vlgmr.msra.gmra.mrb[16].mxu0 %vm471_vm0, %v3273_v18 }
 0x900   : > { %3140 = vmatprep.mubr.msk.bf16.mxu0 %vm471_vm0, %v3274_v1 }
 0x905   : > { %v1745_v22 = vpop.permute.xlu0 %1744 }
 0x90a   : > { %v1740_v51 = vpop.permute.xlu1 %1739 }
 0x9d0   : > { %v1846_v19 = vpop.f32.mrb[24].mxu1 }
 0x9d1   : > { %v1847_v53 = vadd.f32 %v1846_v19, %v1740_v51  ;;  %v3181_v54 = vpop.f32.mrb[25].mxu1 }
 0x9d2   : > { %v1803_v56 = vpop.f32.mrb[16].mxu0  ;;  %v1849_v20 = vpop.f32.mrb[26].mxu1 }
 0x9d3   : > { %v1855_v21 = vmul.f32 %v1847_v53, %v3463_v62  ;;  %v1804_v55 = vadd.f32 %v1803_v56, %v1740_v51  ;;  %v1805_v57 = vpop.f32.mrb[17].mxu0  ;;  %v3182_v58 = vpop.f32.mrb[27].mxu1  ;;  %v1850_v28 = vadd.f32 %v1849_v20, %v1745_v22 }
 0x9d4   : > { %v1806_v59 = vadd.f32 %v1805_v57, %v1740_v51  ;;  %v1807_v60 = vpop.f32.mrb[18].mxu0 }
 0x9d5   : > { %v1853_v23 = vmul.f32 %v1804_v55, %v3466_v4  ;;  %v1808_v24 = vadd.f32 %v1807_v60, %v1745_v22  ;;  %v1809_v8 = vpop.f32.mrb[19].mxu0  ;;  %v3170_v10 = vpack.c.bf16 %v1855_v21, %v1855_v21  ;;  %v1858_v32 = vmul.f32 %v1850_v28, %v3463_v62 }
 0x9d6   : > { %v1854_v25 = vmul.f32 %v1806_v59, %v3471_v9  ;;  %v1810_v26 = vadd.f32 %v1809_v8, %v1745_v22 }
 0x9d7   : > { %v1856_v27 = vmul.f32 %v1808_v24, %v3466_v4  ;;  %1883 = vrot.lane.b32.xlu0 %v3170_v10, %s3306_s24  ;;  %v3172_v33 = vpack.c.bf16 %v1858_v32, %v1858_v32 }
 0x9d8   : > { %v3169_v29 = vpack.c.bf16 %v1854_v25, %v1853_v23  ;;  %v1857_v30 = vmul.f32 %v1810_v26, %v3471_v9 }
 0x9da   : > { %v3171_v31 = vpack.c.bf16 %v1857_v30, %v1856_v27  ;;  %1881 = vrot.lane.b32.xlu1 %v3169_v29, %s3306_s24 }
 0x9de   : > { %1885 = vrot.lane.b32.xlu1 %v3171_v31, %s3306_s24  ;;  %v3276_v31 = vld [vmem:[%s4329_s3 + $0x70] ss:$8 sps:$4 sm:$0xff]  }
 0x9e2   : > { %1887 = vrot.lane.b32.xlu1 %v3172_v33, %s3306_s24 }
 0xa49   : > { %v1884_v36 = vpop.permute.xlu0 %1883 }
 0xa4c   : > { %v1882_v34 = vpop.permute.xlu1 %1881 }
 0xa4d   : > { %v1889_v35 = vrot.slane %v1882_v34, 4 }
 0xa4f   : > { %v1891_v37 = vsel %vm287_vm9, %v1889_v35, %v1882_v34  ;;  %v1892_v13 = vsel %vm287_vm9, %v1889_v35, %v1884_v36 }
 0xa50   : > { %1902 = vst.msk [vmem:[%s3981_s20] sm:$0xff] %vm1901_vm10, %v1891_v37  ;;  %v1886_v49 = vpop.permute.xlu1 %1885 }
 0xa51   : > { %1904 = vst.msk [vmem:[%s3981_s20 + $0x8] sm:$0xf] %vm1903_vm14, %v1892_v13  ;;  %v1890_v38 = vrot.slane %v1886_v49, 4 }
 0xa53   : > { %v1893_v15 = vsel %vm287_vm9, %v1890_v38, %v1886_v49 }
 0xa54   : > { %1905 = vst.msk [vmem:[%s3981_s20 + $0xc] sm:$0xff] %vm1901_vm10, %v1893_v15  ;;  %v1888_v39 = vpop.permute.xlu1 %1887 }
 0xa55   : > { %v1894_v40 = vsel %vm287_vm9, %v1890_v38, %v1888_v39 }
 0xa56   : > { %1906 = vst.msk [vmem:[%s3981_s20 + $0x14] sm:$0xf] %vm1903_vm14, %v1894_v40 }
 0xa57   : > { %v1910_v41 = vld [vmem:[%s3981_s20] sm:$0xff] }
 0xa58   : > { %v1911_v47 = vld [vmem:[%s3981_s20 + $0x8] sm:$0xf] }
 0xa5b   : > { %v1912_v42 = vld [vmem:[%s3981_s20 + $0xc] sm:$0xff] }
 0xa5c   : > { %v3136_v43 = vcombine.high %v1910_v41, %v1912_v42  ;;  %v3135_v44 = vcombine.low %v1910_v41, %v1912_v42 }
 0xa5d   : > { %v1913_v12 = vld [vmem:[%s3981_s20 + $0x14] sm:$0xf] }
 0xa5e   : > { %v3137_v61 = vcombine.low %v1911_v47, %v1913_v12  ;;  %1932 = vrot.lane.b32.xlu0 %v3136_v43, %s3298_s27  ;;  %2042 = vmatprep.subr.bf16.mxu0 %v3136_v43 }
 0xa5f   : > { %2043 = vmatpush1.bf16.msra.mxu0 %v3135_v44 }
 0xa60   : > { %1934 = vrot.lane.b32.xlu1 %v3137_v61, %s3298_s27  ;;  %2086 = vmatpush1.bf16.msra.mxu1 %v3137_v61 }
 0xa61   : > { %2087 = vmatprep.subr.bf16.mxu1 %v3297_v0 }
 0xa62   : > { %1930 = vrot.lane.b32.xlu0 %v3135_v44, %s3298_s27 }
 0xa64   : > { %1943 = vrot.lane.b32.xlu1 %v3136_v43, %s3299_s28 }
 0xa66   : > { %1945 = vrot.lane.b32.xlu0 %v3137_v61, %s3299_s28 }
 0xa68   : > { %1941 = vrot.lane.b32.xlu1 %v3135_v44, %s3299_s28 }
 0xa6a   : > { %1954 = vrot.lane.b32.xlu0 %v3136_v43, %s3300_s29 }
 0xa6c   : > { %1956 = vrot.lane.b32.xlu1 %v3137_v61, %s3300_s29 }
 0xa6e   : > { %1952 = vrot.lane.b32.xlu0 %v3135_v44, %s3300_s29 }
 0xa70   : > { %1965 = vrot.lane.b32.xlu1 %v3136_v43, %s3301_s30 }
 0xa72   : > { %1967 = vrot.lane.b32.xlu0 %v3137_v61, %s3301_s30 }
 0xa74   : > { %1963 = vrot.lane.b32.xlu1 %v3135_v44, %s3301_s30 }
 0xa76   : > { %1976 = vrot.lane.b32.xlu0 %v3136_v43, %s3302_s7 }
 0xa78   : > { %1978 = vrot.lane.b32.xlu1 %v3137_v61, %s3302_s7 }
 0xa7a   : > { %1974 = vrot.lane.b32.xlu0 %v3135_v44, %s3302_s7 }
 0xa7c   : > { %1987 = vrot.lane.b32.xlu1 %v3136_v43, %s3303_s8 }
 0xa7e   : > { %1989 = vrot.lane.b32.xlu0 %v3137_v61, %s3303_s8 }
 0xa80   : > { %1985 = vrot.lane.b32.xlu1 %v3135_v44, %s3303_s8 }
 0xa82   : > { %1998 = vrot.lane.b32.xlu0 %v3136_v43, %s3304_s11 }
 0xa84   : > { %2000 = vrot.lane.b32.xlu1 %v3137_v61, %s3304_s11 }
 0xa86   : > { %1996 = vrot.lane.b32.xlu0 %v3135_v44, %s3304_s11 }
 0xa88   : > { %2009 = vrot.lane.b32.xlu1 %v3136_v43, %s3305_s12 }
 0xa8a   : > { %2011 = vrot.lane.b32.xlu0 %v3137_v61, %s3305_s12 }
 0xa8c   : > { %2007 = vrot.lane.b32.xlu1 %v3135_v44, %s3305_s12 }
 0xa8e   : > { %2022 = vperm.xlu0 %3239, %v3804_v2  }
 0xa90   : > { %2027 = vperm.xlu1 %3240, %v3816_v14  }
 0xad0   : > { %v1933_v5 = vpop.permute.xlu0 %1932 }
 0xad2   : > { %v1935_v6 = vpop.permute.xlu1 %1934 }
 0xad3   : > { %2088 = vmatpush1.bf16.msra.mxu1 %v1935_v6  ;;  %v1937_v7 = vsel %vm360_vm1, %v1933_v5, %v1935_v6 }
 0xad4   : > { %v1931_v11 = vpop.permute.xlu0 %1930  ;;  %2044 = vmatprep.subr.bf16.mxu0 %v1937_v7  ;;  %2089 = vmatprep.subr.bf16.mxu1 %v3297_v0 }
 0xad5   : > { %v1936_v16 = vsel %vm360_vm1, %v1931_v11, %v1933_v5 }
 0xad6   : > { %2045 = vmatpush1.bf16.msra.mxu0 %v1936_v16  ;;  %v1944_v46 = vpop.permute.xlu1 %1943 }
 0xad8   : > { %v1946_v48 = vpop.permute.xlu0 %1945 }
 0xad9   : > { %2090 = vmatpush1.bf16.msra.mxu1 %v1946_v48  ;;  %v1948_v45 = vsel %vm372_vm2, %v1944_v46, %v1946_v48 }
 0xada   : > { %2046 = vmatprep.subr.bf16.mxu0 %v1948_v45  ;;  %v1942_v2 = vpop.permute.xlu1 %1941  ;;  %2091 = vmatprep.subr.bf16.mxu1 %v3297_v0 }
 0xadb   : > { %v1947_v14 = vsel %vm372_vm2, %v1942_v2, %v1944_v46 }
 0xadc   : > { %v1955_v17 = vpop.permute.xlu0 %1954  ;;  %2047 = vmatpush1.bf16.msra.mxu0 %v1947_v14 }
 0xade   : > { %v1957_v18 = vpop.permute.xlu1 %1956 }
 0xadf   : > { %2092 = vmatpush1.bf16.msra.mxu1 %v1957_v18  ;;  %v1959_v52 = vsel %vm384_vm3, %v1955_v17, %v1957_v18 }
 0xae0   : > { %v1953_v50 = vpop.permute.xlu0 %1952  ;;  %2048 = vmatprep.subr.bf16.mxu0 %v1959_v52  ;;  %2093 = vmatprep.subr.bf16.mxu1 %v3297_v0 }
 0xae1   : > { %v1958_v51 = vsel %vm384_vm3, %v1953_v50, %v1955_v17 }
 0xae2   : > { %2049 = vmatpush1.bf16.msra.mxu0 %v1958_v51  ;;  %v1966_v19 = vpop.permute.xlu1 %1965 }
 0xae4   : > { %v1968_v53 = vpop.permute.xlu0 %1967 }
 0xae5   : > { %2094 = vmatpush1.bf16.msra.mxu1 %v1968_v53  ;;  %v1970_v54 = vsel %vm396_vm4, %v1966_v19, %v1968_v53 }
 0xae6   : > { %2050 = vmatprep.subr.bf16.mxu0 %v1970_v54  ;;  %v1964_v56 = vpop.permute.xlu1 %1963  ;;  %2095 = vmatprep.subr.bf16.mxu1 %v3297_v0 }
 0xae7   : > { %v1969_v20 = vsel %vm396_vm4, %v1964_v56, %v1966_v19 }
 0xae8   : > { %v1977_v21 = vpop.permute.xlu0 %1976  ;;  %2051 = vmatpush1.bf16.msra.mxu0 %v1969_v20 }
 0xaea   : > { %v1979_v55 = vpop.permute.xlu1 %1978 }
 0xaeb   : > { %2096 = vmatpush1.bf16.msra.mxu1 %v1979_v55  ;;  %v1981_v57 = vsel %vm408_vm5, %v1977_v21, %v1979_v55  ;;  %v3314_v55 = vmov 6  }
 0xaec   : > { %v1975_v58 = vpop.permute.xlu0 %1974  ;;  %2052 = vmatprep.subr.bf16.mxu0 %v1981_v57  ;;  %2097 = vmatprep.subr.bf16.mxu1 %v3297_v0  ;;  %v3287_v57 = vld [vmem:[%s4330_s4] sm:$0xff] }
 0xaed   : > { %v1980_v22 = vsel %vm408_vm5, %v1975_v58, %v1977_v21  ;;  %v3277_v21 = vld [vmem:[%s4329_s3 + $0x84] ss:$8 sps:$4 sm:$0xff]   ;;  %3241 = vset.pattern.permute.xlu0 %v3314_v55  ;;  %3242 = vset.pattern.permute.xlu1 %v3314_v55 }
 0xaee   : > { %2053 = vmatpush1.bf16.msra.mxu0 %v1980_v22  ;;  %v1988_v59 = vpop.permute.xlu1 %1987  ;;  %v3288_v58 = vld [vmem:[%s4330_s4 + $0x8] sm:$0xff] }
 0xaf0   : > { %v1990_v60 = vpop.permute.xlu0 %1989 }
 0xaf1   : > { %2098 = vmatpush1.bf16.msra.mxu1 %v1990_v60  ;;  %v1992_v23 = vsel %vm420_vm6, %v1988_v59, %v1990_v60 }
 0xaf2   : > { %2054 = vmatprep.subr.bf16.mxu0 %v1992_v23  ;;  %v1986_v24 = vpop.permute.xlu1 %1985  ;;  %2099 = vmatprep.subr.bf16.mxu1 %v3297_v0 }
 0xaf3   : > { %v1991_v8 = vsel %vm420_vm6, %v1986_v24, %v1988_v59 }
 0xaf4   : > { %v1999_v10 = vpop.permute.xlu0 %1998  ;;  %2055 = vmatpush1.bf16.msra.mxu0 %v1991_v8 }
 0xaf6   : > { %v2001_v25 = vpop.permute.xlu1 %2000 }
 0xaf7   : > { %2100 = vmatpush1.bf16.msra.mxu1 %v2001_v25  ;;  %v2003_v26 = vsel %vm432_vm7, %v1999_v10, %v2001_v25 }
 0xaf8   : > { %v1997_v27 = vpop.permute.xlu0 %1996  ;;  %2056 = vmatprep.subr.bf16.mxu0 %v2003_v26  ;;  %2101 = vmatprep.subr.bf16.mxu1 %v3297_v0 }
 0xaf9   : > { %v2002_v28 = vsel %vm432_vm7, %v1997_v27, %v1999_v10 }
 0xafa   : > { %2057 = vmatpush1.bf16.msra.mxu0 %v2002_v28  ;;  %v2010_v29 = vpop.permute.xlu1 %2009 }
 0xafc   : > { %v2012_v30 = vpop.permute.xlu0 %2011 }
 0xafd   : > { %2102 = vmatpush1.bf16.msra.mxu1 %v2012_v30  ;;  %v2014_v32 = vsel %vm444_vm8, %v2010_v29, %v2012_v30 }
 0xafe   : > { %2058 = vmatprep.subr.bf16.mxu0 %v2014_v32  ;;  %v2008_v33 = vpop.permute.xlu1 %2007  ;;  %2322 = vmatprep.subr.bf16.mxu1 %v3297_v0 }
 0xaff   : > { %v2013_v34 = vsel %vm444_vm8, %v2008_v33, %v2010_v29 }
 0xb00   : > { %2059 = vmatpush1.bf16.msra.mxu0 %v2013_v34  ;;  %2118 = vmatmul.mubr.bf16.vlgmr.msra.gmra.mrb[28].mxu1 %v3276_v31 }
 0xb01   : > { %3147 = vmatprep.mubr.msk.bf16.mxu1 %vm471_vm0, %v3277_v21 }
 0xb03   : > { %2075 = vmatmul.mubr.bf16.vlgmr.msra.gmra.mrb[20].mxu0 %v3276_v31 }
 0xb04   : > { %3146 = vmatprep.mubr.msk.bf16.mxu0 %vm471_vm0, %v3277_v21 }
 0xb0d   : > { %v2023_v35 = vpop.permute.xlu0 %2022 }
 0xb0f   : > { %v2028_v37 = vpop.permute.xlu1 %2027 }
 0xbd3   : > { %v2119_v36 = vpop.f32.mrb[28].mxu1 }
 0xbd4   : > { %v2120_v13 = vadd.f32 %v2119_v36, %v2023_v35  ;;  %v2121_v49 = vpop.f32.mrb[29].mxu1 }
 0xbd5   : > { %v2122_v38 = vpop.f32.mrb[30].mxu1 }
 0xbd6   : > { %v2128_v15 = vmul.f32 %v2120_v13, %v3463_v62  ;;  %v2123_v39 = vadd.f32 %v2122_v38, %v2028_v37  ;;  %v2076_v40 = vpop.f32.mrb[20].mxu0  ;;  %v2124_v41 = vpop.f32.mrb[31].mxu1 }
 0xbd7   : > { %v2077_v42 = vadd.f32 %v2076_v40, %v2023_v35  ;;  %v2078_v43 = vpop.f32.mrb[21].mxu0 }
 0xbd8   : > { %v2131_v44 = vmul.f32 %v2123_v39, %v3463_v62  ;;  %v2079_v47 = vadd.f32 %v2078_v43, %v2023_v35  ;;  %v2080_v12 = vpop.f32.mrb[22].mxu0  ;;  %v2134_v5 = vmax.f32 %v2128_v15, 0.0 }
 0xbd9   : > { %v2126_v61 = vmul.f32 %v2077_v42, %v3466_v4  ;;  %v2081_v1 = vadd.f32 %v2080_v12, %v2028_v37  ;;  %v2082_v3 = vpop.f32.mrb[23].mxu0 }
 0xbda   : > { %v2137_v6 = vmax.f32 %v2131_v44, 0.0  ;;  %v2127_v7 = vmul.f32 %v2079_v47, %v3471_v9  ;;  %v2083_v11 = vadd.f32 %v2082_v3, %v2028_v37 }
 0xbdb   : > { %v2129_v16 = vmul.f32 %v2081_v1, %v3466_v4  ;;  %v2132_v45 = vmax.f32 %v2126_v61, 0.0 }
 0xbdc   : > { %v2140_v46 = vpack.c.bf16 %v2137_v6, %v2134_v5  ;;  %v2130_v48 = vmul.f32 %v2083_v11, %v3471_v9  ;;  %v2133_v14 = vmax.f32 %v2127_v7, 0.0  ;;  %v3279_v11 = vld [vmem:[%s4329_s3 + $0x80] ss:$8 sps:$4 sm:$0xff]  }
 0xbdd   : > { %v2135_v2 = vmax.f32 %v2129_v16, 0.0 }
 0xbde   : > { %v2136_v17 = vmax.f32 %v2130_v48, 0.0 }
 0xbdf   : > { %v2138_v18 = vpack.c.bf16 %v2135_v2, %v2132_v45 }
 0xbe0   : > { %v2139_v52 = vpack.c.bf16 %v2136_v17, %v2133_v14 }
 0xbe1   : > { %2144 = vrot.lane.b32.xlu1 %v2138_v18, %s3306_s24 }
 0xbe2   : > { %2146 = vrot.lane.b32.xlu0 %v2139_v52, %s3306_s24 }
 0xbe5   : > { %2148 = vrot.lane.b32.xlu1 %v2140_v46, %s3306_s24 }
 0xc53   : > { %v2145_v50 = vpop.permute.xlu1 %2144 }
 0xc54   : > { %2155 = vst.msk [vmem:[#allocation2] sm:$0xff] %vm601_vm11, %v2145_v50  ;;  %v2147_v51 = vpop.permute.xlu0 %2146 }
 0xc55   : > { %v2150_v19 = vsel %vm287_vm9, %v2145_v50, %v2147_v51 }
 0xc56   : > { %2279 = vmatprep.subr.bf16.mxu0 %v2150_v19 }
 0xc57   : > { %v2149_v53 = vpop.permute.xlu1 %2148 }
 0xc58   : > { %v2151_v54 = vsel %vm287_vm9, %v2147_v51, %v2149_v53 }
 0xc59   : > { %2157 = vst.msk [vmem:[#allocation2 + $0x10] sm:$0xff] %vm604_vm12, %v2151_v54 }
 0xc5b   : > { %v2161_v56 = vld [vmem:[#allocation2] sm:$0xff] }
 0xc5c   : > { %2167 = vrot.lane.b32.xlu0 %v2161_v56, %s3298_s27  ;;  %2178 = vrot.lane.b32.xlu1 %v2161_v56, %s3299_s28 }
 0xc5d   : > { %2280 = vmatpush1.bf16.msra.mxu0 %v2161_v56 }
 0xc60   : > { %2189 = vrot.lane.b32.xlu0 %v2161_v56, %s3300_s29  ;;  %2200 = vrot.lane.b32.xlu1 %v2161_v56, %s3301_s30  ;;  %v2163_v20 = vld [vmem:[#allocation2 + $0x10] sm:$0xff] }
 0xc61   : > { %2323 = vmatpush1.bf16.msra.mxu1 %v2163_v20 }
 0xc62   : > { %2324 = vmatprep.subr.bf16.mxu1 %v3297_v0 }
 0xc64   : > { %2211 = vrot.lane.b32.xlu0 %v2161_v56, %s3302_s7  ;;  %2222 = vrot.lane.b32.xlu1 %v2161_v56, %s3303_s8 }
 0xc68   : > { %2233 = vrot.lane.b32.xlu0 %v2161_v56, %s3304_s11  ;;  %2171 = vrot.lane.b32.xlu1 %v2163_v20, %s3298_s27 }
 0xc6c   : > { %2169 = vrot.lane.b32.xlu0 %v2150_v19, %s3298_s27  ;;  %2180 = vrot.lane.b32.xlu1 %v2150_v19, %s3299_s28 }
 0xc70   : > { %2182 = vrot.lane.b32.xlu0 %v2163_v20, %s3299_s28  ;;  %2193 = vrot.lane.b32.xlu1 %v2163_v20, %s3300_s29 }
 0xc74   : > { %2191 = vrot.lane.b32.xlu0 %v2150_v19, %s3300_s29  ;;  %2202 = vrot.lane.b32.xlu1 %v2150_v19, %s3301_s30 }
 0xc78   : > { %2204 = vrot.lane.b32.xlu0 %v2163_v20, %s3301_s30  ;;  %2215 = vrot.lane.b32.xlu1 %v2163_v20, %s3302_s7 }
 0xc7c   : > { %2213 = vrot.lane.b32.xlu0 %v2150_v19, %s3302_s7  ;;  %2224 = vrot.lane.b32.xlu1 %v2150_v19, %s3303_s8 }
 0xc80   : > { %2226 = vrot.lane.b32.xlu0 %v2163_v20, %s3303_s8  ;;  %2237 = vrot.lane.b32.xlu1 %v2163_v20, %s3304_s11 }
 0xc84   : > { %2235 = vrot.lane.b32.xlu0 %v2150_v19, %s3304_s11  ;;  %2246 = vrot.lane.b32.xlu1 %v2150_v19, %s3305_s12 }
 0xc88   : > { %2248 = vrot.lane.b32.xlu0 %v2163_v20, %s3305_s12  ;;  %2244 = vrot.lane.b32.xlu1 %v2161_v56, %s3305_s12 }
 0xc8c   : > { %2259 = vperm.xlu0 %3241, %v3287_v57   ;;  %2264 = vperm.xlu1 %3242, %v3288_v58  }
 0xcce   : > { %v2168_v22 = vpop.permute.xlu0 %2167  ;;  %v2179_v59 = vpop.permute.xlu1 %2178 }
 0xcd2   : > { %v2190_v60 = vpop.permute.xlu0 %2189  ;;  %v2201_v23 = vpop.permute.xlu1 %2200 }
 0xcd6   : > { %v2212_v24 = vpop.permute.xlu0 %2211  ;;  %v2223_v8 = vpop.permute.xlu1 %2222 }
 0xcda   : > { %v2234_v10 = vpop.permute.xlu0 %2233  ;;  %v2172_v25 = vpop.permute.xlu1 %2171 }
 0xcdb   : > { %2325 = vmatpush1.bf16.msra.mxu1 %v2172_v25 }
 0xcdc   : > { %2326 = vmatprep.subr.bf16.mxu1 %v3297_v0 }
 0xcde   : > { %v2170_v26 = vpop.permute.xlu0 %2169  ;;  %v2181_v27 = vpop.permute.xlu1 %2180 }
 0xcdf   : > { %v2173_v28 = vsel %vm360_vm1, %v2168_v22, %v2170_v26  ;;  %v2174_v29 = vsel %vm360_vm1, %v2170_v26, %v2172_v25  ;;  %v2184_v33 = vsel %vm372_vm2, %v2179_v59, %v2181_v27 }
 0xce0   : > { %2281 = vmatprep.subr.bf16.mxu0 %v2174_v29 }
 0xce1   : > { %2282 = vmatpush1.bf16.msra.mxu0 %v2173_v28 }
 0xce2   : > { %v2183_v30 = vpop.permute.xlu0 %2182  ;;  %v2194_v31 = vpop.permute.xlu1 %2193 }
 0xce3   : > { %2327 = vmatpush1.bf16.msra.mxu1 %v2183_v30  ;;  %v2185_v32 = vsel %vm372_vm2, %v2181_v27, %v2183_v30 }
 0xce4   : > { %2283 = vmatprep.subr.bf16.mxu0 %v2185_v32  ;;  %2328 = vmatprep.subr.bf16.mxu1 %v3297_v0 }
 0xce5   : > { %2284 = vmatpush1.bf16.msra.mxu0 %v2184_v33 }
 0xce6   : > { %v2192_v34 = vpop.permute.xlu0 %2191  ;;  %v2203_v35 = vpop.permute.xlu1 %2202 }
 0xce7   : > { %v2195_v36 = vsel %vm384_vm3, %v2190_v60, %v2192_v34  ;;  %2329 = vmatpush1.bf16.msra.mxu1 %v2194_v31  ;;  %v2196_v37 = vsel %vm384_vm3, %v2192_v34, %v2194_v31  ;;  %v2206_v15 = vsel %vm396_vm4, %v2201_v23, %v2203_v35 }
 0xce8   : > { %2285 = vmatprep.subr.bf16.mxu0 %v2196_v37  ;;  %2330 = vmatprep.subr.bf16.mxu1 %v3297_v0 }
 0xce9   : > { %2286 = vmatpush1.bf16.msra.mxu0 %v2195_v36 }
 0xcea   : > { %v2205_v13 = vpop.permute.xlu0 %2204  ;;  %v2216_v49 = vpop.permute.xlu1 %2215 }
 0xceb   : > { %2331 = vmatpush1.bf16.msra.mxu1 %v2205_v13  ;;  %v2207_v38 = vsel %vm396_vm4, %v2203_v35, %v2205_v13  ;;  %v3280_v13 = vld [vmem:[%s4329_s3 + $0x94] ss:$8 sps:$4 sm:$0xff]  }
 0xcec   : > { %2287 = vmatprep.subr.bf16.mxu0 %v2207_v38  ;;  %2332 = vmatprep.subr.bf16.mxu1 %v3297_v0  ;;  %v4194_v38 = vld [vmem:[%s4330_s4] sm:$0xff] }
 0xced   : > { %2288 = vmatpush1.bf16.msra.mxu0 %v2206_v15  ;;  %v4199_v15 = vld [vmem:[%s4330_s4 + $0x8] sm:$0xff] }
 0xcee   : > { %v2214_v39 = vpop.permute.xlu0 %2213  ;;  %v2225_v40 = vpop.permute.xlu1 %2224 }
 0xcef   : > { %v2217_v41 = vsel %vm408_vm5, %v2212_v24, %v2214_v39  ;;  %2333 = vmatpush1.bf16.msra.mxu1 %v2216_v49  ;;  %v2218_v42 = vsel %vm408_vm5, %v2214_v39, %v2216_v49  ;;  %v2228_v12 = vsel %vm420_vm6, %v2223_v8, %v2225_v40  ;;  %v3315_v49 = vmov 7  }
 0xcf0   : > { %2289 = vmatprep.subr.bf16.mxu0 %v2218_v42  ;;  %2334 = vmatprep.subr.bf16.mxu1 %v3297_v0 }
 0xcf1   : > { %2290 = vmatpush1.bf16.msra.mxu0 %v2217_v41  ;;  %3243 = vset.pattern.permute.xlu0 %v3315_v49 }
 0xcf2   : > { %v2227_v43 = vpop.permute.xlu0 %2226  ;;  %v2238_v44 = vpop.permute.xlu1 %2237  ;;  %3244 = vset.pattern.permute.xlu1 %v3315_v49 }
 0xcf3   : > { %2335 = vmatpush1.bf16.msra.mxu1 %v2227_v43  ;;  %v2229_v47 = vsel %vm420_vm6, %v2225_v40, %v2227_v43 }
 0xcf4   : > { %2291 = vmatprep.subr.bf16.mxu0 %v2229_v47  ;;  %2336 = vmatprep.subr.bf16.mxu1 %v3297_v0 }
 0xcf5   : > { %2292 = vmatpush1.bf16.msra.mxu0 %v2228_v12 }
 0xcf6   : > { %v2236_v61 = vpop.permute.xlu0 %2235  ;;  %v2247_v1 = vpop.permute.xlu1 %2246 }
 0xcf7   : > { %v2239_v3 = vsel %vm432_vm7, %v2234_v10, %v2236_v61  ;;  %2337 = vmatpush1.bf16.msra.mxu1 %v2238_v44  ;;  %v2240_v5 = vsel %vm432_vm7, %v2236_v61, %v2238_v44 }
 0xcf8   : > { %2293 = vmatprep.subr.bf16.mxu0 %v2240_v5  ;;  %2338 = vmatprep.subr.bf16.mxu1 %v3297_v0 }
 0xcf9   : > { %2294 = vmatpush1.bf16.msra.mxu0 %v2239_v3 }
 0xcfa   : > { %v2249_v6 = vpop.permute.xlu0 %2248  ;;  %v2245_v7 = vpop.permute.xlu1 %2244 }
 0xcfb   : > { %v2250_v16 = vsel %vm444_vm8, %v2245_v7, %v2247_v1  ;;  %2339 = vmatpush1.bf16.msra.mxu1 %v2249_v6  ;;  %v2251_v46 = vsel %vm444_vm8, %v2247_v1, %v2249_v6 }
 0xcfc   : > { %2295 = vmatprep.subr.bf16.mxu0 %v2251_v46  ;;  %2559 = vmatprep.subr.bf16.mxu1 %v3297_v0 }
 0xcfd   : > { %2296 = vmatpush1.bf16.msra.mxu0 %v2250_v16 }
 0xcfe   : > { %2355 = vmatmul.mubr.bf16.vlgmr.msra.gmra.mrb[32].mxu1 %v3279_v11 }
 0xcff   : > { %3153 = vmatprep.mubr.msk.bf16.mxu1 %vm471_vm0, %v3280_v13 }
 0xd00   : > { %2312 = vmatmul.mubr.bf16.vlgmr.msra.gmra.mrb[24].mxu0 %v3279_v11 }
 0xd01   : > { %3152 = vmatprep.mubr.msk.bf16.mxu0 %vm471_vm0, %v3280_v13 }
 0xd0b   : > { %v2260_v48 = vpop.permute.xlu0 %2259  ;;  %v2265_v2 = vpop.permute.xlu1 %2264 }
 0xdd1   : > { %v2356_v45 = vpop.f32.mrb[32].mxu1 }
 0xdd2   : > { %v2357_v14 = vadd.f32 %v2356_v45, %v2260_v48  ;;  %v2358_v17 = vpop.f32.mrb[33].mxu1 }
 0xdd3   : > { %v2313_v18 = vpop.f32.mrb[24].mxu0  ;;  %v2359_v52 = vpop.f32.mrb[34].mxu1 }
 0xdd4   : > { %v2365_v50 = vmul.f32 %v2357_v14, %v3463_v62  ;;  %v2314_v51 = vadd.f32 %v2313_v18, %v2260_v48  ;;  %v2360_v19 = vadd.f32 %v2359_v52, %v2265_v2  ;;  %v2315_v53 = vpop.f32.mrb[25].mxu0  ;;  %v2361_v54 = vpop.f32.mrb[35].mxu1 }
 0xdd5   : > { %v2316_v56 = vadd.f32 %v2315_v53, %v2260_v48  ;;  %v2317_v20 = vpop.f32.mrb[26].mxu0 }
 0xdd6   : > { %v2363_v21 = vmul.f32 %v2314_v51, %v3466_v4  ;;  %v2368_v55 = vmul.f32 %v2360_v19, %v3463_v62  ;;  %v2318_v57 = vadd.f32 %v2317_v20, %v2265_v2  ;;  %v2319_v58 = vpop.f32.mrb[27].mxu0  ;;  %v2371_v60 = vmax.f32 %v2365_v50, 0.0 }
 0xdd7   : > { %v2364_v22 = vmul.f32 %v2316_v56, %v3471_v9  ;;  %v2320_v59 = vadd.f32 %v2319_v58, %v2265_v2 }
 0xdd8   : > { %v2374_v23 = vmax.f32 %v2368_v55, 0.0  ;;  %v2366_v24 = vmul.f32 %v2318_v57, %v3466_v4  ;;  %v2369_v10 = vmax.f32 %v2363_v21, 0.0 }
 0xdd9   : > { %v2367_v8 = vmul.f32 %v2320_v59, %v3471_v9  ;;  %v2370_v27 = vmax.f32 %v2364_v22, 0.0 }
 0xdda   : > { %v2372_v25 = vmax.f32 %v2366_v24, 0.0  ;;  %v2377_v26 = vpack.c.bf16 %v2374_v23, %v2371_v60  ;;  %v3282_v23 = vld [vmem:[%s4329_s3 + $0x90] ss:$8 sps:$4 sm:$0xff]  }
 0xddb   : > { %v2373_v28 = vmax.f32 %v2367_v8, 0.0 }
 0xddc   : > { %v2375_v29 = vpack.c.bf16 %v2372_v25, %v2369_v10 }
 0xddd   : > { %v2376_v30 = vpack.c.bf16 %v2373_v28, %v2370_v27 }
 0xdde   : > { %2381 = vrot.lane.b32.xlu1 %v2375_v29, %s3306_s24 }
 0xddf   : > { %2383 = vrot.lane.b32.xlu0 %v2376_v30, %s3306_s24 }
 0xde2   : > { %2385 = vrot.lane.b32.xlu1 %v2377_v26, %s3306_s24 }
 0xe50   : > { %v2382_v31 = vpop.permute.xlu1 %2381 }
 0xe51   : > { %2392 = vst.msk [vmem:[#allocation2] sm:$0xff] %vm601_vm11, %v2382_v31  ;;  %v2384_v32 = vpop.permute.xlu0 %2383 }
 0xe52   : > { %v2387_v33 = vsel %vm287_vm9, %v2382_v31, %v2384_v32 }
 0xe53   : > { %2516 = vmatprep.subr.bf16.mxu0 %v2387_v33 }
 0xe54   : > { %v2386_v34 = vpop.permute.xlu1 %2385 }
 0xe55   : > { %v2388_v35 = vsel %vm287_vm9, %v2384_v32, %v2386_v34 }
 0xe56   : > { %2394 = vst.msk [vmem:[#allocation2 + $0x10] sm:$0xff] %vm604_vm12, %v2388_v35 }
 0xe58   : > { %v2398_v36 = vld [vmem:[#allocation2] sm:$0xff] }
 0xe59   : > { %2415 = vrot.lane.b32.xlu1 %v2398_v36, %s3299_s28  ;;  %2404 = vrot.lane.b32.xlu0 %v2398_v36, %s3298_s27 }
 0xe5a   : > { %2517 = vmatpush1.bf16.msra.mxu0 %v2398_v36 }
 0xe5d   : > { %2437 = vrot.lane.b32.xlu1 %v2398_v36, %s3301_s30  ;;  %2426 = vrot.lane.b32.xlu0 %v2398_v36, %s3300_s29  ;;  %v2400_v37 = vld [vmem:[#allocation2 + $0x10] sm:$0xff] }
 0xe5e   : > { %2560 = vmatpush1.bf16.msra.mxu1 %v2400_v37 }
 0xe5f   : > { %2561 = vmatprep.subr.bf16.mxu1 %v3297_v0 }
 0xe61   : > { %2459 = vrot.lane.b32.xlu1 %v2398_v36, %s3303_s8  ;;  %2448 = vrot.lane.b32.xlu0 %v2398_v36, %s3302_s7 }
 0xe65   : > { %2470 = vrot.lane.b32.xlu0 %v2398_v36, %s3304_s11  ;;  %2408 = vrot.lane.b32.xlu1 %v2400_v37, %s3298_s27 }
 0xe69   : > { %2406 = vrot.lane.b32.xlu0 %v2387_v33, %s3298_s27  ;;  %2417 = vrot.lane.b32.xlu1 %v2387_v33, %s3299_s28 }
 0xe6d   : > { %2419 = vrot.lane.b32.xlu0 %v2400_v37, %s3299_s28  ;;  %2430 = vrot.lane.b32.xlu1 %v2400_v37, %s3300_s29 }
 0xe71   : > { %2428 = vrot.lane.b32.xlu0 %v2387_v33, %s3300_s29  ;;  %2439 = vrot.lane.b32.xlu1 %v2387_v33, %s3301_s30 }
 0xe75   : > { %2441 = vrot.lane.b32.xlu0 %v2400_v37, %s3301_s30  ;;  %2452 = vrot.lane.b32.xlu1 %v2400_v37, %s3302_s7 }
 0xe79   : > { %2450 = vrot.lane.b32.xlu0 %v2387_v33, %s3302_s7  ;;  %2461 = vrot.lane.b32.xlu1 %v2387_v33, %s3303_s8 }
 0xe7d   : > { %2463 = vrot.lane.b32.xlu0 %v2400_v37, %s3303_s8  ;;  %2474 = vrot.lane.b32.xlu1 %v2400_v37, %s3304_s11 }
 0xe81   : > { %2472 = vrot.lane.b32.xlu0 %v2387_v33, %s3304_s11  ;;  %2483 = vrot.lane.b32.xlu1 %v2387_v33, %s3305_s12 }
 0xe85   : > { %2485 = vrot.lane.b32.xlu0 %v2400_v37, %s3305_s12  ;;  %2481 = vrot.lane.b32.xlu1 %v2398_v36, %s3305_s12 }
 0xe89   : > { %2496 = vperm.xlu0 %3243, %v4194_v38   ;;  %2501 = vperm.xlu1 %3244, %v4199_v15  }
 0xecb   : > { %v2405_v39 = vpop.permute.xlu0 %2404  ;;  %v2416_v40 = vpop.permute.xlu1 %2415 }
 0xecf   : > { %v2427_v41 = vpop.permute.xlu0 %2426  ;;  %v2438_v42 = vpop.permute.xlu1 %2437 }
 0xed3   : > { %v2449_v43 = vpop.permute.xlu0 %2448  ;;  %v2460_v44 = vpop.permute.xlu1 %2459 }
 0xed7   : > { %v2471_v47 = vpop.permute.xlu0 %2470  ;;  %v2409_v12 = vpop.permute.xlu1 %2408 }
 0xed8   : > { %2562 = vmatpush1.bf16.msra.mxu1 %v2409_v12 }
 0xed9   : > { %2563 = vmatprep.subr.bf16.mxu1 %v3297_v0 }
 0xedb   : > { %v2407_v61 = vpop.permute.xlu0 %2406  ;;  %v2418_v1 = vpop.permute.xlu1 %2417 }
 0xedc   : > { %v2410_v3 = vsel %vm360_vm1, %v2405_v39, %v2407_v61  ;;  %v2411_v5 = vsel %vm360_vm1, %v2407_v61, %v2409_v12  ;;  %v2421_v16 = vsel %vm372_vm2, %v2416_v40, %v2418_v1 }
 0xedd   : > { %2518 = vmatprep.subr.bf16.mxu0 %v2411_v5 }
 0xede   : > { %2519 = vmatpush1.bf16.msra.mxu0 %v2410_v3 }
 0xedf   : > { %v2420_v6 = vpop.permute.xlu0 %2419  ;;  %v2431_v7 = vpop.permute.xlu1 %2430 }
 0xee0   : > { %2564 = vmatpush1.bf16.msra.mxu1 %v2420_v6  ;;  %v2422_v11 = vsel %vm372_vm2, %v2418_v1, %v2420_v6 }
 0xee1   : > { %2520 = vmatprep.subr.bf16.mxu0 %v2422_v11  ;;  %2565 = vmatprep.subr.bf16.mxu1 %v3297_v0 }
 0xee2   : > { %2521 = vmatpush1.bf16.msra.mxu0 %v2421_v16 }
 0xee3   : > { %v2429_v46 = vpop.permute.xlu0 %2428  ;;  %v2440_v48 = vpop.permute.xlu1 %2439 }
 0xee4   : > { %v2432_v45 = vsel %vm384_vm3, %v2427_v41, %v2429_v46  ;;  %2566 = vmatpush1.bf16.msra.mxu1 %v2431_v7  ;;  %v2433_v2 = vsel %vm384_vm3, %v2429_v46, %v2431_v7  ;;  %v2443_v52 = vsel %vm396_vm4, %v2438_v42, %v2440_v48 }
 0xee5   : > { %2522 = vmatprep.subr.bf16.mxu0 %v2433_v2  ;;  %2567 = vmatprep.subr.bf16.mxu1 %v3297_v0 }
 0xee6   : > { %2523 = vmatpush1.bf16.msra.mxu0 %v2432_v45 }
 0xee7   : > { %v2442_v14 = vpop.permute.xlu0 %2441  ;;  %v2453_v17 = vpop.permute.xlu1 %2452 }
 0xee8   : > { %2568 = vmatpush1.bf16.msra.mxu1 %v2442_v14  ;;  %v2444_v18 = vsel %vm396_vm4, %v2440_v48, %v2442_v14 }
 0xee9   : > { %2524 = vmatprep.subr.bf16.mxu0 %v2444_v18  ;;  %2569 = vmatprep.subr.bf16.mxu1 %v3297_v0  ;;  %v3283_v18 = vld [vmem:[%s4329_s3 + $0xa4] ss:$8 sps:$4 sm:$0xff]  }
 0xeea   : > { %2525 = vmatpush1.bf16.msra.mxu0 %v2443_v52  ;;  %v3316_v52 = vmov 8  }
 0xeeb   : > { %v2451_v50 = vpop.permute.xlu0 %2450  ;;  %v2462_v51 = vpop.permute.xlu1 %2461  ;;  %3245 = vset.pattern.permute.xlu0 %v3316_v52  ;;  %3246 = vset.pattern.permute.xlu1 %v3316_v52 }
 0xeec   : > { %v2454_v19 = vsel %vm408_vm5, %v2449_v43, %v2451_v50  ;;  %2570 = vmatpush1.bf16.msra.mxu1 %v2453_v17  ;;  %v2455_v53 = vsel %vm408_vm5, %v2451_v50, %v2453_v17  ;;  %v2465_v21 = vsel %vm420_vm6, %v2460_v44, %v2462_v51 }
 0xeed   : > { %2526 = vmatprep.subr.bf16.mxu0 %v2455_v53  ;;  %2571 = vmatprep.subr.bf16.mxu1 %v3297_v0 }
 0xeee   : > { %2527 = vmatpush1.bf16.msra.mxu0 %v2454_v19 }
 0xeef   : > { %v2464_v54 = vpop.permute.xlu0 %2463  ;;  %v2475_v56 = vpop.permute.xlu1 %2474 }
 0xef0   : > { %2572 = vmatpush1.bf16.msra.mxu1 %v2464_v54  ;;  %v2466_v20 = vsel %vm420_vm6, %v2462_v51, %v2464_v54 }
 0xef1   : > { %2528 = vmatprep.subr.bf16.mxu0 %v2466_v20  ;;  %2573 = vmatprep.subr.bf16.mxu1 %v3297_v0 }
 0xef2   : > { %2529 = vmatpush1.bf16.msra.mxu0 %v2465_v21 }
 0xef3   : > { %v2473_v55 = vpop.permute.xlu0 %2472  ;;  %v2484_v57 = vpop.permute.xlu1 %2483 }
 0xef4   : > { %v2476_v58 = vsel %vm432_vm7, %v2471_v47, %v2473_v55  ;;  %2574 = vmatpush1.bf16.msra.mxu1 %v2475_v56  ;;  %v2477_v22 = vsel %vm432_vm7, %v2473_v55, %v2475_v56 }
 0xef5   : > { %2530 = vmatprep.subr.bf16.mxu0 %v2477_v22  ;;  %2575 = vmatprep.subr.bf16.mxu1 %v3297_v0 }
 0xef6   : > { %2531 = vmatpush1.bf16.msra.mxu0 %v2476_v58 }
 0xef7   : > { %v2486_v59 = vpop.permute.xlu0 %2485  ;;  %v2482_v60 = vpop.permute.xlu1 %2481 }
 0xef8   : > { %v2487_v24 = vsel %vm444_vm8, %v2482_v60, %v2484_v57  ;;  %2576 = vmatpush1.bf16.msra.mxu1 %v2486_v59  ;;  %v2488_v8 = vsel %vm444_vm8, %v2484_v57, %v2486_v59 }
 0xef9   : > { %2532 = vmatprep.subr.bf16.mxu0 %v2488_v8  ;;  %2796 = vmatprep.subr.bf16.mxu1 %v3297_v0 }
 0xefa   : > { %2533 = vmatpush1.bf16.msra.mxu0 %v2487_v24 }
 0xefb   : > { %2592 = vmatmul.mubr.bf16.vlgmr.msra.gmra.mrb[36].mxu1 %v3282_v23 }
 0xefc   : > { %3159 = vmatprep.mubr.msk.bf16.mxu1 %vm471_vm0, %v3283_v18 }
 0xefd   : > { %2549 = vmatmul.mubr.bf16.vlgmr.msra.gmra.mrb[28].mxu0 %v3282_v23 }
 0xefe   : > { %3158 = vmatprep.mubr.msk.bf16.mxu0 %vm471_vm0, %v3283_v18 }
 0xf08   : > { %v2497_v10 = vpop.permute.xlu0 %2496  ;;  %v2502_v26 = vpop.permute.xlu1 %2501 }
 0xfce   : > { %v2593_v25 = vpop.f32.mrb[36].mxu1 }
 0xfcf   : > { %v2594_v27 = vadd.f32 %v2593_v25, %v2497_v10  ;;  %v2595_v28 = vpop.f32.mrb[37].mxu1 }
 0xfd0   : > { %v2550_v29 = vpop.f32.mrb[28].mxu0  ;;  %v2596_v30 = vpop.f32.mrb[38].mxu1 }
 0xfd1   : > { %v2602_v31 = vmul.f32 %v2594_v27, %v3463_v62  ;;  %v2551_v32 = vadd.f32 %v2550_v29, %v2497_v10  ;;  %v2597_v33 = vadd.f32 %v2596_v30, %v2502_v26  ;;  %v2552_v34 = vpop.f32.mrb[29].mxu0  ;;  %v2598_v35 = vpop.f32.mrb[39].mxu1 }
 0xfd2   : > { %v2553_v36 = vadd.f32 %v2552_v34, %v2497_v10  ;;  %v2554_v37 = vpop.f32.mrb[30].mxu0 }
 0xfd3   : > { %v2600_v13 = vmul.f32 %v2551_v32, %v3466_v4  ;;  %v2605_v49 = vmul.f32 %v2597_v33, %v3463_v62  ;;  %v2555_v39 = vadd.f32 %v2554_v37, %v2502_v26  ;;  %v2556_v40 = vpop.f32.mrb[31].mxu0  ;;  %v2608_v43 = vmax.f32 %v2602_v31, 0.0 }
 0xfd4   : > { %v2601_v41 = vmul.f32 %v2553_v36, %v3471_v9  ;;  %v2557_v42 = vadd.f32 %v2556_v40, %v2502_v26 }
 0xfd5   : > { %v2611_v44 = vmax.f32 %v2605_v49, 0.0  ;;  %v2603_v47 = vmul.f32 %v2555_v39, %v3466_v4  ;;  %v2606_v61 = vmax.f32 %v2600_v13, 0.0 }
 0xfd6   : > { %v2604_v12 = vmul.f32 %v2557_v42, %v3471_v9  ;;  %v2607_v5 = vmax.f32 %v2601_v41, 0.0 }
 0xfd7   : > { %v2609_v1 = vmax.f32 %v2603_v47, 0.0  ;;  %v2614_v3 = vpack.c.bf16 %v2611_v44, %v2608_v43  ;;  %v3285_v44 = vld [vmem:[%s4329_s3 + $0xa0] ss:$8 sps:$4 sm:$0xff]  }
 0xfd8   : > { %v2610_v6 = vmax.f32 %v2604_v12, 0.0 }
 0xfd9   : > { %v2612_v7 = vpack.c.bf16 %v2609_v1, %v2606_v61 }
 0xfda   : > { %v2613_v11 = vpack.c.bf16 %v2610_v6, %v2607_v5 }
 0xfdb   : > { %2618 = vrot.lane.b32.xlu1 %v2612_v7, %s3306_s24 }
 0xfdc   : > { %2620 = vrot.lane.b32.xlu0 %v2613_v11, %s3306_s24 }
 0xfdf   : > { %2622 = vrot.lane.b32.xlu1 %v2614_v3, %s3306_s24 }
0x104d   : > { %v2619_v16 = vpop.permute.xlu1 %2618 }
0x104e   : > { %2629 = vst.msk [vmem:[#allocation2] sm:$0xff] %vm601_vm11, %v2619_v16  ;;  %v2621_v46 = vpop.permute.xlu0 %2620 }
0x104f   : > { %v2624_v48 = vsel %vm287_vm9, %v2619_v16, %v2621_v46 }
0x1050   : > { %2753 = vmatprep.subr.bf16.mxu0 %v2624_v48 }
0x1051   : > { %v2623_v45 = vpop.permute.xlu1 %2622 }
0x1052   : > { %v2625_v2 = vsel %vm287_vm9, %v2621_v46, %v2623_v45 }
0x1053   : > { %2631 = vst.msk [vmem:[#allocation2 + $0x10] sm:$0xff] %vm604_vm12, %v2625_v2 }
0x1055   : > { %v2635_v14 = vld [vmem:[#allocation2] sm:$0xff] }
0x1056   : > { %2652 = vrot.lane.b32.xlu1 %v2635_v14, %s3299_s28  ;;  %2641 = vrot.lane.b32.xlu0 %v2635_v14, %s3298_s27 }
0x1057   : > { %2754 = vmatpush1.bf16.msra.mxu0 %v2635_v14 }
0x105a   : > { %2674 = vrot.lane.b32.xlu1 %v2635_v14, %s3301_s30  ;;  %2663 = vrot.lane.b32.xlu0 %v2635_v14, %s3300_s29  ;;  %v2637_v17 = vld [vmem:[#allocation2 + $0x10] sm:$0xff] }
0x105b   : > { %2797 = vmatpush1.bf16.msra.mxu1 %v2637_v17 }
0x105c   : > { %2798 = vmatprep.subr.bf16.mxu1 %v3297_v0 }
0x105e   : > { %2696 = vrot.lane.b32.xlu1 %v2635_v14, %s3303_s8  ;;  %2685 = vrot.lane.b32.xlu0 %v2635_v14, %s3302_s7 }
0x1062   : > { %2707 = vrot.lane.b32.xlu0 %v2635_v14, %s3304_s11  ;;  %2645 = vrot.lane.b32.xlu1 %v2637_v17, %s3298_s27 }
0x1066   : > { %2643 = vrot.lane.b32.xlu0 %v2624_v48, %s3298_s27  ;;  %2654 = vrot.lane.b32.xlu1 %v2624_v48, %s3299_s28 }
0x106a   : > { %2656 = vrot.lane.b32.xlu0 %v2637_v17, %s3299_s28  ;;  %2667 = vrot.lane.b32.xlu1 %v2637_v17, %s3300_s29 }
0x106e   : > { %2665 = vrot.lane.b32.xlu0 %v2624_v48, %s3300_s29  ;;  %2676 = vrot.lane.b32.xlu1 %v2624_v48, %s3301_s30 }
0x1072   : > { %2678 = vrot.lane.b32.xlu0 %v2637_v17, %s3301_s30  ;;  %2689 = vrot.lane.b32.xlu1 %v2637_v17, %s3302_s7 }
0x1076   : > { %2687 = vrot.lane.b32.xlu0 %v2624_v48, %s3302_s7  ;;  %2698 = vrot.lane.b32.xlu1 %v2624_v48, %s3303_s8 }
0x107a   : > { %2700 = vrot.lane.b32.xlu0 %v2637_v17, %s3303_s8  ;;  %2711 = vrot.lane.b32.xlu1 %v2637_v17, %s3304_s11  ;;  %s3317_s8 = smov 119  }
0x107e   : > { %2709 = vrot.lane.b32.xlu0 %v2624_v48, %s3304_s11  ;;  %2720 = vrot.lane.b32.xlu1 %v2624_v48, %s3305_s12 }
0x1082   : > { %2722 = vrot.lane.b32.xlu0 %v2637_v17, %s3305_s12  ;;  %2718 = vrot.lane.b32.xlu1 %v2635_v14, %s3305_s12 }
0x1086   : > { %2733 = vperm.xlu0 %3245, %v4194_v38   ;;  %2738 = vperm.xlu1 %3246, %v4199_v15  }
0x10c8   : > { %v2642_v50 = vpop.permute.xlu0 %2641  ;;  %v2653_v51 = vpop.permute.xlu1 %2652 }
0x10cc   : > { %v2664_v19 = vpop.permute.xlu0 %2663  ;;  %v2675_v53 = vpop.permute.xlu1 %2674 }
0x10d0   : > { %v2686_v54 = vpop.permute.xlu0 %2685  ;;  %v2697_v56 = vpop.permute.xlu1 %2696 }
0x10d4   : > { %v2708_v20 = vpop.permute.xlu0 %2707  ;;  %v2646_v21 = vpop.permute.xlu1 %2645 }
0x10d5   : > { %2799 = vmatpush1.bf16.msra.mxu1 %v2646_v21 }
0x10d6   : > { %2800 = vmatprep.subr.bf16.mxu1 %v3297_v0 }
0x10d8   : > { %v2644_v55 = vpop.permute.xlu0 %2643  ;;  %v2655_v57 = vpop.permute.xlu1 %2654 }
0x10d9   : > { %v2647_v58 = vsel %vm360_vm1, %v2642_v50, %v2644_v55  ;;  %v2648_v22 = vsel %vm360_vm1, %v2644_v55, %v2646_v21  ;;  %v2658_v24 = vsel %vm372_vm2, %v2653_v51, %v2655_v57  ;;  %vm4334_vm1 = vmmov 0  }
0x10da   : > { %2755 = vmatprep.subr.bf16.mxu0 %v2648_v22 }
0x10db   : > { %2756 = vmatpush1.bf16.msra.mxu0 %v2647_v58 }
0x10dc   : > { %v2657_v59 = vpop.permute.xlu0 %2656  ;;  %v2668_v60 = vpop.permute.xlu1 %2667 }
0x10dd   : > { %2801 = vmatpush1.bf16.msra.mxu1 %v2657_v59  ;;  %v2659_v23 = vsel %vm372_vm2, %v2655_v57, %v2657_v59  ;;  %vm2948_vm2 = vcmask 244736  }
0x10de   : > { %2757 = vmatprep.subr.bf16.mxu0 %v2659_v23  ;;  %2802 = vmatprep.subr.bf16.mxu1 %v3297_v0 }
0x10df   : > { %2758 = vmatpush1.bf16.msra.mxu0 %v2658_v24 }
0x10e0   : > { %v2666_v8 = vpop.permute.xlu0 %2665  ;;  %v2677_v10 = vpop.permute.xlu1 %2676 }
0x10e1   : > { %v2669_v25 = vsel %vm384_vm3, %v2664_v19, %v2666_v8  ;;  %2803 = vmatpush1.bf16.msra.mxu1 %v2668_v60  ;;  %v2670_v26 = vsel %vm384_vm3, %v2666_v8, %v2668_v60  ;;  %v2680_v30 = vsel %vm396_vm4, %v2675_v53, %v2677_v10 }
0x10e2   : > { %2759 = vmatprep.subr.bf16.mxu0 %v2670_v26  ;;  %2804 = vmatprep.subr.bf16.mxu1 %v3297_v0 }
0x10e3   : > { %2760 = vmatpush1.bf16.msra.mxu0 %v2669_v25 }
0x10e4   : > { %v2679_v27 = vpop.permute.xlu0 %2678  ;;  %v2690_v28 = vpop.permute.xlu1 %2689 }
0x10e5   : > { %2805 = vmatpush1.bf16.msra.mxu1 %v2679_v27  ;;  %v2681_v29 = vsel %vm396_vm4, %v2677_v10, %v2679_v27 }
0x10e6   : > { %2761 = vmatprep.subr.bf16.mxu0 %v2681_v29  ;;  %2806 = vmatprep.subr.bf16.mxu1 %v3297_v0 }
0x10e7   : > { %2762 = vmatpush1.bf16.msra.mxu0 %v2680_v30 }
0x10e8   : > { %v2688_v31 = vpop.permute.xlu0 %2687  ;;  %v2699_v32 = vpop.permute.xlu1 %2698 }
0x10e9   : > { %v2691_v33 = vsel %vm408_vm5, %v2686_v54, %v2688_v31  ;;  %2807 = vmatpush1.bf16.msra.mxu1 %v2690_v28  ;;  %v2692_v34 = vsel %vm408_vm5, %v2688_v31, %v2690_v28  ;;  %v2702_v13 = vsel %vm420_vm6, %v2697_v56, %v2699_v32 }
0x10ea   : > { %2763 = vmatprep.subr.bf16.mxu0 %v2692_v34  ;;  %2808 = vmatprep.subr.bf16.mxu1 %v3297_v0 }
0x10eb   : > { %2764 = vmatpush1.bf16.msra.mxu0 %v2691_v33 }
0x10ec   : > { %v2701_v35 = vpop.permute.xlu0 %2700  ;;  %v2712_v36 = vpop.permute.xlu1 %2711 }
0x10ed   : > { %2809 = vmatpush1.bf16.msra.mxu1 %v2701_v35  ;;  %v2703_v37 = vsel %vm420_vm6, %v2699_v32, %v2701_v35 }
0x10ee   : > { %2765 = vmatprep.subr.bf16.mxu0 %v2703_v37  ;;  %2810 = vmatprep.subr.bf16.mxu1 %v3297_v0 }
0x10ef   : > { %2766 = vmatpush1.bf16.msra.mxu0 %v2702_v13 }
0x10f0   : > { %v2710_v49 = vpop.permute.xlu0 %2709  ;;  %v2721_v39 = vpop.permute.xlu1 %2720 }
0x10f1   : > { %v2713_v40 = vsel %vm432_vm7, %v2708_v20, %v2710_v49  ;;  %2811 = vmatpush1.bf16.msra.mxu1 %v2712_v36  ;;  %v2714_v41 = vsel %vm432_vm7, %v2710_v49, %v2712_v36 }
0x10f2   : > { %2767 = vmatprep.subr.bf16.mxu0 %v2714_v41  ;;  %2812 = vmatprep.subr.bf16.mxu1 %v3297_v0 }
0x10f3   : > { %2768 = vmatpush1.bf16.msra.mxu0 %v2713_v40 }
0x10f4   : > { %v2723_v42 = vpop.permute.xlu0 %2722  ;;  %v2719_v43 = vpop.permute.xlu1 %2718 }
0x10f5   : > { %v2724_v47 = vsel %vm444_vm8, %v2719_v43, %v2721_v39  ;;  %2813 = vmatpush1.bf16.msra.mxu1 %v2723_v42  ;;  %v2725_v12 = vsel %vm444_vm8, %v2721_v39, %v2723_v42 }
0x10f6   : > { %2769 = vmatprep.subr.bf16.mxu0 %v2725_v12  ;;  %3183 = vmatprep.subr.bf16.mxu1 %v3310_v63 }
0x10f7   : > { %2770 = vmatpush1.bf16.msra.mxu0 %v2724_v47 }
0x10f8   : > { %2829 = vmatmul.mubr.bf16.vlgmr.msra.gmra.mrb[40].mxu1 %v3285_v44 }
0x10f9   : > { %3185 = vmatprep.mubr.msk.bf16.mxu1 %vm4334_vm1, %v3310_v63 }
0x10fa   : > { %2786 = vmatmul.mubr.bf16.vlgmr.msra.gmra.mrb[32].mxu0 %v3285_v44 }
0x10fb   : > { %2895 = vmatprep.mubr.bf16.mxu0 %v3297_v0 }
0x1105   : > { %v2734_v61 = vpop.permute.xlu0 %2733  ;;  %v2739_v3 = vpop.permute.xlu1 %2738 }
0x11cb   : > { %v2830_v1 = vpop.f32.mrb[40].mxu1 }
0x11cc   : > { %v2831_v5 = vadd.f32 %v2830_v1, %v2734_v61  ;;  %v2832_v6 = vpop.f32.mrb[41].mxu1 }
0x11cd   : > { %v2787_v7 = vpop.f32.mrb[32].mxu0  ;;  %v2833_v11 = vpop.f32.mrb[42].mxu1 }
0x11ce   : > { %v2839_v16 = vmul.f32 %v2831_v5, %v3463_v62  ;;  %v2788_v46 = vadd.f32 %v2787_v7, %v2734_v61  ;;  %v2834_v48 = vadd.f32 %v2833_v11, %v2739_v3  ;;  %v2789_v45 = vpop.f32.mrb[33].mxu0  ;;  %v2835_v2 = vpop.f32.mrb[43].mxu1 }
0x11cf   : > { %v2790_v14 = vadd.f32 %v2789_v45, %v2734_v61  ;;  %v2791_v17 = vpop.f32.mrb[34].mxu0 }
0x11d0   : > { %v2837_v63 = vmul.f32 %v2788_v46, %v3466_v4  ;;  %v2842_v18 = vmul.f32 %v2834_v48, %v3463_v62  ;;  %v2792_v0 = vadd.f32 %v2791_v17, %v2739_v3  ;;  %v2793_v52 = vpop.f32.mrb[35].mxu0  ;;  %v2845_v19 = vmax.f32 %v2839_v16, 0.0  ;;  %v3286_v62 = vld [vmem:[%s4329_s3 + $0xb0] ss:$8 sps:$4 sm:$0xff]  }
0x11d1   : > { %v2838_v50 = vmul.f32 %v2790_v14, %v3471_v9  ;;  %v2794_v51 = vadd.f32 %v2793_v52, %v2739_v3 }
0x11d2   : > { %v2848_v53 = vmax.f32 %v2842_v18, 0.0  ;;  %v2840_v54 = vmul.f32 %v2792_v0, %v3466_v4  ;;  %v2843_v20 = vmax.f32 %v2837_v63, 0.0 }
0x11d3   : > { %v2841_v56 = vmul.f32 %v2794_v51, %v3471_v9  ;;  %v2844_v57 = vmax.f32 %v2838_v50, 0.0 }
0x11d4   : > { %v2846_v21 = vmax.f32 %v2840_v54, 0.0  ;;  %v2854_v55 = vpack.c.bf16 %v2848_v53, %v2845_v19 }
0x11d5   : > { %v2847_v58 = vmax.f32 %v2841_v56, 0.0 }
0x11d6   : > { %v2852_v22 = vpack.c.bf16 %v2846_v21, %v2843_v20  ;;  %3184 = vmatpush3.bf16.msra.mxu1 %v2854_v55 }
0x11d7   : > { %v2853_v59 = vpack.c.bf16 %v2847_v58, %v2844_v57 }
0x11d9   : > { %2863 = vmatprep.subr.bf16.mxu0 %v2853_v59  ;;  %3186 = vmatmul.mubr.msk.bf16.vlgmr.msra.gmra.mrb[44].mxu1 %vm471_vm0, %v3286_v62 }
0x11da   : > { %2864 = vmatpush1.bf16.msra.mxu0 %v2852_v22 }
0x11dd   : > { %3163 = vmatmul.mubr.msk.bf16.vlgmr.msra.gmra.mrb[36].mxu0 %vm471_vm0, %v3286_v62  ;;  %vm2970_vm0 = vcmask 7168  }
0x12ac   : > { %v2940_v4 = vpop.f32.mrb[44].mxu1 }
0x12ad   : > { %v3187_v9 = vpop.f32.mrb[45].mxu1  ;;  %v2949_v10 = vsel %vm2948_vm2, %v2940_v4, 0.0 }
0x12ae   : > { %v2943_v60 = vpop.f32.mrb[46].mxu1 }
0x12af   : > { %v3188_v23 = vpop.f32.mrb[47].mxu1  ;;  %v2954_v30 = vsel %vm2948_vm2, %v2943_v60, 0.0 }
0x12b0   : > { %v2897_v24 = vpop.f32.mrb[36].mxu0 }
0x12b1   : > { %v2899_v8 = vpop.f32.mrb[37].mxu0 }
0x12b2   : > { %v2947_v25 = vadd.f32 %v2899_v8, %v2897_v24  ;;  %v2901_v26 = vpop.f32.mrb[38].mxu0 }
0x12b3   : > { %v2903_v27 = vpop.f32.mrb[39].mxu0 }
0x12b4   : > { %v2950_v28 = vadd.f32 %v2949_v10, %v2947_v25  ;;  %v2953_v29 = vadd.f32 %v2903_v27, %v2901_v26 }
0x12b6   : > { %v2955_v31 = vadd.f32 %v2954_v30, %v2953_v29  ;;  %2951 = vadd.xlane.f32.xlu1 %v2950_v28 }
0x12b8   : > { %2956 = vadd.xlane.f32.xlu0 %v2955_v31 }
0x1343   : > { %v2952_v32 = vpop.xlane.xlu1 %2951 }
0x1344   : > { %v2958_v33 = vmul.f32 0.00390625, %v2952_v32 }
0x1345   : > { %v2957_v34 = vpop.xlane.xlu0 %2956 }
0x1346   : > { %v2960_v35 = vadd.f32 %v2958_v33, %v4194_v38  ;;  %v2959_v36 = vmul.f32 0.00390625, %v2957_v34 }
0x1348   : > { %v2961_v37 = vadd.f32 %v2959_v36, %v4199_v15  ;;  %2964 = vrot.lane.b32.xlu0 %v2960_v35, %s3317_s8 }
0x134a   : > { %2966 = vrot.lane.b32.xlu1 %v2961_v37, %s3317_s8 }
0x13ba   : > { %v2965_v13 = vpop.permute.xlu0 %2964 }
0x13bb   : > { %2971 = vst.msk [vmem:[%s284_s16] sm:$0xff] %vm2970_vm0, %v2965_v13 }
0x13bc   : > { %v2967_v49 = vpop.permute.xlu1 %2966 }
0x13bd   : > { %2972 = vst.msk [vmem:[%s284_s16 + $0x8] sm:$0xff] %vm2970_vm0, %v2967_v49 }
0x13be PF: > { %s17_s21 = sadd.s32 1, %s3295_s21  }
0x13bf   : > { %p14_p4 = scmp.ge.s32.totalorder %s17_s21, 4  }
0x13c1   :  { %16 = sbr.rel (!%p14_p4) target bundleno = 1 (0x1), region = 96 }

</bundles_post_ra>
